<compile_context>
chip_gen: v7x
topology: tpu7x:2x2x1
jax: 0.10.0
libtpu: 0.0.40
codegen_flags: <defaults>
</compile_context>

<pallas_src>
import functools

import jax
import jax.numpy as jnp
from jax.experimental import pallas as pl
from jax.experimental.pallas import tpu as pltpu


# ----------------------------- in-kernel helpers -----------------------------

def _ln(x, g, b, eps=1e-5):
    """LayerNorm over the last axis (PyTorch semantics: biased var, eps in sqrt)."""
    mu = jnp.mean(x, axis=-1, keepdims=True)
    xc = x - mu
    var = jnp.mean(xc * xc, axis=-1, keepdims=True)
    return xc * jax.lax.rsqrt(var + eps) * g + b


# ----------------------------- fused Pallas kernel -----------------------------

def _encoder_kernel(num_heads,
                    x_ref, pos_ref,
                    emb_w_ref, emb_b_ref, emb_g_ref, emb_be_ref,
                    wqkv_ref, bqkv_ref, wo_ref, bo_ref,
                    ln1_g_ref, ln1_b_ref,
                    w1_ref, b1_ref, w2_ref, b2_ref,
                    ln2_g_ref, ln2_b_ref,
                    fc_w_ref, fc_b_ref, fc_g_ref, fc_be_ref,
                    o_ref):
    """One grid step == one batch TILE (tb batch elements), full forward in VMEM.

    x_ref:  (tb, S, Din)         pos_ref: (S, H)
    emb_*:  (Din,H)/(1,H)        wqkv: (L,H,3H)  bqkv: (L,1,3H)
    wo: (L,H,H)  bo/ln*: (L,1,H) w1: (L,H,F) b1: (L,1,F) w2: (L,F,H) b2: (L,1,H)
    fc_*:   (H,Dout)/(1,Dout)    o_ref: (tb, S, Dout)
    """
    TB, S, Din = x_ref.shape
    M = TB * S
    H = emb_w_ref.shape[1]
    L = wqkv_ref.shape[0]
    NH = num_heads
    HD = H // NH
    scale = 1.0 / float(HD) ** 0.5
    f32 = jnp.float32

    # ---- embedding: Linear + LayerNorm over all M tokens, add pos-embedding ----
    x = x_ref[...].reshape(M, Din)
    h = jnp.dot(x, emb_w_ref[...], preferred_element_type=f32) + emb_b_ref[...]
    h = _ln(h, emb_g_ref[...], emb_be_ref[...])
    # pos (S, H) broadcasts over the batch-tile axis.
    h = (h.reshape(TB, S, H) + pos_ref[...]).reshape(M, H)

    # ---- transformer encoder layers (post-LN, ReLU FFN, no dropout) ----
    for l in range(L):                                            # static unroll
        # Fused QKV projection: a single MXU matmul with K=H, N=3H over all tokens.
        qkv = jnp.dot(h, wqkv_ref[l], preferred_element_type=f32) + bqkv_ref[l]
        attn_rows = []
        for b in range(TB):                                       # static unroll
            r0 = b * S                                            # sublane-aligned
            heads = []
            for hh in range(NH):                                  # static unroll
                q = qkv[r0:r0 + S, hh * HD:(hh + 1) * HD]         # (S, HD)
                k = qkv[r0:r0 + S, H + hh * HD:H + (hh + 1) * HD]
                v = qkv[r0:r0 + S, 2 * H + hh * HD:2 * H + (hh + 1) * HD]
                # q @ k^T without an explicit transpose (contract last dims).
                s = jax.lax.dot_general(q, k, (((1,), (1,)), ((), ())),
                                        preferred_element_type=f32) * scale
                s = s - jnp.max(s, axis=-1, keepdims=True)
                p = jnp.exp(s)
                p = p / jnp.sum(p, axis=-1, keepdims=True)
                heads.append(jnp.dot(p, v, preferred_element_type=f32))
            attn_rows.append(jnp.concatenate(heads, axis=-1))     # (S, H)
        attn = jnp.concatenate(attn_rows, axis=0)                 # (M, H)
        attn = jnp.dot(attn, wo_ref[l], preferred_element_type=f32) + bo_ref[l]
        h = _ln(h + attn, ln1_g_ref[l], ln1_b_ref[l])             # norm1(x + attn)

        ff = jnp.dot(h, w1_ref[l], preferred_element_type=f32) + b1_ref[l]
        ff = jnp.maximum(ff, 0.0)                                 # ReLU
        ff = jnp.dot(ff, w2_ref[l], preferred_element_type=f32) + b2_ref[l]
        h = _ln(h + ff, ln2_g_ref[l], ln2_b_ref[l])               # norm2(x + ff)

    # ---- output head: Linear + LayerNorm ----
    y = jnp.dot(h, fc_w_ref[...], preferred_element_type=f32) + fc_b_ref[...]
    y = _ln(y, fc_g_ref[...], fc_be_ref[...])
    o_ref[...] = y.reshape(TB, S, -1)


# ----------------------------- wrapper -----------------------------

_PARAM_ORDER = ('pos', 'emb_w', 'emb_b', 'emb_g', 'emb_beta',
                'wqkv', 'bqkv', 'wo', 'bo', 'ln1_g', 'ln1_b',
                'w1', 'b1', 'w2', 'b2', 'ln2_g', 'ln2_b',
                'fc_w', 'fc_b', 'fc_g', 'fc_beta')

_MAX_TOKENS_PER_STEP = 1024   # flattened M per grid step; activations stay tiny in VMEM


def _pick_batch_tile(B, S):
    """Largest divisor of B keeping the flattened token count per step modest."""
    best = 1
    for t in range(1, B + 1):
        if B % t == 0 and t * S <= _MAX_TOKENS_PER_STEP:
            best = t
    return best


def ginka_transformer_encoder(x, params, num_heads):
    """Forward of GinkaTransformerEncoder. x: (B, token_size, in_dim//token_size)."""
    B, S, Din = x.shape
    Dout = params['fc_w'].shape[1]
    tb = _pick_batch_tile(B, S)
    args = [params[k] for k in _PARAM_ORDER]

    def whole(a):
        # Full-array block, constant block index -> DMA'd once, VMEM-resident
        # across all grid steps.
        z = (0,) * a.ndim
        return pl.BlockSpec(a.shape, lambda b, _z=z: _z)

    in_specs = [pl.BlockSpec((tb, S, Din), lambda b: (b, 0, 0))] + [whole(a) for a in args]
    out_specs = pl.BlockSpec((tb, S, Dout), lambda b: (b, 0, 0))

    return pl.pallas_call(
        functools.partial(_encoder_kernel, num_heads),
        out_shape=jax.ShapeDtypeStruct((B, S, Dout), jnp.float32),
        grid=(B // tb,),
        in_specs=in_specs,
        out_specs=out_specs,
        compiler_params=pltpu.CompilerParams(
            dimension_semantics=("parallel",)),   # batch tiles across TCs on v7x
    )(x, *args)


# ----------------------------- parameters -----------------------------

def init_params(key, in_dim, hidden_dim, out_dim, token_size, ff_dim, num_layers):
    """Deterministic init roughly matching PyTorch Linear fan-in scaling."""
    Din = in_dim // token_size
    H = hidden_dim // token_size
    Dout = out_dim // token_size
    F = ff_dim
    S = token_size
    L = num_layers

    ks = iter(jax.random.split(key, 32))

    def uni(shape, fan_in):
        bound = 1.0 / float(fan_in) ** 0.5
        return jax.random.uniform(next(ks), shape, jnp.float32, -bound, bound)

    p = {
        'emb_w': uni((Din, H), Din),
        'emb_b': uni((1, H), Din),
        'emb_g': jnp.ones((1, H), jnp.float32),
        'emb_beta': jnp.zeros((1, H), jnp.float32),
        'pos': jax.random.normal(next(ks), (S, H), jnp.float32),
        'wqkv': uni((L, H, 3 * H), H),
        'bqkv': uni((L, 1, 3 * H), H),
        'wo': uni((L, H, H), H),
        'bo': uni((L, 1, H), H),
        'ln1_g': jnp.ones((L, 1, H), jnp.float32),
        'ln1_b': jnp.zeros((L, 1, H), jnp.float32),
        'w1': uni((L, H, F), H),
        'b1': uni((L, 1, F), H),
        'w2': uni((L, F, H), F),
        'b2': uni((L, 1, H), F),
        'ln2_g': jnp.ones((L, 1, H), jnp.float32),
        'ln2_b': jnp.zeros((L, 1, H), jnp.float32),
        'fc_w': uni((H, Dout), H),
        'fc_b': uni((1, Dout), H),
        'fc_g': jnp.ones((1, Dout), jnp.float32),
        'fc_beta': jnp.zeros((1, Dout), jnp.float32),
    }
    return p


# ----------------------------- pure-JAX reference -----------------------------

def _ln_ref(x, g, b, eps=1e-5):
    mu = jnp.mean(x, axis=-1, keepdims=True)
    var = jnp.mean((x - mu) ** 2, axis=-1, keepdims=True)
    return (x - mu) * jax.lax.rsqrt(var + eps) * g + b


def reference_forward(x, p, num_heads):
    hp = jax.lax.Precision.HIGHEST
    B, S, Din = x.shape
    H = p['emb_w'].shape[1]
    NH = num_heads
    HD = H // NH
    scale = 1.0 / float(HD) ** 0.5

    h = jnp.dot(x.reshape(B * S, Din), p['emb_w'], precision=hp) + p['emb_b']
    h = _ln_ref(h, p['emb_g'], p['emb_beta'])
    h = (h.reshape(B, S, H) + p['pos'][None]).reshape(B * S, H)

    L = p['wqkv'].shape[0]
    for l in range(L):
        qkv = jnp.dot(h, p['wqkv'][l], precision=hp) + p['bqkv'][l]
        q = qkv[:, :H].reshape(B, S, NH, HD)
        k = qkv[:, H:2 * H].reshape(B, S, NH, HD)
        v = qkv[:, 2 * H:].reshape(B, S, NH, HD)
        s = jnp.einsum('bqhd,bkhd->bhqk', q, k, precision=hp) * scale
        a = jax.nn.softmax(s, axis=-1)
        o = jnp.einsum('bhqk,bkhd->bqhd', a, v, precision=hp).reshape(B * S, H)
        attn = jnp.dot(o, p['wo'][l], precision=hp) + p['bo'][l]
        h = _ln_ref(h + attn, p['ln1_g'][l], p['ln1_b'][l])
        ff = jax.nn.relu(jnp.dot(h, p['w1'][l], precision=hp) + p['b1'][l])
        ff = jnp.dot(ff, p['w2'][l], precision=hp) + p['b2'][l]
        h = _ln_ref(h + ff, p['ln2_g'][l], p['ln2_b'][l])

    y = jnp.dot(h, p['fc_w'], precision=hp) + p['fc_b']
    y = _ln_ref(y, p['fc_g'], p['fc_beta'])
    return y.reshape(B, S, -1)


# ----------------------------- demo -----------------------------

if __name__ == "__main__":
    key = jax.random.PRNGKey(0)
    kx, kp = jax.random.split(key)

    # Small shapes consistent with the module: per-token dims = dim // token_size.
    B = 2
    token_size = 8                         # sequence length
    in_dim, hidden_dim, out_dim = 256, 512, 256   # per-token: 32 / 64 / 32
    ff_dim = 128
    num_heads = 8                          # head_dim = 8
    num_layers = 2

    Din = in_dim // token_size
    Dout = out_dim // token_size
    x = jax.random.normal(kx, (B, token_size, Din), jnp.float32)
    params = init_params(kp, in_dim, hidden_dim, out_dim, token_size, ff_dim, num_layers)

    fwd = jax.jit(functools.partial(ginka_transformer_encoder, num_heads=num_heads))
    out = jax.block_until_ready(fwd(x, params))

    assert out.shape == (B, token_size, Dout), out.shape
    assert bool(jnp.all(jnp.isfinite(out)))

    ref = reference_forward(x, params, num_heads)
    err = float(jnp.max(jnp.abs(out - ref)))
    assert err < 5e-3, f"max abs error vs reference: {err}"

    print("KERNEL_OK")
</pallas_src>

<mosaic_0001>
module attributes {stable_mosaic.version = 11 : i64} {
  func.func @_encoder_kernel(%arg0: i32, %arg1: memref<2x8x32xf32, #tpu.memory_space<vmem>>, %arg2: memref<8x64xf32, #tpu.memory_space<vmem>>, %arg3: memref<32x64xf32, #tpu.memory_space<vmem>>, %arg4: memref<1x64xf32, #tpu.memory_space<vmem>>, %arg5: memref<1x64xf32, #tpu.memory_space<vmem>>, %arg6: memref<1x64xf32, #tpu.memory_space<vmem>>, %arg7: memref<2x64x192xf32, #tpu.memory_space<vmem>>, %arg8: memref<2x1x192xf32, #tpu.memory_space<vmem>>, %arg9: memref<2x64x64xf32, #tpu.memory_space<vmem>>, %arg10: memref<2x1x64xf32, #tpu.memory_space<vmem>>, %arg11: memref<2x1x64xf32, #tpu.memory_space<vmem>>, %arg12: memref<2x1x64xf32, #tpu.memory_space<vmem>>, %arg13: memref<2x64x128xf32, #tpu.memory_space<vmem>>, %arg14: memref<2x1x128xf32, #tpu.memory_space<vmem>>, %arg15: memref<2x128x64xf32, #tpu.memory_space<vmem>>, %arg16: memref<2x1x64xf32, #tpu.memory_space<vmem>>, %arg17: memref<2x1x64xf32, #tpu.memory_space<vmem>>, %arg18: memref<2x1x64xf32, #tpu.memory_space<vmem>>, %arg19: memref<64x32xf32, #tpu.memory_space<vmem>>, %arg20: memref<1x32xf32, #tpu.memory_space<vmem>>, %arg21: memref<1x32xf32, #tpu.memory_space<vmem>>, %arg22: memref<1x32xf32, #tpu.memory_space<vmem>>, %arg23: memref<2x8x32xf32, #tpu.memory_space<vmem>>) attributes {dimension_semantics = [#tpu.dimension_semantics<parallel>], iteration_bounds = array<i64: 1>, scalar_prefetch = 0 : i64, scratch_operands = 0 : i64, tpu.core_type = #tpu.core_type<tc>, window_params = [{transform_indices = @transform_0, window_bounds = array<i64: 2, 8, 32>}, {pipeline_mode = #tpu.pipeline_mode<synchronous>, transform_indices = @transform_1, window_bounds = array<i64: 8, 64>}, {pipeline_mode = #tpu.pipeline_mode<synchronous>, transform_indices = @transform_2, window_bounds = array<i64: 32, 64>}, {pipeline_mode = #tpu.pipeline_mode<synchronous>, transform_indices = @transform_3, window_bounds = array<i64: 1, 64>}, {pipeline_mode = #tpu.pipeline_mode<synchronous>, transform_indices = @transform_4, window_bounds = array<i64: 1, 64>}, {pipeline_mode = #tpu.pipeline_mode<synchronous>, transform_indices = @transform_5, window_bounds = array<i64: 1, 64>}, {pipeline_mode = #tpu.pipeline_mode<synchronous>, transform_indices = @transform_6, window_bounds = array<i64: 2, 64, 192>}, {pipeline_mode = #tpu.pipeline_mode<synchronous>, transform_indices = @transform_7, window_bounds = array<i64: 2, 1, 192>}, {pipeline_mode = #tpu.pipeline_mode<synchronous>, transform_indices = @transform_8, window_bounds = array<i64: 2, 64, 64>}, {pipeline_mode = #tpu.pipeline_mode<synchronous>, transform_indices = @transform_9, window_bounds = array<i64: 2, 1, 64>}, {pipeline_mode = #tpu.pipeline_mode<synchronous>, transform_indices = @transform_10, window_bounds = array<i64: 2, 1, 64>}, {pipeline_mode = #tpu.pipeline_mode<synchronous>, transform_indices = @transform_11, window_bounds = array<i64: 2, 1, 64>}, {pipeline_mode = #tpu.pipeline_mode<synchronous>, transform_indices = @transform_12, window_bounds = array<i64: 2, 64, 128>}, {pipeline_mode = #tpu.pipeline_mode<synchronous>, transform_indices = @transform_13, window_bounds = array<i64: 2, 1, 128>}, {pipeline_mode = #tpu.pipeline_mode<synchronous>, transform_indices = @transform_14, window_bounds = array<i64: 2, 128, 64>}, {pipeline_mode = #tpu.pipeline_mode<synchronous>, transform_indices = @transform_15, window_bounds = array<i64: 2, 1, 64>}, {pipeline_mode = #tpu.pipeline_mode<synchronous>, transform_indices = @transform_16, window_bounds = array<i64: 2, 1, 64>}, {pipeline_mode = #tpu.pipeline_mode<synchronous>, transform_indices = @transform_17, window_bounds = array<i64: 2, 1, 64>}, {pipeline_mode = #tpu.pipeline_mode<synchronous>, transform_indices = @transform_18, window_bounds = array<i64: 64, 32>}, {pipeline_mode = #tpu.pipeline_mode<synchronous>, transform_indices = @transform_19, window_bounds = array<i64: 1, 32>}, {pipeline_mode = #tpu.pipeline_mode<synchronous>, transform_indices = @transform_20, window_bounds = array<i64: 1, 32>}, {pipeline_mode = #tpu.pipeline_mode<synchronous>, transform_indices = @transform_21, window_bounds = array<i64: 1, 32>}, {transform_indices = @transform_22, window_bounds = array<i64: 2, 8, 32>}]} {
    %c0 = arith.constant 0 : index
    %c0_0 = arith.constant 0 : index
    %c0_1 = arith.constant 0 : index
    %0 = vector.load %arg1[%c0, %c0_0, %c0_1] : memref<2x8x32xf32, #tpu.memory_space<vmem>>, vector<2x8x32xf32>
    %1 = vector.shape_cast %0 : vector<2x8x32xf32> to vector<16x32xf32>
    %c0_2 = arith.constant 0 : index
    %c0_3 = arith.constant 0 : index
    %2 = vector.load %arg3[%c0_2, %c0_3] : memref<32x64xf32, #tpu.memory_space<vmem>>, vector<32x64xf32>
    %cst = arith.constant dense<0.000000e+00> : vector<16x64xf32>
    %3 = tpu.matmul %1, %2, %cst {dimension_numbers = #tpu.dot_dimension_numbers<[1], [0], [0], [1], [0, 0, 1, 1], [], []>} : vector<16x32xf32>, vector<32x64xf32>, vector<16x64xf32> -> vector<16x64xf32>
    %c0_4 = arith.constant 0 : index
    %c0_5 = arith.constant 0 : index
    %4 = vector.load %arg4[%c0_4, %c0_5] : memref<1x64xf32, #tpu.memory_space<vmem>>, vector<1x64xf32>
    %5 = vector.broadcast %4 : vector<1x64xf32> to vector<16x64xf32>
    %6 = arith.addf %3, %5 : vector<16x64xf32>
    %c0_6 = arith.constant 0 : index
    %c0_7 = arith.constant 0 : index
    %7 = vector.load %arg5[%c0_6, %c0_7] : memref<1x64xf32, #tpu.memory_space<vmem>>, vector<1x64xf32>
    %c0_8 = arith.constant 0 : index
    %c0_9 = arith.constant 0 : index
    %8 = vector.load %arg6[%c0_8, %c0_9] : memref<1x64xf32, #tpu.memory_space<vmem>>, vector<1x64xf32>
    %cst_10 = arith.constant dense<0.000000e+00> : vector<16xf32>
    %9 = vector.multi_reduction <add>, %6, %cst_10 [1] : vector<16x64xf32> to vector<16xf32>
    %10 = vector.shape_cast %9 : vector<16xf32> to vector<16x1xf32>
    %cst_11 = arith.constant 6.400000e+01 : f32
    %11 = vector.broadcast %cst_11 : f32 to vector<16x1xf32>
    %12 = arith.divf %10, %11 : vector<16x1xf32>
    %13 = vector.broadcast %12 : vector<16x1xf32> to vector<16x64xf32>
    %14 = arith.subf %6, %13 : vector<16x64xf32>
    %15 = arith.mulf %14, %14 : vector<16x64xf32>
    %cst_12 = arith.constant dense<0.000000e+00> : vector<16xf32>
    %16 = vector.multi_reduction <add>, %15, %cst_12 [1] : vector<16x64xf32> to vector<16xf32>
    %17 = vector.shape_cast %16 : vector<16xf32> to vector<16x1xf32>
    %cst_13 = arith.constant 6.400000e+01 : f32
    %18 = vector.broadcast %cst_13 : f32 to vector<16x1xf32>
    %19 = arith.divf %17, %18 : vector<16x1xf32>
    %cst_14 = arith.constant 9.99999974E-6 : f32
    %20 = vector.broadcast %cst_14 : f32 to vector<16x1xf32>
    %21 = arith.addf %19, %20 : vector<16x1xf32>
    %22 = math.rsqrt %21 : vector<16x1xf32>
    %23 = vector.broadcast %22 : vector<16x1xf32> to vector<16x64xf32>
    %24 = arith.mulf %14, %23 : vector<16x64xf32>
    %25 = vector.broadcast %7 : vector<1x64xf32> to vector<16x64xf32>
    %26 = arith.mulf %24, %25 : vector<16x64xf32>
    %27 = vector.broadcast %8 : vector<1x64xf32> to vector<16x64xf32>
    %28 = arith.addf %26, %27 : vector<16x64xf32>
    %29 = vector.shape_cast %28 : vector<16x64xf32> to vector<2x8x64xf32>
    %c0_15 = arith.constant 0 : index
    %c0_16 = arith.constant 0 : index
    %30 = vector.load %arg2[%c0_15, %c0_16] : memref<8x64xf32, #tpu.memory_space<vmem>>, vector<8x64xf32>
    %31 = vector.shape_cast %30 : vector<8x64xf32> to vector<1x8x64xf32>
    %32 = vector.broadcast %31 : vector<1x8x64xf32> to vector<2x8x64xf32>
    %33 = arith.addf %29, %32 : vector<2x8x64xf32>
    %34 = vector.shape_cast %33 : vector<2x8x64xf32> to vector<16x64xf32>
    %c0_17 = arith.constant 0 : index
    %c0_18 = arith.constant 0 : index
    %c0_19 = arith.constant 0 : index
    %35 = vector.load %arg7[%c0_17, %c0_18, %c0_19] : memref<2x64x192xf32, #tpu.memory_space<vmem>>, vector<1x64x192xf32>
    %36 = vector.shape_cast %35 : vector<1x64x192xf32> to vector<64x192xf32>
    %cst_20 = arith.constant dense<0.000000e+00> : vector<16x192xf32>
    %37 = tpu.matmul %34, %36, %cst_20 {dimension_numbers = #tpu.dot_dimension_numbers<[1], [0], [0], [1], [0, 0, 1, 1], [], []>} : vector<16x64xf32>, vector<64x192xf32>, vector<16x192xf32> -> vector<16x192xf32>
    %c0_21 = arith.constant 0 : index
    %c0_22 = arith.constant 0 : index
    %c0_23 = arith.constant 0 : index
    %38 = vector.load %arg8[%c0_21, %c0_22, %c0_23] : memref<2x1x192xf32, #tpu.memory_space<vmem>>, vector<1x1x192xf32>
    %39 = vector.shape_cast %38 : vector<1x1x192xf32> to vector<1x192xf32>
    %40 = vector.broadcast %39 : vector<1x192xf32> to vector<16x192xf32>
    %41 = arith.addf %37, %40 : vector<16x192xf32>
    %42 = vector.extract_strided_slice %41 {offsets = [0, 0], sizes = [8, 8], strides = [1, 1]} : vector<16x192xf32> to vector<8x8xf32>
    %43 = vector.extract_strided_slice %41 {offsets = [0, 64], sizes = [8, 8], strides = [1, 1]} : vector<16x192xf32> to vector<8x8xf32>
    %44 = vector.extract_strided_slice %41 {offsets = [0, 128], sizes = [8, 8], strides = [1, 1]} : vector<16x192xf32> to vector<8x8xf32>
    %cst_24 = arith.constant dense<0.000000e+00> : vector<8x8xf32>
    %45 = tpu.matmul %42, %43, %cst_24 {dimension_numbers = #tpu.dot_dimension_numbers<[1], [1], [0], [0], [0, 0, 1, 0], [], []>} : vector<8x8xf32>, vector<8x8xf32>, vector<8x8xf32> -> vector<8x8xf32>
    %cst_25 = arith.constant 0.353553385 : f32
    %46 = vector.broadcast %cst_25 : f32 to vector<8x8xf32>
    %47 = arith.mulf %45, %46 : vector<8x8xf32>
    %cst_26 = arith.constant dense<0xFF800000> : vector<8xf32>
    %48 = vector.multi_reduction <maximumf>, %47, %cst_26 [1] : vector<8x8xf32> to vector<8xf32>
    %49 = vector.shape_cast %48 : vector<8xf32> to vector<8x1xf32>
    %50 = vector.broadcast %49 : vector<8x1xf32> to vector<8x8xf32>
    %51 = arith.subf %47, %50 : vector<8x8xf32>
    %52 = math.exp %51 : vector<8x8xf32>
    %cst_27 = arith.constant dense<0.000000e+00> : vector<8xf32>
    %53 = vector.multi_reduction <add>, %52, %cst_27 [1] : vector<8x8xf32> to vector<8xf32>
    %54 = vector.shape_cast %53 : vector<8xf32> to vector<8x1xf32>
    %55 = vector.broadcast %54 : vector<8x1xf32> to vector<8x8xf32>
    %56 = arith.divf %52, %55 : vector<8x8xf32>
    %cst_28 = arith.constant dense<0.000000e+00> : vector<8x8xf32>
    %57 = tpu.matmul %56, %44, %cst_28 {dimension_numbers = #tpu.dot_dimension_numbers<[1], [0], [0], [1], [0, 0, 1, 1], [], []>} : vector<8x8xf32>, vector<8x8xf32>, vector<8x8xf32> -> vector<8x8xf32>
    %58 = vector.extract_strided_slice %41 {offsets = [0, 8], sizes = [8, 8], strides = [1, 1]} : vector<16x192xf32> to vector<8x8xf32>
    %59 = vector.extract_strided_slice %41 {offsets = [0, 72], sizes = [8, 8], strides = [1, 1]} : vector<16x192xf32> to vector<8x8xf32>
    %60 = vector.extract_strided_slice %41 {offsets = [0, 136], sizes = [8, 8], strides = [1, 1]} : vector<16x192xf32> to vector<8x8xf32>
    %cst_29 = arith.constant dense<0.000000e+00> : vector<8x8xf32>
    %61 = tpu.matmul %58, %59, %cst_29 {dimension_numbers = #tpu.dot_dimension_numbers<[1], [1], [0], [0], [0, 0, 1, 0], [], []>} : vector<8x8xf32>, vector<8x8xf32>, vector<8x8xf32> -> vector<8x8xf32>
    %cst_30 = arith.constant 0.353553385 : f32
    %62 = vector.broadcast %cst_30 : f32 to vector<8x8xf32>
    %63 = arith.mulf %61, %62 : vector<8x8xf32>
    %cst_31 = arith.constant dense<0xFF800000> : vector<8xf32>
    %64 = vector.multi_reduction <maximumf>, %63, %cst_31 [1] : vector<8x8xf32> to vector<8xf32>
    %65 = vector.shape_cast %64 : vector<8xf32> to vector<8x1xf32>
    %66 = vector.broadcast %65 : vector<8x1xf32> to vector<8x8xf32>
    %67 = arith.subf %63, %66 : vector<8x8xf32>
    %68 = math.exp %67 : vector<8x8xf32>
    %cst_32 = arith.constant dense<0.000000e+00> : vector<8xf32>
    %69 = vector.multi_reduction <add>, %68, %cst_32 [1] : vector<8x8xf32> to vector<8xf32>
    %70 = vector.shape_cast %69 : vector<8xf32> to vector<8x1xf32>
    %71 = vector.broadcast %70 : vector<8x1xf32> to vector<8x8xf32>
    %72 = arith.divf %68, %71 : vector<8x8xf32>
    %cst_33 = arith.constant dense<0.000000e+00> : vector<8x8xf32>
    %73 = tpu.matmul %72, %60, %cst_33 {dimension_numbers = #tpu.dot_dimension_numbers<[1], [0], [0], [1], [0, 0, 1, 1], [], []>} : vector<8x8xf32>, vector<8x8xf32>, vector<8x8xf32> -> vector<8x8xf32>
    %74 = vector.extract_strided_slice %41 {offsets = [0, 16], sizes = [8, 8], strides = [1, 1]} : vector<16x192xf32> to vector<8x8xf32>
    %75 = vector.extract_strided_slice %41 {offsets = [0, 80], sizes = [8, 8], strides = [1, 1]} : vector<16x192xf32> to vector<8x8xf32>
    %76 = vector.extract_strided_slice %41 {offsets = [0, 144], sizes = [8, 8], strides = [1, 1]} : vector<16x192xf32> to vector<8x8xf32>
    %cst_34 = arith.constant dense<0.000000e+00> : vector<8x8xf32>
    %77 = tpu.matmul %74, %75, %cst_34 {dimension_numbers = #tpu.dot_dimension_numbers<[1], [1], [0], [0], [0, 0, 1, 0], [], []>} : vector<8x8xf32>, vector<8x8xf32>, vector<8x8xf32> -> vector<8x8xf32>
    %cst_35 = arith.constant 0.353553385 : f32
    %78 = vector.broadcast %cst_35 : f32 to vector<8x8xf32>
    %79 = arith.mulf %77, %78 : vector<8x8xf32>
    %cst_36 = arith.constant dense<0xFF800000> : vector<8xf32>
    %80 = vector.multi_reduction <maximumf>, %79, %cst_36 [1] : vector<8x8xf32> to vector<8xf32>
    %81 = vector.shape_cast %80 : vector<8xf32> to vector<8x1xf32>
    %82 = vector.broadcast %81 : vector<8x1xf32> to vector<8x8xf32>
    %83 = arith.subf %79, %82 : vector<8x8xf32>
    %84 = math.exp %83 : vector<8x8xf32>
    %cst_37 = arith.constant dense<0.000000e+00> : vector<8xf32>
    %85 = vector.multi_reduction <add>, %84, %cst_37 [1] : vector<8x8xf32> to vector<8xf32>
    %86 = vector.shape_cast %85 : vector<8xf32> to vector<8x1xf32>
    %87 = vector.broadcast %86 : vector<8x1xf32> to vector<8x8xf32>
    %88 = arith.divf %84, %87 : vector<8x8xf32>
    %cst_38 = arith.constant dense<0.000000e+00> : vector<8x8xf32>
    %89 = tpu.matmul %88, %76, %cst_38 {dimension_numbers = #tpu.dot_dimension_numbers<[1], [0], [0], [1], [0, 0, 1, 1], [], []>} : vector<8x8xf32>, vector<8x8xf32>, vector<8x8xf32> -> vector<8x8xf32>
    %90 = vector.extract_strided_slice %41 {offsets = [0, 24], sizes = [8, 8], strides = [1, 1]} : vector<16x192xf32> to vector<8x8xf32>
    %91 = vector.extract_strided_slice %41 {offsets = [0, 88], sizes = [8, 8], strides = [1, 1]} : vector<16x192xf32> to vector<8x8xf32>
    %92 = vector.extract_strided_slice %41 {offsets = [0, 152], sizes = [8, 8], strides = [1, 1]} : vector<16x192xf32> to vector<8x8xf32>
    %cst_39 = arith.constant dense<0.000000e+00> : vector<8x8xf32>
    %93 = tpu.matmul %90, %91, %cst_39 {dimension_numbers = #tpu.dot_dimension_numbers<[1], [1], [0], [0], [0, 0, 1, 0], [], []>} : vector<8x8xf32>, vector<8x8xf32>, vector<8x8xf32> -> vector<8x8xf32>
    %cst_40 = arith.constant 0.353553385 : f32
    %94 = vector.broadcast %cst_40 : f32 to vector<8x8xf32>
    %95 = arith.mulf %93, %94 : vector<8x8xf32>
    %cst_41 = arith.constant dense<0xFF800000> : vector<8xf32>
    %96 = vector.multi_reduction <maximumf>, %95, %cst_41 [1] : vector<8x8xf32> to vector<8xf32>
    %97 = vector.shape_cast %96 : vector<8xf32> to vector<8x1xf32>
    %98 = vector.broadcast %97 : vector<8x1xf32> to vector<8x8xf32>
    %99 = arith.subf %95, %98 : vector<8x8xf32>
    %100 = math.exp %99 : vector<8x8xf32>
    %cst_42 = arith.constant dense<0.000000e+00> : vector<8xf32>
    %101 = vector.multi_reduction <add>, %100, %cst_42 [1] : vector<8x8xf32> to vector<8xf32>
    %102 = vector.shape_cast %101 : vector<8xf32> to vector<8x1xf32>
    %103 = vector.broadcast %102 : vector<8x1xf32> to vector<8x8xf32>
    %104 = arith.divf %100, %103 : vector<8x8xf32>
    %cst_43 = arith.constant dense<0.000000e+00> : vector<8x8xf32>
    %105 = tpu.matmul %104, %92, %cst_43 {dimension_numbers = #tpu.dot_dimension_numbers<[1], [0], [0], [1], [0, 0, 1, 1], [], []>} : vector<8x8xf32>, vector<8x8xf32>, vector<8x8xf32> -> vector<8x8xf32>
    %106 = vector.extract_strided_slice %41 {offsets = [0, 32], sizes = [8, 8], strides = [1, 1]} : vector<16x192xf32> to vector<8x8xf32>
    %107 = vector.extract_strided_slice %41 {offsets = [0, 96], sizes = [8, 8], strides = [1, 1]} : vector<16x192xf32> to vector<8x8xf32>
    %108 = vector.extract_strided_slice %41 {offsets = [0, 160], sizes = [8, 8], strides = [1, 1]} : vector<16x192xf32> to vector<8x8xf32>
    %cst_44 = arith.constant dense<0.000000e+00> : vector<8x8xf32>
    %109 = tpu.matmul %106, %107, %cst_44 {dimension_numbers = #tpu.dot_dimension_numbers<[1], [1], [0], [0], [0, 0, 1, 0], [], []>} : vector<8x8xf32>, vector<8x8xf32>, vector<8x8xf32> -> vector<8x8xf32>
    %cst_45 = arith.constant 0.353553385 : f32
    %110 = vector.broadcast %cst_45 : f32 to vector<8x8xf32>
    %111 = arith.mulf %109, %110 : vector<8x8xf32>
    %cst_46 = arith.constant dense<0xFF800000> : vector<8xf32>
    %112 = vector.multi_reduction <maximumf>, %111, %cst_46 [1] : vector<8x8xf32> to vector<8xf32>
    %113 = vector.shape_cast %112 : vector<8xf32> to vector<8x1xf32>
    %114 = vector.broadcast %113 : vector<8x1xf32> to vector<8x8xf32>
    %115 = arith.subf %111, %114 : vector<8x8xf32>
    %116 = math.exp %115 : vector<8x8xf32>
    %cst_47 = arith.constant dense<0.000000e+00> : vector<8xf32>
    %117 = vector.multi_reduction <add>, %116, %cst_47 [1] : vector<8x8xf32> to vector<8xf32>
    %118 = vector.shape_cast %117 : vector<8xf32> to vector<8x1xf32>
    %119 = vector.broadcast %118 : vector<8x1xf32> to vector<8x8xf32>
    %120 = arith.divf %116, %119 : vector<8x8xf32>
    %cst_48 = arith.constant dense<0.000000e+00> : vector<8x8xf32>
    %121 = tpu.matmul %120, %108, %cst_48 {dimension_numbers = #tpu.dot_dimension_numbers<[1], [0], [0], [1], [0, 0, 1, 1], [], []>} : vector<8x8xf32>, vector<8x8xf32>, vector<8x8xf32> -> vector<8x8xf32>
    %122 = vector.extract_strided_slice %41 {offsets = [0, 40], sizes = [8, 8], strides = [1, 1]} : vector<16x192xf32> to vector<8x8xf32>
    %123 = vector.extract_strided_slice %41 {offsets = [0, 104], sizes = [8, 8], strides = [1, 1]} : vector<16x192xf32> to vector<8x8xf32>
    %124 = vector.extract_strided_slice %41 {offsets = [0, 168], sizes = [8, 8], strides = [1, 1]} : vector<16x192xf32> to vector<8x8xf32>
    %cst_49 = arith.constant dense<0.000000e+00> : vector<8x8xf32>
    %125 = tpu.matmul %122, %123, %cst_49 {dimension_numbers = #tpu.dot_dimension_numbers<[1], [1], [0], [0], [0, 0, 1, 0], [], []>} : vector<8x8xf32>, vector<8x8xf32>, vector<8x8xf32> -> vector<8x8xf32>
    %cst_50 = arith.constant 0.353553385 : f32
    %126 = vector.broadcast %cst_50 : f32 to vector<8x8xf32>
    %127 = arith.mulf %125, %126 : vector<8x8xf32>
    %cst_51 = arith.constant dense<0xFF800000> : vector<8xf32>
    %128 = vector.multi_reduction <maximumf>, %127, %cst_51 [1] : vector<8x8xf32> to vector<8xf32>
    %129 = vector.shape_cast %128 : vector<8xf32> to vector<8x1xf32>
    %130 = vector.broadcast %129 : vector<8x1xf32> to vector<8x8xf32>
    %131 = arith.subf %127, %130 : vector<8x8xf32>
    %132 = math.exp %131 : vector<8x8xf32>
    %cst_52 = arith.constant dense<0.000000e+00> : vector<8xf32>
    %133 = vector.multi_reduction <add>, %132, %cst_52 [1] : vector<8x8xf32> to vector<8xf32>
    %134 = vector.shape_cast %133 : vector<8xf32> to vector<8x1xf32>
    %135 = vector.broadcast %134 : vector<8x1xf32> to vector<8x8xf32>
    %136 = arith.divf %132, %135 : vector<8x8xf32>
    %cst_53 = arith.constant dense<0.000000e+00> : vector<8x8xf32>
    %137 = tpu.matmul %136, %124, %cst_53 {dimension_numbers = #tpu.dot_dimension_numbers<[1], [0], [0], [1], [0, 0, 1, 1], [], []>} : vector<8x8xf32>, vector<8x8xf32>, vector<8x8xf32> -> vector<8x8xf32>
    %138 = vector.extract_strided_slice %41 {offsets = [0, 48], sizes = [8, 8], strides = [1, 1]} : vector<16x192xf32> to vector<8x8xf32>
    %139 = vector.extract_strided_slice %41 {offsets = [0, 112], sizes = [8, 8], strides = [1, 1]} : vector<16x192xf32> to vector<8x8xf32>
    %140 = vector.extract_strided_slice %41 {offsets = [0, 176], sizes = [8, 8], strides = [1, 1]} : vector<16x192xf32> to vector<8x8xf32>
    %cst_54 = arith.constant dense<0.000000e+00> : vector<8x8xf32>
    %141 = tpu.matmul %138, %139, %cst_54 {dimension_numbers = #tpu.dot_dimension_numbers<[1], [1], [0], [0], [0, 0, 1, 0], [], []>} : vector<8x8xf32>, vector<8x8xf32>, vector<8x8xf32> -> vector<8x8xf32>
    %cst_55 = arith.constant 0.353553385 : f32
    %142 = vector.broadcast %cst_55 : f32 to vector<8x8xf32>
    %143 = arith.mulf %141, %142 : vector<8x8xf32>
    %cst_56 = arith.constant dense<0xFF800000> : vector<8xf32>
    %144 = vector.multi_reduction <maximumf>, %143, %cst_56 [1] : vector<8x8xf32> to vector<8xf32>
    %145 = vector.shape_cast %144 : vector<8xf32> to vector<8x1xf32>
    %146 = vector.broadcast %145 : vector<8x1xf32> to vector<8x8xf32>
    %147 = arith.subf %143, %146 : vector<8x8xf32>
    %148 = math.exp %147 : vector<8x8xf32>
    %cst_57 = arith.constant dense<0.000000e+00> : vector<8xf32>
    %149 = vector.multi_reduction <add>, %148, %cst_57 [1] : vector<8x8xf32> to vector<8xf32>
    %150 = vector.shape_cast %149 : vector<8xf32> to vector<8x1xf32>
    %151 = vector.broadcast %150 : vector<8x1xf32> to vector<8x8xf32>
    %152 = arith.divf %148, %151 : vector<8x8xf32>
    %cst_58 = arith.constant dense<0.000000e+00> : vector<8x8xf32>
    %153 = tpu.matmul %152, %140, %cst_58 {dimension_numbers = #tpu.dot_dimension_numbers<[1], [0], [0], [1], [0, 0, 1, 1], [], []>} : vector<8x8xf32>, vector<8x8xf32>, vector<8x8xf32> -> vector<8x8xf32>
    %154 = vector.extract_strided_slice %41 {offsets = [0, 56], sizes = [8, 8], strides = [1, 1]} : vector<16x192xf32> to vector<8x8xf32>
    %155 = vector.extract_strided_slice %41 {offsets = [0, 120], sizes = [8, 8], strides = [1, 1]} : vector<16x192xf32> to vector<8x8xf32>
    %156 = vector.extract_strided_slice %41 {offsets = [0, 184], sizes = [8, 8], strides = [1, 1]} : vector<16x192xf32> to vector<8x8xf32>
    %cst_59 = arith.constant dense<0.000000e+00> : vector<8x8xf32>
    %157 = tpu.matmul %154, %155, %cst_59 {dimension_numbers = #tpu.dot_dimension_numbers<[1], [1], [0], [0], [0, 0, 1, 0], [], []>} : vector<8x8xf32>, vector<8x8xf32>, vector<8x8xf32> -> vector<8x8xf32>
    %cst_60 = arith.constant 0.353553385 : f32
    %158 = vector.broadcast %cst_60 : f32 to vector<8x8xf32>
    %159 = arith.mulf %157, %158 : vector<8x8xf32>
    %cst_61 = arith.constant dense<0xFF800000> : vector<8xf32>
    %160 = vector.multi_reduction <maximumf>, %159, %cst_61 [1] : vector<8x8xf32> to vector<8xf32>
    %161 = vector.shape_cast %160 : vector<8xf32> to vector<8x1xf32>
    %162 = vector.broadcast %161 : vector<8x1xf32> to vector<8x8xf32>
    %163 = arith.subf %159, %162 : vector<8x8xf32>
    %164 = math.exp %163 : vector<8x8xf32>
    %cst_62 = arith.constant dense<0.000000e+00> : vector<8xf32>
    %165 = vector.multi_reduction <add>, %164, %cst_62 [1] : vector<8x8xf32> to vector<8xf32>
    %166 = vector.shape_cast %165 : vector<8xf32> to vector<8x1xf32>
    %167 = vector.broadcast %166 : vector<8x1xf32> to vector<8x8xf32>
    %168 = arith.divf %164, %167 : vector<8x8xf32>
    %cst_63 = arith.constant dense<0.000000e+00> : vector<8x8xf32>
    %169 = tpu.matmul %168, %156, %cst_63 {dimension_numbers = #tpu.dot_dimension_numbers<[1], [0], [0], [1], [0, 0, 1, 1], [], []>} : vector<8x8xf32>, vector<8x8xf32>, vector<8x8xf32> -> vector<8x8xf32>
    %170 = tpu.concatenate %57, %73, %89, %105, %121, %137, %153, %169 in 1 : vector<8x8xf32>, vector<8x8xf32>, vector<8x8xf32>, vector<8x8xf32>, vector<8x8xf32>, vector<8x8xf32>, vector<8x8xf32>, vector<8x8xf32> -> vector<8x64xf32>
    %171 = vector.extract_strided_slice %41 {offsets = [8, 0], sizes = [8, 8], strides = [1, 1]} : vector<16x192xf32> to vector<8x8xf32>
    %172 = vector.extract_strided_slice %41 {offsets = [8, 64], sizes = [8, 8], strides = [1, 1]} : vector<16x192xf32> to vector<8x8xf32>
    %173 = vector.extract_strided_slice %41 {offsets = [8, 128], sizes = [8, 8], strides = [1, 1]} : vector<16x192xf32> to vector<8x8xf32>
    %cst_64 = arith.constant dense<0.000000e+00> : vector<8x8xf32>
    %174 = tpu.matmul %171, %172, %cst_64 {dimension_numbers = #tpu.dot_dimension_numbers<[1], [1], [0], [0], [0, 0, 1, 0], [], []>} : vector<8x8xf32>, vector<8x8xf32>, vector<8x8xf32> -> vector<8x8xf32>
    %cst_65 = arith.constant 0.353553385 : f32
    %175 = vector.broadcast %cst_65 : f32 to vector<8x8xf32>
    %176 = arith.mulf %174, %175 : vector<8x8xf32>
    %cst_66 = arith.constant dense<0xFF800000> : vector<8xf32>
    %177 = vector.multi_reduction <maximumf>, %176, %cst_66 [1] : vector<8x8xf32> to vector<8xf32>
    %178 = vector.shape_cast %177 : vector<8xf32> to vector<8x1xf32>
    %179 = vector.broadcast %178 : vector<8x1xf32> to vector<8x8xf32>
    %180 = arith.subf %176, %179 : vector<8x8xf32>
    %181 = math.exp %180 : vector<8x8xf32>
    %cst_67 = arith.constant dense<0.000000e+00> : vector<8xf32>
    %182 = vector.multi_reduction <add>, %181, %cst_67 [1] : vector<8x8xf32> to vector<8xf32>
    %183 = vector.shape_cast %182 : vector<8xf32> to vector<8x1xf32>
    %184 = vector.broadcast %183 : vector<8x1xf32> to vector<8x8xf32>
    %185 = arith.divf %181, %184 : vector<8x8xf32>
    %cst_68 = arith.constant dense<0.000000e+00> : vector<8x8xf32>
    %186 = tpu.matmul %185, %173, %cst_68 {dimension_numbers = #tpu.dot_dimension_numbers<[1], [0], [0], [1], [0, 0, 1, 1], [], []>} : vector<8x8xf32>, vector<8x8xf32>, vector<8x8xf32> -> vector<8x8xf32>
    %187 = vector.extract_strided_slice %41 {offsets = [8, 8], sizes = [8, 8], strides = [1, 1]} : vector<16x192xf32> to vector<8x8xf32>
    %188 = vector.extract_strided_slice %41 {offsets = [8, 72], sizes = [8, 8], strides = [1, 1]} : vector<16x192xf32> to vector<8x8xf32>
    %189 = vector.extract_strided_slice %41 {offsets = [8, 136], sizes = [8, 8], strides = [1, 1]} : vector<16x192xf32> to vector<8x8xf32>
    %cst_69 = arith.constant dense<0.000000e+00> : vector<8x8xf32>
    %190 = tpu.matmul %187, %188, %cst_69 {dimension_numbers = #tpu.dot_dimension_numbers<[1], [1], [0], [0], [0, 0, 1, 0], [], []>} : vector<8x8xf32>, vector<8x8xf32>, vector<8x8xf32> -> vector<8x8xf32>
    %cst_70 = arith.constant 0.353553385 : f32
    %191 = vector.broadcast %cst_70 : f32 to vector<8x8xf32>
    %192 = arith.mulf %190, %191 : vector<8x8xf32>
    %cst_71 = arith.constant dense<0xFF800000> : vector<8xf32>
    %193 = vector.multi_reduction <maximumf>, %192, %cst_71 [1] : vector<8x8xf32> to vector<8xf32>
    %194 = vector.shape_cast %193 : vector<8xf32> to vector<8x1xf32>
    %195 = vector.broadcast %194 : vector<8x1xf32> to vector<8x8xf32>
    %196 = arith.subf %192, %195 : vector<8x8xf32>
    %197 = math.exp %196 : vector<8x8xf32>
    %cst_72 = arith.constant dense<0.000000e+00> : vector<8xf32>
    %198 = vector.multi_reduction <add>, %197, %cst_72 [1] : vector<8x8xf32> to vector<8xf32>
    %199 = vector.shape_cast %198 : vector<8xf32> to vector<8x1xf32>
    %200 = vector.broadcast %199 : vector<8x1xf32> to vector<8x8xf32>
    %201 = arith.divf %197, %200 : vector<8x8xf32>
    %cst_73 = arith.constant dense<0.000000e+00> : vector<8x8xf32>
    %202 = tpu.matmul %201, %189, %cst_73 {dimension_numbers = #tpu.dot_dimension_numbers<[1], [0], [0], [1], [0, 0, 1, 1], [], []>} : vector<8x8xf32>, vector<8x8xf32>, vector<8x8xf32> -> vector<8x8xf32>
    %203 = vector.extract_strided_slice %41 {offsets = [8, 16], sizes = [8, 8], strides = [1, 1]} : vector<16x192xf32> to vector<8x8xf32>
    %204 = vector.extract_strided_slice %41 {offsets = [8, 80], sizes = [8, 8], strides = [1, 1]} : vector<16x192xf32> to vector<8x8xf32>
    %205 = vector.extract_strided_slice %41 {offsets = [8, 144], sizes = [8, 8], strides = [1, 1]} : vector<16x192xf32> to vector<8x8xf32>
    %cst_74 = arith.constant dense<0.000000e+00> : vector<8x8xf32>
    %206 = tpu.matmul %203, %204, %cst_74 {dimension_numbers = #tpu.dot_dimension_numbers<[1], [1], [0], [0], [0, 0, 1, 0], [], []>} : vector<8x8xf32>, vector<8x8xf32>, vector<8x8xf32> -> vector<8x8xf32>
    %cst_75 = arith.constant 0.353553385 : f32
    %207 = vector.broadcast %cst_75 : f32 to vector<8x8xf32>
    %208 = arith.mulf %206, %207 : vector<8x8xf32>
    %cst_76 = arith.constant dense<0xFF800000> : vector<8xf32>
    %209 = vector.multi_reduction <maximumf>, %208, %cst_76 [1] : vector<8x8xf32> to vector<8xf32>
    %210 = vector.shape_cast %209 : vector<8xf32> to vector<8x1xf32>
    %211 = vector.broadcast %210 : vector<8x1xf32> to vector<8x8xf32>
    %212 = arith.subf %208, %211 : vector<8x8xf32>
    %213 = math.exp %212 : vector<8x8xf32>
    %cst_77 = arith.constant dense<0.000000e+00> : vector<8xf32>
    %214 = vector.multi_reduction <add>, %213, %cst_77 [1] : vector<8x8xf32> to vector<8xf32>
    %215 = vector.shape_cast %214 : vector<8xf32> to vector<8x1xf32>
    %216 = vector.broadcast %215 : vector<8x1xf32> to vector<8x8xf32>
    %217 = arith.divf %213, %216 : vector<8x8xf32>
    %cst_78 = arith.constant dense<0.000000e+00> : vector<8x8xf32>
    %218 = tpu.matmul %217, %205, %cst_78 {dimension_numbers = #tpu.dot_dimension_numbers<[1], [0], [0], [1], [0, 0, 1, 1], [], []>} : vector<8x8xf32>, vector<8x8xf32>, vector<8x8xf32> -> vector<8x8xf32>
    %219 = vector.extract_strided_slice %41 {offsets = [8, 24], sizes = [8, 8], strides = [1, 1]} : vector<16x192xf32> to vector<8x8xf32>
    %220 = vector.extract_strided_slice %41 {offsets = [8, 88], sizes = [8, 8], strides = [1, 1]} : vector<16x192xf32> to vector<8x8xf32>
    %221 = vector.extract_strided_slice %41 {offsets = [8, 152], sizes = [8, 8], strides = [1, 1]} : vector<16x192xf32> to vector<8x8xf32>
    %cst_79 = arith.constant dense<0.000000e+00> : vector<8x8xf32>
    %222 = tpu.matmul %219, %220, %cst_79 {dimension_numbers = #tpu.dot_dimension_numbers<[1], [1], [0], [0], [0, 0, 1, 0], [], []>} : vector<8x8xf32>, vector<8x8xf32>, vector<8x8xf32> -> vector<8x8xf32>
    %cst_80 = arith.constant 0.353553385 : f32
    %223 = vector.broadcast %cst_80 : f32 to vector<8x8xf32>
    %224 = arith.mulf %222, %223 : vector<8x8xf32>
    %cst_81 = arith.constant dense<0xFF800000> : vector<8xf32>
    %225 = vector.multi_reduction <maximumf>, %224, %cst_81 [1] : vector<8x8xf32> to vector<8xf32>
    %226 = vector.shape_cast %225 : vector<8xf32> to vector<8x1xf32>
    %227 = vector.broadcast %226 : vector<8x1xf32> to vector<8x8xf32>
    %228 = arith.subf %224, %227 : vector<8x8xf32>
    %229 = math.exp %228 : vector<8x8xf32>
    %cst_82 = arith.constant dense<0.000000e+00> : vector<8xf32>
    %230 = vector.multi_reduction <add>, %229, %cst_82 [1] : vector<8x8xf32> to vector<8xf32>
    %231 = vector.shape_cast %230 : vector<8xf32> to vector<8x1xf32>
    %232 = vector.broadcast %231 : vector<8x1xf32> to vector<8x8xf32>
    %233 = arith.divf %229, %232 : vector<8x8xf32>
    %cst_83 = arith.constant dense<0.000000e+00> : vector<8x8xf32>
    %234 = tpu.matmul %233, %221, %cst_83 {dimension_numbers = #tpu.dot_dimension_numbers<[1], [0], [0], [1], [0, 0, 1, 1], [], []>} : vector<8x8xf32>, vector<8x8xf32>, vector<8x8xf32> -> vector<8x8xf32>
    %235 = vector.extract_strided_slice %41 {offsets = [8, 32], sizes = [8, 8], strides = [1, 1]} : vector<16x192xf32> to vector<8x8xf32>
    %236 = vector.extract_strided_slice %41 {offsets = [8, 96], sizes = [8, 8], strides = [1, 1]} : vector<16x192xf32> to vector<8x8xf32>
    %237 = vector.extract_strided_slice %41 {offsets = [8, 160], sizes = [8, 8], strides = [1, 1]} : vector<16x192xf32> to vector<8x8xf32>
    %cst_84 = arith.constant dense<0.000000e+00> : vector<8x8xf32>
    %238 = tpu.matmul %235, %236, %cst_84 {dimension_numbers = #tpu.dot_dimension_numbers<[1], [1], [0], [0], [0, 0, 1, 0], [], []>} : vector<8x8xf32>, vector<8x8xf32>, vector<8x8xf32> -> vector<8x8xf32>
    %cst_85 = arith.constant 0.353553385 : f32
    %239 = vector.broadcast %cst_85 : f32 to vector<8x8xf32>
    %240 = arith.mulf %238, %239 : vector<8x8xf32>
    %cst_86 = arith.constant dense<0xFF800000> : vector<8xf32>
    %241 = vector.multi_reduction <maximumf>, %240, %cst_86 [1] : vector<8x8xf32> to vector<8xf32>
    %242 = vector.shape_cast %241 : vector<8xf32> to vector<8x1xf32>
    %243 = vector.broadcast %242 : vector<8x1xf32> to vector<8x8xf32>
    %244 = arith.subf %240, %243 : vector<8x8xf32>
    %245 = math.exp %244 : vector<8x8xf32>
    %cst_87 = arith.constant dense<0.000000e+00> : vector<8xf32>
    %246 = vector.multi_reduction <add>, %245, %cst_87 [1] : vector<8x8xf32> to vector<8xf32>
    %247 = vector.shape_cast %246 : vector<8xf32> to vector<8x1xf32>
    %248 = vector.broadcast %247 : vector<8x1xf32> to vector<8x8xf32>
    %249 = arith.divf %245, %248 : vector<8x8xf32>
    %cst_88 = arith.constant dense<0.000000e+00> : vector<8x8xf32>
    %250 = tpu.matmul %249, %237, %cst_88 {dimension_numbers = #tpu.dot_dimension_numbers<[1], [0], [0], [1], [0, 0, 1, 1], [], []>} : vector<8x8xf32>, vector<8x8xf32>, vector<8x8xf32> -> vector<8x8xf32>
    %251 = vector.extract_strided_slice %41 {offsets = [8, 40], sizes = [8, 8], strides = [1, 1]} : vector<16x192xf32> to vector<8x8xf32>
    %252 = vector.extract_strided_slice %41 {offsets = [8, 104], sizes = [8, 8], strides = [1, 1]} : vector<16x192xf32> to vector<8x8xf32>
    %253 = vector.extract_strided_slice %41 {offsets = [8, 168], sizes = [8, 8], strides = [1, 1]} : vector<16x192xf32> to vector<8x8xf32>
    %cst_89 = arith.constant dense<0.000000e+00> : vector<8x8xf32>
    %254 = tpu.matmul %251, %252, %cst_89 {dimension_numbers = #tpu.dot_dimension_numbers<[1], [1], [0], [0], [0, 0, 1, 0], [], []>} : vector<8x8xf32>, vector<8x8xf32>, vector<8x8xf32> -> vector<8x8xf32>
    %cst_90 = arith.constant 0.353553385 : f32
    %255 = vector.broadcast %cst_90 : f32 to vector<8x8xf32>
    %256 = arith.mulf %254, %255 : vector<8x8xf32>
    %cst_91 = arith.constant dense<0xFF800000> : vector<8xf32>
    %257 = vector.multi_reduction <maximumf>, %256, %cst_91 [1] : vector<8x8xf32> to vector<8xf32>
    %258 = vector.shape_cast %257 : vector<8xf32> to vector<8x1xf32>
    %259 = vector.broadcast %258 : vector<8x1xf32> to vector<8x8xf32>
    %260 = arith.subf %256, %259 : vector<8x8xf32>
    %261 = math.exp %260 : vector<8x8xf32>
    %cst_92 = arith.constant dense<0.000000e+00> : vector<8xf32>
    %262 = vector.multi_reduction <add>, %261, %cst_92 [1] : vector<8x8xf32> to vector<8xf32>
    %263 = vector.shape_cast %262 : vector<8xf32> to vector<8x1xf32>
    %264 = vector.broadcast %263 : vector<8x1xf32> to vector<8x8xf32>
    %265 = arith.divf %261, %264 : vector<8x8xf32>
    %cst_93 = arith.constant dense<0.000000e+00> : vector<8x8xf32>
    %266 = tpu.matmul %265, %253, %cst_93 {dimension_numbers = #tpu.dot_dimension_numbers<[1], [0], [0], [1], [0, 0, 1, 1], [], []>} : vector<8x8xf32>, vector<8x8xf32>, vector<8x8xf32> -> vector<8x8xf32>
    %267 = vector.extract_strided_slice %41 {offsets = [8, 48], sizes = [8, 8], strides = [1, 1]} : vector<16x192xf32> to vector<8x8xf32>
    %268 = vector.extract_strided_slice %41 {offsets = [8, 112], sizes = [8, 8], strides = [1, 1]} : vector<16x192xf32> to vector<8x8xf32>
    %269 = vector.extract_strided_slice %41 {offsets = [8, 176], sizes = [8, 8], strides = [1, 1]} : vector<16x192xf32> to vector<8x8xf32>
    %cst_94 = arith.constant dense<0.000000e+00> : vector<8x8xf32>
    %270 = tpu.matmul %267, %268, %cst_94 {dimension_numbers = #tpu.dot_dimension_numbers<[1], [1], [0], [0], [0, 0, 1, 0], [], []>} : vector<8x8xf32>, vector<8x8xf32>, vector<8x8xf32> -> vector<8x8xf32>
    %cst_95 = arith.constant 0.353553385 : f32
    %271 = vector.broadcast %cst_95 : f32 to vector<8x8xf32>
    %272 = arith.mulf %270, %271 : vector<8x8xf32>
    %cst_96 = arith.constant dense<0xFF800000> : vector<8xf32>
    %273 = vector.multi_reduction <maximumf>, %272, %cst_96 [1] : vector<8x8xf32> to vector<8xf32>
    %274 = vector.shape_cast %273 : vector<8xf32> to vector<8x1xf32>
    %275 = vector.broadcast %274 : vector<8x1xf32> to vector<8x8xf32>
    %276 = arith.subf %272, %275 : vector<8x8xf32>
    %277 = math.exp %276 : vector<8x8xf32>
    %cst_97 = arith.constant dense<0.000000e+00> : vector<8xf32>
    %278 = vector.multi_reduction <add>, %277, %cst_97 [1] : vector<8x8xf32> to vector<8xf32>
    %279 = vector.shape_cast %278 : vector<8xf32> to vector<8x1xf32>
    %280 = vector.broadcast %279 : vector<8x1xf32> to vector<8x8xf32>
    %281 = arith.divf %277, %280 : vector<8x8xf32>
    %cst_98 = arith.constant dense<0.000000e+00> : vector<8x8xf32>
    %282 = tpu.matmul %281, %269, %cst_98 {dimension_numbers = #tpu.dot_dimension_numbers<[1], [0], [0], [1], [0, 0, 1, 1], [], []>} : vector<8x8xf32>, vector<8x8xf32>, vector<8x8xf32> -> vector<8x8xf32>
    %283 = vector.extract_strided_slice %41 {offsets = [8, 56], sizes = [8, 8], strides = [1, 1]} : vector<16x192xf32> to vector<8x8xf32>
    %284 = vector.extract_strided_slice %41 {offsets = [8, 120], sizes = [8, 8], strides = [1, 1]} : vector<16x192xf32> to vector<8x8xf32>
    %285 = vector.extract_strided_slice %41 {offsets = [8, 184], sizes = [8, 8], strides = [1, 1]} : vector<16x192xf32> to vector<8x8xf32>
    %cst_99 = arith.constant dense<0.000000e+00> : vector<8x8xf32>
    %286 = tpu.matmul %283, %284, %cst_99 {dimension_numbers = #tpu.dot_dimension_numbers<[1], [1], [0], [0], [0, 0, 1, 0], [], []>} : vector<8x8xf32>, vector<8x8xf32>, vector<8x8xf32> -> vector<8x8xf32>
    %cst_100 = arith.constant 0.353553385 : f32
    %287 = vector.broadcast %cst_100 : f32 to vector<8x8xf32>
    %288 = arith.mulf %286, %287 : vector<8x8xf32>
    %cst_101 = arith.constant dense<0xFF800000> : vector<8xf32>
    %289 = vector.multi_reduction <maximumf>, %288, %cst_101 [1] : vector<8x8xf32> to vector<8xf32>
    %290 = vector.shape_cast %289 : vector<8xf32> to vector<8x1xf32>
    %291 = vector.broadcast %290 : vector<8x1xf32> to vector<8x8xf32>
    %292 = arith.subf %288, %291 : vector<8x8xf32>
    %293 = math.exp %292 : vector<8x8xf32>
    %cst_102 = arith.constant dense<0.000000e+00> : vector<8xf32>
    %294 = vector.multi_reduction <add>, %293, %cst_102 [1] : vector<8x8xf32> to vector<8xf32>
    %295 = vector.shape_cast %294 : vector<8xf32> to vector<8x1xf32>
    %296 = vector.broadcast %295 : vector<8x1xf32> to vector<8x8xf32>
    %297 = arith.divf %293, %296 : vector<8x8xf32>
    %cst_103 = arith.constant dense<0.000000e+00> : vector<8x8xf32>
    %298 = tpu.matmul %297, %285, %cst_103 {dimension_numbers = #tpu.dot_dimension_numbers<[1], [0], [0], [1], [0, 0, 1, 1], [], []>} : vector<8x8xf32>, vector<8x8xf32>, vector<8x8xf32> -> vector<8x8xf32>
    %299 = tpu.concatenate %186, %202, %218, %234, %250, %266, %282, %298 in 1 : vector<8x8xf32>, vector<8x8xf32>, vector<8x8xf32>, vector<8x8xf32>, vector<8x8xf32>, vector<8x8xf32>, vector<8x8xf32>, vector<8x8xf32> -> vector<8x64xf32>
    %300 = tpu.concatenate %170, %299 in 0 : vector<8x64xf32>, vector<8x64xf32> -> vector<16x64xf32>
    %c0_104 = arith.constant 0 : index
    %c0_105 = arith.constant 0 : index
    %c0_106 = arith.constant 0 : index
    %301 = vector.load %arg9[%c0_104, %c0_105, %c0_106] : memref<2x64x64xf32, #tpu.memory_space<vmem>>, vector<1x64x64xf32>
    %302 = vector.shape_cast %301 : vector<1x64x64xf32> to vector<64x64xf32>
    %cst_107 = arith.constant dense<0.000000e+00> : vector<16x64xf32>
    %303 = tpu.matmul %300, %302, %cst_107 {dimension_numbers = #tpu.dot_dimension_numbers<[1], [0], [0], [1], [0, 0, 1, 1], [], []>} : vector<16x64xf32>, vector<64x64xf32>, vector<16x64xf32> -> vector<16x64xf32>
    %c0_108 = arith.constant 0 : index
    %c0_109 = arith.constant 0 : index
    %c0_110 = arith.constant 0 : index
    %304 = vector.load %arg10[%c0_108, %c0_109, %c0_110] : memref<2x1x64xf32, #tpu.memory_space<vmem>>, vector<1x1x64xf32>
    %305 = vector.shape_cast %304 : vector<1x1x64xf32> to vector<1x64xf32>
    %306 = vector.broadcast %305 : vector<1x64xf32> to vector<16x64xf32>
    %307 = arith.addf %303, %306 : vector<16x64xf32>
    %308 = arith.addf %34, %307 : vector<16x64xf32>
    %c0_111 = arith.constant 0 : index
    %c0_112 = arith.constant 0 : index
    %c0_113 = arith.constant 0 : index
    %309 = vector.load %arg11[%c0_111, %c0_112, %c0_113] : memref<2x1x64xf32, #tpu.memory_space<vmem>>, vector<1x1x64xf32>
    %310 = vector.shape_cast %309 : vector<1x1x64xf32> to vector<1x64xf32>
    %c0_114 = arith.constant 0 : index
    %c0_115 = arith.constant 0 : index
    %c0_116 = arith.constant 0 : index
    %311 = vector.load %arg12[%c0_114, %c0_115, %c0_116] : memref<2x1x64xf32, #tpu.memory_space<vmem>>, vector<1x1x64xf32>
    %312 = vector.shape_cast %311 : vector<1x1x64xf32> to vector<1x64xf32>
    %cst_117 = arith.constant dense<0.000000e+00> : vector<16xf32>
    %313 = vector.multi_reduction <add>, %308, %cst_117 [1] : vector<16x64xf32> to vector<16xf32>
    %314 = vector.shape_cast %313 : vector<16xf32> to vector<16x1xf32>
    %cst_118 = arith.constant 6.400000e+01 : f32
    %315 = vector.broadcast %cst_118 : f32 to vector<16x1xf32>
    %316 = arith.divf %314, %315 : vector<16x1xf32>
    %317 = vector.broadcast %316 : vector<16x1xf32> to vector<16x64xf32>
    %318 = arith.subf %308, %317 : vector<16x64xf32>
    %319 = arith.mulf %318, %318 : vector<16x64xf32>
    %cst_119 = arith.constant dense<0.000000e+00> : vector<16xf32>
    %320 = vector.multi_reduction <add>, %319, %cst_119 [1] : vector<16x64xf32> to vector<16xf32>
    %321 = vector.shape_cast %320 : vector<16xf32> to vector<16x1xf32>
    %cst_120 = arith.constant 6.400000e+01 : f32
    %322 = vector.broadcast %cst_120 : f32 to vector<16x1xf32>
    %323 = arith.divf %321, %322 : vector<16x1xf32>
    %cst_121 = arith.constant 9.99999974E-6 : f32
    %324 = vector.broadcast %cst_121 : f32 to vector<16x1xf32>
    %325 = arith.addf %323, %324 : vector<16x1xf32>
    %326 = math.rsqrt %325 : vector<16x1xf32>
    %327 = vector.broadcast %326 : vector<16x1xf32> to vector<16x64xf32>
    %328 = arith.mulf %318, %327 : vector<16x64xf32>
    %329 = vector.broadcast %310 : vector<1x64xf32> to vector<16x64xf32>
    %330 = arith.mulf %328, %329 : vector<16x64xf32>
    %331 = vector.broadcast %312 : vector<1x64xf32> to vector<16x64xf32>
    %332 = arith.addf %330, %331 : vector<16x64xf32>
    %c0_122 = arith.constant 0 : index
    %c0_123 = arith.constant 0 : index
    %c0_124 = arith.constant 0 : index
    %333 = vector.load %arg13[%c0_122, %c0_123, %c0_124] : memref<2x64x128xf32, #tpu.memory_space<vmem>>, vector<1x64x128xf32>
    %334 = vector.shape_cast %333 : vector<1x64x128xf32> to vector<64x128xf32>
    %cst_125 = arith.constant dense<0.000000e+00> : vector<16x128xf32>
    %335 = tpu.matmul %332, %334, %cst_125 {dimension_numbers = #tpu.dot_dimension_numbers<[1], [0], [0], [1], [0, 0, 1, 1], [], []>} : vector<16x64xf32>, vector<64x128xf32>, vector<16x128xf32> -> vector<16x128xf32>
    %c0_126 = arith.constant 0 : index
    %c0_127 = arith.constant 0 : index
    %c0_128 = arith.constant 0 : index
    %336 = vector.load %arg14[%c0_126, %c0_127, %c0_128] : memref<2x1x128xf32, #tpu.memory_space<vmem>>, vector<1x1x128xf32>
    %337 = vector.shape_cast %336 : vector<1x1x128xf32> to vector<1x128xf32>
    %338 = vector.broadcast %337 : vector<1x128xf32> to vector<16x128xf32>
    %339 = arith.addf %335, %338 : vector<16x128xf32>
    %cst_129 = arith.constant 0.000000e+00 : f32
    %340 = vector.broadcast %cst_129 : f32 to vector<16x128xf32>
    %341 = arith.maximumf %339, %340 : vector<16x128xf32>
    %c0_130 = arith.constant 0 : index
    %c0_131 = arith.constant 0 : index
    %c0_132 = arith.constant 0 : index
    %342 = vector.load %arg15[%c0_130, %c0_131, %c0_132] : memref<2x128x64xf32, #tpu.memory_space<vmem>>, vector<1x128x64xf32>
    %343 = vector.shape_cast %342 : vector<1x128x64xf32> to vector<128x64xf32>
    %cst_133 = arith.constant dense<0.000000e+00> : vector<16x64xf32>
    %344 = tpu.matmul %341, %343, %cst_133 {dimension_numbers = #tpu.dot_dimension_numbers<[1], [0], [0], [1], [0, 0, 1, 1], [], []>} : vector<16x128xf32>, vector<128x64xf32>, vector<16x64xf32> -> vector<16x64xf32>
    %c0_134 = arith.constant 0 : index
    %c0_135 = arith.constant 0 : index
    %c0_136 = arith.constant 0 : index
    %345 = vector.load %arg16[%c0_134, %c0_135, %c0_136] : memref<2x1x64xf32, #tpu.memory_space<vmem>>, vector<1x1x64xf32>
    %346 = vector.shape_cast %345 : vector<1x1x64xf32> to vector<1x64xf32>
    %347 = vector.broadcast %346 : vector<1x64xf32> to vector<16x64xf32>
    %348 = arith.addf %344, %347 : vector<16x64xf32>
    %349 = arith.addf %332, %348 : vector<16x64xf32>
    %c0_137 = arith.constant 0 : index
    %c0_138 = arith.constant 0 : index
    %c0_139 = arith.constant 0 : index
    %350 = vector.load %arg17[%c0_137, %c0_138, %c0_139] : memref<2x1x64xf32, #tpu.memory_space<vmem>>, vector<1x1x64xf32>
    %351 = vector.shape_cast %350 : vector<1x1x64xf32> to vector<1x64xf32>
    %c0_140 = arith.constant 0 : index
    %c0_141 = arith.constant 0 : index
    %c0_142 = arith.constant 0 : index
    %352 = vector.load %arg18[%c0_140, %c0_141, %c0_142] : memref<2x1x64xf32, #tpu.memory_space<vmem>>, vector<1x1x64xf32>
    %353 = vector.shape_cast %352 : vector<1x1x64xf32> to vector<1x64xf32>
    %cst_143 = arith.constant dense<0.000000e+00> : vector<16xf32>
    %354 = vector.multi_reduction <add>, %349, %cst_143 [1] : vector<16x64xf32> to vector<16xf32>
    %355 = vector.shape_cast %354 : vector<16xf32> to vector<16x1xf32>
    %cst_144 = arith.constant 6.400000e+01 : f32
    %356 = vector.broadcast %cst_144 : f32 to vector<16x1xf32>
    %357 = arith.divf %355, %356 : vector<16x1xf32>
    %358 = vector.broadcast %357 : vector<16x1xf32> to vector<16x64xf32>
    %359 = arith.subf %349, %358 : vector<16x64xf32>
    %360 = arith.mulf %359, %359 : vector<16x64xf32>
    %cst_145 = arith.constant dense<0.000000e+00> : vector<16xf32>
    %361 = vector.multi_reduction <add>, %360, %cst_145 [1] : vector<16x64xf32> to vector<16xf32>
    %362 = vector.shape_cast %361 : vector<16xf32> to vector<16x1xf32>
    %cst_146 = arith.constant 6.400000e+01 : f32
    %363 = vector.broadcast %cst_146 : f32 to vector<16x1xf32>
    %364 = arith.divf %362, %363 : vector<16x1xf32>
    %cst_147 = arith.constant 9.99999974E-6 : f32
    %365 = vector.broadcast %cst_147 : f32 to vector<16x1xf32>
    %366 = arith.addf %364, %365 : vector<16x1xf32>
    %367 = math.rsqrt %366 : vector<16x1xf32>
    %368 = vector.broadcast %367 : vector<16x1xf32> to vector<16x64xf32>
    %369 = arith.mulf %359, %368 : vector<16x64xf32>
    %370 = vector.broadcast %351 : vector<1x64xf32> to vector<16x64xf32>
    %371 = arith.mulf %369, %370 : vector<16x64xf32>
    %372 = vector.broadcast %353 : vector<1x64xf32> to vector<16x64xf32>
    %373 = arith.addf %371, %372 : vector<16x64xf32>
    %c1 = arith.constant 1 : index
    %c0_148 = arith.constant 0 : index
    %c0_149 = arith.constant 0 : index
    %374 = vector.load %arg7[%c1, %c0_148, %c0_149] : memref<2x64x192xf32, #tpu.memory_space<vmem>>, vector<1x64x192xf32>
    %375 = vector.shape_cast %374 : vector<1x64x192xf32> to vector<64x192xf32>
    %cst_150 = arith.constant dense<0.000000e+00> : vector<16x192xf32>
    %376 = tpu.matmul %373, %375, %cst_150 {dimension_numbers = #tpu.dot_dimension_numbers<[1], [0], [0], [1], [0, 0, 1, 1], [], []>} : vector<16x64xf32>, vector<64x192xf32>, vector<16x192xf32> -> vector<16x192xf32>
    %c1_151 = arith.constant 1 : index
    %c0_152 = arith.constant 0 : index
    %c0_153 = arith.constant 0 : index
    %377 = vector.load %arg8[%c1_151, %c0_152, %c0_153] : memref<2x1x192xf32, #tpu.memory_space<vmem>>, vector<1x1x192xf32>
    %378 = vector.shape_cast %377 : vector<1x1x192xf32> to vector<1x192xf32>
    %379 = vector.broadcast %378 : vector<1x192xf32> to vector<16x192xf32>
    %380 = arith.addf %376, %379 : vector<16x192xf32>
    %381 = vector.extract_strided_slice %380 {offsets = [0, 0], sizes = [8, 8], strides = [1, 1]} : vector<16x192xf32> to vector<8x8xf32>
    %382 = vector.extract_strided_slice %380 {offsets = [0, 64], sizes = [8, 8], strides = [1, 1]} : vector<16x192xf32> to vector<8x8xf32>
    %383 = vector.extract_strided_slice %380 {offsets = [0, 128], sizes = [8, 8], strides = [1, 1]} : vector<16x192xf32> to vector<8x8xf32>
    %cst_154 = arith.constant dense<0.000000e+00> : vector<8x8xf32>
    %384 = tpu.matmul %381, %382, %cst_154 {dimension_numbers = #tpu.dot_dimension_numbers<[1], [1], [0], [0], [0, 0, 1, 0], [], []>} : vector<8x8xf32>, vector<8x8xf32>, vector<8x8xf32> -> vector<8x8xf32>
    %cst_155 = arith.constant 0.353553385 : f32
    %385 = vector.broadcast %cst_155 : f32 to vector<8x8xf32>
    %386 = arith.mulf %384, %385 : vector<8x8xf32>
    %cst_156 = arith.constant dense<0xFF800000> : vector<8xf32>
    %387 = vector.multi_reduction <maximumf>, %386, %cst_156 [1] : vector<8x8xf32> to vector<8xf32>
    %388 = vector.shape_cast %387 : vector<8xf32> to vector<8x1xf32>
    %389 = vector.broadcast %388 : vector<8x1xf32> to vector<8x8xf32>
    %390 = arith.subf %386, %389 : vector<8x8xf32>
    %391 = math.exp %390 : vector<8x8xf32>
    %cst_157 = arith.constant dense<0.000000e+00> : vector<8xf32>
    %392 = vector.multi_reduction <add>, %391, %cst_157 [1] : vector<8x8xf32> to vector<8xf32>
    %393 = vector.shape_cast %392 : vector<8xf32> to vector<8x1xf32>
    %394 = vector.broadcast %393 : vector<8x1xf32> to vector<8x8xf32>
    %395 = arith.divf %391, %394 : vector<8x8xf32>
    %cst_158 = arith.constant dense<0.000000e+00> : vector<8x8xf32>
    %396 = tpu.matmul %395, %383, %cst_158 {dimension_numbers = #tpu.dot_dimension_numbers<[1], [0], [0], [1], [0, 0, 1, 1], [], []>} : vector<8x8xf32>, vector<8x8xf32>, vector<8x8xf32> -> vector<8x8xf32>
    %397 = vector.extract_strided_slice %380 {offsets = [0, 8], sizes = [8, 8], strides = [1, 1]} : vector<16x192xf32> to vector<8x8xf32>
    %398 = vector.extract_strided_slice %380 {offsets = [0, 72], sizes = [8, 8], strides = [1, 1]} : vector<16x192xf32> to vector<8x8xf32>
    %399 = vector.extract_strided_slice %380 {offsets = [0, 136], sizes = [8, 8], strides = [1, 1]} : vector<16x192xf32> to vector<8x8xf32>
    %cst_159 = arith.constant dense<0.000000e+00> : vector<8x8xf32>
    %400 = tpu.matmul %397, %398, %cst_159 {dimension_numbers = #tpu.dot_dimension_numbers<[1], [1], [0], [0], [0, 0, 1, 0], [], []>} : vector<8x8xf32>, vector<8x8xf32>, vector<8x8xf32> -> vector<8x8xf32>
    %cst_160 = arith.constant 0.353553385 : f32
    %401 = vector.broadcast %cst_160 : f32 to vector<8x8xf32>
    %402 = arith.mulf %400, %401 : vector<8x8xf32>
    %cst_161 = arith.constant dense<0xFF800000> : vector<8xf32>
    %403 = vector.multi_reduction <maximumf>, %402, %cst_161 [1] : vector<8x8xf32> to vector<8xf32>
    %404 = vector.shape_cast %403 : vector<8xf32> to vector<8x1xf32>
    %405 = vector.broadcast %404 : vector<8x1xf32> to vector<8x8xf32>
    %406 = arith.subf %402, %405 : vector<8x8xf32>
    %407 = math.exp %406 : vector<8x8xf32>
    %cst_162 = arith.constant dense<0.000000e+00> : vector<8xf32>
    %408 = vector.multi_reduction <add>, %407, %cst_162 [1] : vector<8x8xf32> to vector<8xf32>
    %409 = vector.shape_cast %408 : vector<8xf32> to vector<8x1xf32>
    %410 = vector.broadcast %409 : vector<8x1xf32> to vector<8x8xf32>
    %411 = arith.divf %407, %410 : vector<8x8xf32>
    %cst_163 = arith.constant dense<0.000000e+00> : vector<8x8xf32>
    %412 = tpu.matmul %411, %399, %cst_163 {dimension_numbers = #tpu.dot_dimension_numbers<[1], [0], [0], [1], [0, 0, 1, 1], [], []>} : vector<8x8xf32>, vector<8x8xf32>, vector<8x8xf32> -> vector<8x8xf32>
    %413 = vector.extract_strided_slice %380 {offsets = [0, 16], sizes = [8, 8], strides = [1, 1]} : vector<16x192xf32> to vector<8x8xf32>
    %414 = vector.extract_strided_slice %380 {offsets = [0, 80], sizes = [8, 8], strides = [1, 1]} : vector<16x192xf32> to vector<8x8xf32>
    %415 = vector.extract_strided_slice %380 {offsets = [0, 144], sizes = [8, 8], strides = [1, 1]} : vector<16x192xf32> to vector<8x8xf32>
    %cst_164 = arith.constant dense<0.000000e+00> : vector<8x8xf32>
    %416 = tpu.matmul %413, %414, %cst_164 {dimension_numbers = #tpu.dot_dimension_numbers<[1], [1], [0], [0], [0, 0, 1, 0], [], []>} : vector<8x8xf32>, vector<8x8xf32>, vector<8x8xf32> -> vector<8x8xf32>
    %cst_165 = arith.constant 0.353553385 : f32
    %417 = vector.broadcast %cst_165 : f32 to vector<8x8xf32>
    %418 = arith.mulf %416, %417 : vector<8x8xf32>
    %cst_166 = arith.constant dense<0xFF800000> : vector<8xf32>
    %419 = vector.multi_reduction <maximumf>, %418, %cst_166 [1] : vector<8x8xf32> to vector<8xf32>
    %420 = vector.shape_cast %419 : vector<8xf32> to vector<8x1xf32>
    %421 = vector.broadcast %420 : vector<8x1xf32> to vector<8x8xf32>
    %422 = arith.subf %418, %421 : vector<8x8xf32>
    %423 = math.exp %422 : vector<8x8xf32>
    %cst_167 = arith.constant dense<0.000000e+00> : vector<8xf32>
    %424 = vector.multi_reduction <add>, %423, %cst_167 [1] : vector<8x8xf32> to vector<8xf32>
    %425 = vector.shape_cast %424 : vector<8xf32> to vector<8x1xf32>
    %426 = vector.broadcast %425 : vector<8x1xf32> to vector<8x8xf32>
    %427 = arith.divf %423, %426 : vector<8x8xf32>
    %cst_168 = arith.constant dense<0.000000e+00> : vector<8x8xf32>
    %428 = tpu.matmul %427, %415, %cst_168 {dimension_numbers = #tpu.dot_dimension_numbers<[1], [0], [0], [1], [0, 0, 1, 1], [], []>} : vector<8x8xf32>, vector<8x8xf32>, vector<8x8xf32> -> vector<8x8xf32>
    %429 = vector.extract_strided_slice %380 {offsets = [0, 24], sizes = [8, 8], strides = [1, 1]} : vector<16x192xf32> to vector<8x8xf32>
    %430 = vector.extract_strided_slice %380 {offsets = [0, 88], sizes = [8, 8], strides = [1, 1]} : vector<16x192xf32> to vector<8x8xf32>
    %431 = vector.extract_strided_slice %380 {offsets = [0, 152], sizes = [8, 8], strides = [1, 1]} : vector<16x192xf32> to vector<8x8xf32>
    %cst_169 = arith.constant dense<0.000000e+00> : vector<8x8xf32>
    %432 = tpu.matmul %429, %430, %cst_169 {dimension_numbers = #tpu.dot_dimension_numbers<[1], [1], [0], [0], [0, 0, 1, 0], [], []>} : vector<8x8xf32>, vector<8x8xf32>, vector<8x8xf32> -> vector<8x8xf32>
    %cst_170 = arith.constant 0.353553385 : f32
    %433 = vector.broadcast %cst_170 : f32 to vector<8x8xf32>
    %434 = arith.mulf %432, %433 : vector<8x8xf32>
    %cst_171 = arith.constant dense<0xFF800000> : vector<8xf32>
    %435 = vector.multi_reduction <maximumf>, %434, %cst_171 [1] : vector<8x8xf32> to vector<8xf32>
    %436 = vector.shape_cast %435 : vector<8xf32> to vector<8x1xf32>
    %437 = vector.broadcast %436 : vector<8x1xf32> to vector<8x8xf32>
    %438 = arith.subf %434, %437 : vector<8x8xf32>
    %439 = math.exp %438 : vector<8x8xf32>
    %cst_172 = arith.constant dense<0.000000e+00> : vector<8xf32>
    %440 = vector.multi_reduction <add>, %439, %cst_172 [1] : vector<8x8xf32> to vector<8xf32>
    %441 = vector.shape_cast %440 : vector<8xf32> to vector<8x1xf32>
    %442 = vector.broadcast %441 : vector<8x1xf32> to vector<8x8xf32>
    %443 = arith.divf %439, %442 : vector<8x8xf32>
    %cst_173 = arith.constant dense<0.000000e+00> : vector<8x8xf32>
    %444 = tpu.matmul %443, %431, %cst_173 {dimension_numbers = #tpu.dot_dimension_numbers<[1], [0], [0], [1], [0, 0, 1, 1], [], []>} : vector<8x8xf32>, vector<8x8xf32>, vector<8x8xf32> -> vector<8x8xf32>
    %445 = vector.extract_strided_slice %380 {offsets = [0, 32], sizes = [8, 8], strides = [1, 1]} : vector<16x192xf32> to vector<8x8xf32>
    %446 = vector.extract_strided_slice %380 {offsets = [0, 96], sizes = [8, 8], strides = [1, 1]} : vector<16x192xf32> to vector<8x8xf32>
    %447 = vector.extract_strided_slice %380 {offsets = [0, 160], sizes = [8, 8], strides = [1, 1]} : vector<16x192xf32> to vector<8x8xf32>
    %cst_174 = arith.constant dense<0.000000e+00> : vector<8x8xf32>
    %448 = tpu.matmul %445, %446, %cst_174 {dimension_numbers = #tpu.dot_dimension_numbers<[1], [1], [0], [0], [0, 0, 1, 0], [], []>} : vector<8x8xf32>, vector<8x8xf32>, vector<8x8xf32> -> vector<8x8xf32>
    %cst_175 = arith.constant 0.353553385 : f32
    %449 = vector.broadcast %cst_175 : f32 to vector<8x8xf32>
    %450 = arith.mulf %448, %449 : vector<8x8xf32>
    %cst_176 = arith.constant dense<0xFF800000> : vector<8xf32>
    %451 = vector.multi_reduction <maximumf>, %450, %cst_176 [1] : vector<8x8xf32> to vector<8xf32>
    %452 = vector.shape_cast %451 : vector<8xf32> to vector<8x1xf32>
    %453 = vector.broadcast %452 : vector<8x1xf32> to vector<8x8xf32>
    %454 = arith.subf %450, %453 : vector<8x8xf32>
    %455 = math.exp %454 : vector<8x8xf32>
    %cst_177 = arith.constant dense<0.000000e+00> : vector<8xf32>
    %456 = vector.multi_reduction <add>, %455, %cst_177 [1] : vector<8x8xf32> to vector<8xf32>
    %457 = vector.shape_cast %456 : vector<8xf32> to vector<8x1xf32>
    %458 = vector.broadcast %457 : vector<8x1xf32> to vector<8x8xf32>
    %459 = arith.divf %455, %458 : vector<8x8xf32>
    %cst_178 = arith.constant dense<0.000000e+00> : vector<8x8xf32>
    %460 = tpu.matmul %459, %447, %cst_178 {dimension_numbers = #tpu.dot_dimension_numbers<[1], [0], [0], [1], [0, 0, 1, 1], [], []>} : vector<8x8xf32>, vector<8x8xf32>, vector<8x8xf32> -> vector<8x8xf32>
    %461 = vector.extract_strided_slice %380 {offsets = [0, 40], sizes = [8, 8], strides = [1, 1]} : vector<16x192xf32> to vector<8x8xf32>
    %462 = vector.extract_strided_slice %380 {offsets = [0, 104], sizes = [8, 8], strides = [1, 1]} : vector<16x192xf32> to vector<8x8xf32>
    %463 = vector.extract_strided_slice %380 {offsets = [0, 168], sizes = [8, 8], strides = [1, 1]} : vector<16x192xf32> to vector<8x8xf32>
    %cst_179 = arith.constant dense<0.000000e+00> : vector<8x8xf32>
    %464 = tpu.matmul %461, %462, %cst_179 {dimension_numbers = #tpu.dot_dimension_numbers<[1], [1], [0], [0], [0, 0, 1, 0], [], []>} : vector<8x8xf32>, vector<8x8xf32>, vector<8x8xf32> -> vector<8x8xf32>
    %cst_180 = arith.constant 0.353553385 : f32
    %465 = vector.broadcast %cst_180 : f32 to vector<8x8xf32>
    %466 = arith.mulf %464, %465 : vector<8x8xf32>
    %cst_181 = arith.constant dense<0xFF800000> : vector<8xf32>
    %467 = vector.multi_reduction <maximumf>, %466, %cst_181 [1] : vector<8x8xf32> to vector<8xf32>
    %468 = vector.shape_cast %467 : vector<8xf32> to vector<8x1xf32>
    %469 = vector.broadcast %468 : vector<8x1xf32> to vector<8x8xf32>
    %470 = arith.subf %466, %469 : vector<8x8xf32>
    %471 = math.exp %470 : vector<8x8xf32>
    %cst_182 = arith.constant dense<0.000000e+00> : vector<8xf32>
    %472 = vector.multi_reduction <add>, %471, %cst_182 [1] : vector<8x8xf32> to vector<8xf32>
    %473 = vector.shape_cast %472 : vector<8xf32> to vector<8x1xf32>
    %474 = vector.broadcast %473 : vector<8x1xf32> to vector<8x8xf32>
    %475 = arith.divf %471, %474 : vector<8x8xf32>
    %cst_183 = arith.constant dense<0.000000e+00> : vector<8x8xf32>
    %476 = tpu.matmul %475, %463, %cst_183 {dimension_numbers = #tpu.dot_dimension_numbers<[1], [0], [0], [1], [0, 0, 1, 1], [], []>} : vector<8x8xf32>, vector<8x8xf32>, vector<8x8xf32> -> vector<8x8xf32>
    %477 = vector.extract_strided_slice %380 {offsets = [0, 48], sizes = [8, 8], strides = [1, 1]} : vector<16x192xf32> to vector<8x8xf32>
    %478 = vector.extract_strided_slice %380 {offsets = [0, 112], sizes = [8, 8], strides = [1, 1]} : vector<16x192xf32> to vector<8x8xf32>
    %479 = vector.extract_strided_slice %380 {offsets = [0, 176], sizes = [8, 8], strides = [1, 1]} : vector<16x192xf32> to vector<8x8xf32>
    %cst_184 = arith.constant dense<0.000000e+00> : vector<8x8xf32>
    %480 = tpu.matmul %477, %478, %cst_184 {dimension_numbers = #tpu.dot_dimension_numbers<[1], [1], [0], [0], [0, 0, 1, 0], [], []>} : vector<8x8xf32>, vector<8x8xf32>, vector<8x8xf32> -> vector<8x8xf32>
    %cst_185 = arith.constant 0.353553385 : f32
    %481 = vector.broadcast %cst_185 : f32 to vector<8x8xf32>
    %482 = arith.mulf %480, %481 : vector<8x8xf32>
    %cst_186 = arith.constant dense<0xFF800000> : vector<8xf32>
    %483 = vector.multi_reduction <maximumf>, %482, %cst_186 [1] : vector<8x8xf32> to vector<8xf32>
    %484 = vector.shape_cast %483 : vector<8xf32> to vector<8x1xf32>
    %485 = vector.broadcast %484 : vector<8x1xf32> to vector<8x8xf32>
    %486 = arith.subf %482, %485 : vector<8x8xf32>
    %487 = math.exp %486 : vector<8x8xf32>
    %cst_187 = arith.constant dense<0.000000e+00> : vector<8xf32>
    %488 = vector.multi_reduction <add>, %487, %cst_187 [1] : vector<8x8xf32> to vector<8xf32>
    %489 = vector.shape_cast %488 : vector<8xf32> to vector<8x1xf32>
    %490 = vector.broadcast %489 : vector<8x1xf32> to vector<8x8xf32>
    %491 = arith.divf %487, %490 : vector<8x8xf32>
    %cst_188 = arith.constant dense<0.000000e+00> : vector<8x8xf32>
    %492 = tpu.matmul %491, %479, %cst_188 {dimension_numbers = #tpu.dot_dimension_numbers<[1], [0], [0], [1], [0, 0, 1, 1], [], []>} : vector<8x8xf32>, vector<8x8xf32>, vector<8x8xf32> -> vector<8x8xf32>
    %493 = vector.extract_strided_slice %380 {offsets = [0, 56], sizes = [8, 8], strides = [1, 1]} : vector<16x192xf32> to vector<8x8xf32>
    %494 = vector.extract_strided_slice %380 {offsets = [0, 120], sizes = [8, 8], strides = [1, 1]} : vector<16x192xf32> to vector<8x8xf32>
    %495 = vector.extract_strided_slice %380 {offsets = [0, 184], sizes = [8, 8], strides = [1, 1]} : vector<16x192xf32> to vector<8x8xf32>
    %cst_189 = arith.constant dense<0.000000e+00> : vector<8x8xf32>
    %496 = tpu.matmul %493, %494, %cst_189 {dimension_numbers = #tpu.dot_dimension_numbers<[1], [1], [0], [0], [0, 0, 1, 0], [], []>} : vector<8x8xf32>, vector<8x8xf32>, vector<8x8xf32> -> vector<8x8xf32>
    %cst_190 = arith.constant 0.353553385 : f32
    %497 = vector.broadcast %cst_190 : f32 to vector<8x8xf32>
    %498 = arith.mulf %496, %497 : vector<8x8xf32>
    %cst_191 = arith.constant dense<0xFF800000> : vector<8xf32>
    %499 = vector.multi_reduction <maximumf>, %498, %cst_191 [1] : vector<8x8xf32> to vector<8xf32>
    %500 = vector.shape_cast %499 : vector<8xf32> to vector<8x1xf32>
    %501 = vector.broadcast %500 : vector<8x1xf32> to vector<8x8xf32>
    %502 = arith.subf %498, %501 : vector<8x8xf32>
    %503 = math.exp %502 : vector<8x8xf32>
    %cst_192 = arith.constant dense<0.000000e+00> : vector<8xf32>
    %504 = vector.multi_reduction <add>, %503, %cst_192 [1] : vector<8x8xf32> to vector<8xf32>
    %505 = vector.shape_cast %504 : vector<8xf32> to vector<8x1xf32>
    %506 = vector.broadcast %505 : vector<8x1xf32> to vector<8x8xf32>
    %507 = arith.divf %503, %506 : vector<8x8xf32>
    %cst_193 = arith.constant dense<0.000000e+00> : vector<8x8xf32>
    %508 = tpu.matmul %507, %495, %cst_193 {dimension_numbers = #tpu.dot_dimension_numbers<[1], [0], [0], [1], [0, 0, 1, 1], [], []>} : vector<8x8xf32>, vector<8x8xf32>, vector<8x8xf32> -> vector<8x8xf32>
    %509 = tpu.concatenate %396, %412, %428, %444, %460, %476, %492, %508 in 1 : vector<8x8xf32>, vector<8x8xf32>, vector<8x8xf32>, vector<8x8xf32>, vector<8x8xf32>, vector<8x8xf32>, vector<8x8xf32>, vector<8x8xf32> -> vector<8x64xf32>
    %510 = vector.extract_strided_slice %380 {offsets = [8, 0], sizes = [8, 8], strides = [1, 1]} : vector<16x192xf32> to vector<8x8xf32>
    %511 = vector.extract_strided_slice %380 {offsets = [8, 64], sizes = [8, 8], strides = [1, 1]} : vector<16x192xf32> to vector<8x8xf32>
    %512 = vector.extract_strided_slice %380 {offsets = [8, 128], sizes = [8, 8], strides = [1, 1]} : vector<16x192xf32> to vector<8x8xf32>
    %cst_194 = arith.constant dense<0.000000e+00> : vector<8x8xf32>
    %513 = tpu.matmul %510, %511, %cst_194 {dimension_numbers = #tpu.dot_dimension_numbers<[1], [1], [0], [0], [0, 0, 1, 0], [], []>} : vector<8x8xf32>, vector<8x8xf32>, vector<8x8xf32> -> vector<8x8xf32>
    %cst_195 = arith.constant 0.353553385 : f32
    %514 = vector.broadcast %cst_195 : f32 to vector<8x8xf32>
    %515 = arith.mulf %513, %514 : vector<8x8xf32>
    %cst_196 = arith.constant dense<0xFF800000> : vector<8xf32>
    %516 = vector.multi_reduction <maximumf>, %515, %cst_196 [1] : vector<8x8xf32> to vector<8xf32>
    %517 = vector.shape_cast %516 : vector<8xf32> to vector<8x1xf32>
    %518 = vector.broadcast %517 : vector<8x1xf32> to vector<8x8xf32>
    %519 = arith.subf %515, %518 : vector<8x8xf32>
    %520 = math.exp %519 : vector<8x8xf32>
    %cst_197 = arith.constant dense<0.000000e+00> : vector<8xf32>
    %521 = vector.multi_reduction <add>, %520, %cst_197 [1] : vector<8x8xf32> to vector<8xf32>
    %522 = vector.shape_cast %521 : vector<8xf32> to vector<8x1xf32>
    %523 = vector.broadcast %522 : vector<8x1xf32> to vector<8x8xf32>
    %524 = arith.divf %520, %523 : vector<8x8xf32>
    %cst_198 = arith.constant dense<0.000000e+00> : vector<8x8xf32>
    %525 = tpu.matmul %524, %512, %cst_198 {dimension_numbers = #tpu.dot_dimension_numbers<[1], [0], [0], [1], [0, 0, 1, 1], [], []>} : vector<8x8xf32>, vector<8x8xf32>, vector<8x8xf32> -> vector<8x8xf32>
    %526 = vector.extract_strided_slice %380 {offsets = [8, 8], sizes = [8, 8], strides = [1, 1]} : vector<16x192xf32> to vector<8x8xf32>
    %527 = vector.extract_strided_slice %380 {offsets = [8, 72], sizes = [8, 8], strides = [1, 1]} : vector<16x192xf32> to vector<8x8xf32>
    %528 = vector.extract_strided_slice %380 {offsets = [8, 136], sizes = [8, 8], strides = [1, 1]} : vector<16x192xf32> to vector<8x8xf32>
    %cst_199 = arith.constant dense<0.000000e+00> : vector<8x8xf32>
    %529 = tpu.matmul %526, %527, %cst_199 {dimension_numbers = #tpu.dot_dimension_numbers<[1], [1], [0], [0], [0, 0, 1, 0], [], []>} : vector<8x8xf32>, vector<8x8xf32>, vector<8x8xf32> -> vector<8x8xf32>
    %cst_200 = arith.constant 0.353553385 : f32
    %530 = vector.broadcast %cst_200 : f32 to vector<8x8xf32>
    %531 = arith.mulf %529, %530 : vector<8x8xf32>
    %cst_201 = arith.constant dense<0xFF800000> : vector<8xf32>
    %532 = vector.multi_reduction <maximumf>, %531, %cst_201 [1] : vector<8x8xf32> to vector<8xf32>
    %533 = vector.shape_cast %532 : vector<8xf32> to vector<8x1xf32>
    %534 = vector.broadcast %533 : vector<8x1xf32> to vector<8x8xf32>
    %535 = arith.subf %531, %534 : vector<8x8xf32>
    %536 = math.exp %535 : vector<8x8xf32>
    %cst_202 = arith.constant dense<0.000000e+00> : vector<8xf32>
    %537 = vector.multi_reduction <add>, %536, %cst_202 [1] : vector<8x8xf32> to vector<8xf32>
    %538 = vector.shape_cast %537 : vector<8xf32> to vector<8x1xf32>
    %539 = vector.broadcast %538 : vector<8x1xf32> to vector<8x8xf32>
    %540 = arith.divf %536, %539 : vector<8x8xf32>
    %cst_203 = arith.constant dense<0.000000e+00> : vector<8x8xf32>
    %541 = tpu.matmul %540, %528, %cst_203 {dimension_numbers = #tpu.dot_dimension_numbers<[1], [0], [0], [1], [0, 0, 1, 1], [], []>} : vector<8x8xf32>, vector<8x8xf32>, vector<8x8xf32> -> vector<8x8xf32>
    %542 = vector.extract_strided_slice %380 {offsets = [8, 16], sizes = [8, 8], strides = [1, 1]} : vector<16x192xf32> to vector<8x8xf32>
    %543 = vector.extract_strided_slice %380 {offsets = [8, 80], sizes = [8, 8], strides = [1, 1]} : vector<16x192xf32> to vector<8x8xf32>
    %544 = vector.extract_strided_slice %380 {offsets = [8, 144], sizes = [8, 8], strides = [1, 1]} : vector<16x192xf32> to vector<8x8xf32>
    %cst_204 = arith.constant dense<0.000000e+00> : vector<8x8xf32>
    %545 = tpu.matmul %542, %543, %cst_204 {dimension_numbers = #tpu.dot_dimension_numbers<[1], [1], [0], [0], [0, 0, 1, 0], [], []>} : vector<8x8xf32>, vector<8x8xf32>, vector<8x8xf32> -> vector<8x8xf32>
    %cst_205 = arith.constant 0.353553385 : f32
    %546 = vector.broadcast %cst_205 : f32 to vector<8x8xf32>
    %547 = arith.mulf %545, %546 : vector<8x8xf32>
    %cst_206 = arith.constant dense<0xFF800000> : vector<8xf32>
    %548 = vector.multi_reduction <maximumf>, %547, %cst_206 [1] : vector<8x8xf32> to vector<8xf32>
    %549 = vector.shape_cast %548 : vector<8xf32> to vector<8x1xf32>
    %550 = vector.broadcast %549 : vector<8x1xf32> to vector<8x8xf32>
    %551 = arith.subf %547, %550 : vector<8x8xf32>
    %552 = math.exp %551 : vector<8x8xf32>
    %cst_207 = arith.constant dense<0.000000e+00> : vector<8xf32>
    %553 = vector.multi_reduction <add>, %552, %cst_207 [1] : vector<8x8xf32> to vector<8xf32>
    %554 = vector.shape_cast %553 : vector<8xf32> to vector<8x1xf32>
    %555 = vector.broadcast %554 : vector<8x1xf32> to vector<8x8xf32>
    %556 = arith.divf %552, %555 : vector<8x8xf32>
    %cst_208 = arith.constant dense<0.000000e+00> : vector<8x8xf32>
    %557 = tpu.matmul %556, %544, %cst_208 {dimension_numbers = #tpu.dot_dimension_numbers<[1], [0], [0], [1], [0, 0, 1, 1], [], []>} : vector<8x8xf32>, vector<8x8xf32>, vector<8x8xf32> -> vector<8x8xf32>
    %558 = vector.extract_strided_slice %380 {offsets = [8, 24], sizes = [8, 8], strides = [1, 1]} : vector<16x192xf32> to vector<8x8xf32>
    %559 = vector.extract_strided_slice %380 {offsets = [8, 88], sizes = [8, 8], strides = [1, 1]} : vector<16x192xf32> to vector<8x8xf32>
    %560 = vector.extract_strided_slice %380 {offsets = [8, 152], sizes = [8, 8], strides = [1, 1]} : vector<16x192xf32> to vector<8x8xf32>
    %cst_209 = arith.constant dense<0.000000e+00> : vector<8x8xf32>
    %561 = tpu.matmul %558, %559, %cst_209 {dimension_numbers = #tpu.dot_dimension_numbers<[1], [1], [0], [0], [0, 0, 1, 0], [], []>} : vector<8x8xf32>, vector<8x8xf32>, vector<8x8xf32> -> vector<8x8xf32>
    %cst_210 = arith.constant 0.353553385 : f32
    %562 = vector.broadcast %cst_210 : f32 to vector<8x8xf32>
    %563 = arith.mulf %561, %562 : vector<8x8xf32>
    %cst_211 = arith.constant dense<0xFF800000> : vector<8xf32>
    %564 = vector.multi_reduction <maximumf>, %563, %cst_211 [1] : vector<8x8xf32> to vector<8xf32>
    %565 = vector.shape_cast %564 : vector<8xf32> to vector<8x1xf32>
    %566 = vector.broadcast %565 : vector<8x1xf32> to vector<8x8xf32>
    %567 = arith.subf %563, %566 : vector<8x8xf32>
    %568 = math.exp %567 : vector<8x8xf32>
    %cst_212 = arith.constant dense<0.000000e+00> : vector<8xf32>
    %569 = vector.multi_reduction <add>, %568, %cst_212 [1] : vector<8x8xf32> to vector<8xf32>
    %570 = vector.shape_cast %569 : vector<8xf32> to vector<8x1xf32>
    %571 = vector.broadcast %570 : vector<8x1xf32> to vector<8x8xf32>
    %572 = arith.divf %568, %571 : vector<8x8xf32>
    %cst_213 = arith.constant dense<0.000000e+00> : vector<8x8xf32>
    %573 = tpu.matmul %572, %560, %cst_213 {dimension_numbers = #tpu.dot_dimension_numbers<[1], [0], [0], [1], [0, 0, 1, 1], [], []>} : vector<8x8xf32>, vector<8x8xf32>, vector<8x8xf32> -> vector<8x8xf32>
    %574 = vector.extract_strided_slice %380 {offsets = [8, 32], sizes = [8, 8], strides = [1, 1]} : vector<16x192xf32> to vector<8x8xf32>
    %575 = vector.extract_strided_slice %380 {offsets = [8, 96], sizes = [8, 8], strides = [1, 1]} : vector<16x192xf32> to vector<8x8xf32>
    %576 = vector.extract_strided_slice %380 {offsets = [8, 160], sizes = [8, 8], strides = [1, 1]} : vector<16x192xf32> to vector<8x8xf32>
    %cst_214 = arith.constant dense<0.000000e+00> : vector<8x8xf32>
    %577 = tpu.matmul %574, %575, %cst_214 {dimension_numbers = #tpu.dot_dimension_numbers<[1], [1], [0], [0], [0, 0, 1, 0], [], []>} : vector<8x8xf32>, vector<8x8xf32>, vector<8x8xf32> -> vector<8x8xf32>
    %cst_215 = arith.constant 0.353553385 : f32
    %578 = vector.broadcast %cst_215 : f32 to vector<8x8xf32>
    %579 = arith.mulf %577, %578 : vector<8x8xf32>
    %cst_216 = arith.constant dense<0xFF800000> : vector<8xf32>
    %580 = vector.multi_reduction <maximumf>, %579, %cst_216 [1] : vector<8x8xf32> to vector<8xf32>
    %581 = vector.shape_cast %580 : vector<8xf32> to vector<8x1xf32>
    %582 = vector.broadcast %581 : vector<8x1xf32> to vector<8x8xf32>
    %583 = arith.subf %579, %582 : vector<8x8xf32>
    %584 = math.exp %583 : vector<8x8xf32>
    %cst_217 = arith.constant dense<0.000000e+00> : vector<8xf32>
    %585 = vector.multi_reduction <add>, %584, %cst_217 [1] : vector<8x8xf32> to vector<8xf32>
    %586 = vector.shape_cast %585 : vector<8xf32> to vector<8x1xf32>
    %587 = vector.broadcast %586 : vector<8x1xf32> to vector<8x8xf32>
    %588 = arith.divf %584, %587 : vector<8x8xf32>
    %cst_218 = arith.constant dense<0.000000e+00> : vector<8x8xf32>
    %589 = tpu.matmul %588, %576, %cst_218 {dimension_numbers = #tpu.dot_dimension_numbers<[1], [0], [0], [1], [0, 0, 1, 1], [], []>} : vector<8x8xf32>, vector<8x8xf32>, vector<8x8xf32> -> vector<8x8xf32>
    %590 = vector.extract_strided_slice %380 {offsets = [8, 40], sizes = [8, 8], strides = [1, 1]} : vector<16x192xf32> to vector<8x8xf32>
    %591 = vector.extract_strided_slice %380 {offsets = [8, 104], sizes = [8, 8], strides = [1, 1]} : vector<16x192xf32> to vector<8x8xf32>
    %592 = vector.extract_strided_slice %380 {offsets = [8, 168], sizes = [8, 8], strides = [1, 1]} : vector<16x192xf32> to vector<8x8xf32>
    %cst_219 = arith.constant dense<0.000000e+00> : vector<8x8xf32>
    %593 = tpu.matmul %590, %591, %cst_219 {dimension_numbers = #tpu.dot_dimension_numbers<[1], [1], [0], [0], [0, 0, 1, 0], [], []>} : vector<8x8xf32>, vector<8x8xf32>, vector<8x8xf32> -> vector<8x8xf32>
    %cst_220 = arith.constant 0.353553385 : f32
    %594 = vector.broadcast %cst_220 : f32 to vector<8x8xf32>
    %595 = arith.mulf %593, %594 : vector<8x8xf32>
    %cst_221 = arith.constant dense<0xFF800000> : vector<8xf32>
    %596 = vector.multi_reduction <maximumf>, %595, %cst_221 [1] : vector<8x8xf32> to vector<8xf32>
    %597 = vector.shape_cast %596 : vector<8xf32> to vector<8x1xf32>
    %598 = vector.broadcast %597 : vector<8x1xf32> to vector<8x8xf32>
    %599 = arith.subf %595, %598 : vector<8x8xf32>
    %600 = math.exp %599 : vector<8x8xf32>
    %cst_222 = arith.constant dense<0.000000e+00> : vector<8xf32>
    %601 = vector.multi_reduction <add>, %600, %cst_222 [1] : vector<8x8xf32> to vector<8xf32>
    %602 = vector.shape_cast %601 : vector<8xf32> to vector<8x1xf32>
    %603 = vector.broadcast %602 : vector<8x1xf32> to vector<8x8xf32>
    %604 = arith.divf %600, %603 : vector<8x8xf32>
    %cst_223 = arith.constant dense<0.000000e+00> : vector<8x8xf32>
    %605 = tpu.matmul %604, %592, %cst_223 {dimension_numbers = #tpu.dot_dimension_numbers<[1], [0], [0], [1], [0, 0, 1, 1], [], []>} : vector<8x8xf32>, vector<8x8xf32>, vector<8x8xf32> -> vector<8x8xf32>
    %606 = vector.extract_strided_slice %380 {offsets = [8, 48], sizes = [8, 8], strides = [1, 1]} : vector<16x192xf32> to vector<8x8xf32>
    %607 = vector.extract_strided_slice %380 {offsets = [8, 112], sizes = [8, 8], strides = [1, 1]} : vector<16x192xf32> to vector<8x8xf32>
    %608 = vector.extract_strided_slice %380 {offsets = [8, 176], sizes = [8, 8], strides = [1, 1]} : vector<16x192xf32> to vector<8x8xf32>
    %cst_224 = arith.constant dense<0.000000e+00> : vector<8x8xf32>
    %609 = tpu.matmul %606, %607, %cst_224 {dimension_numbers = #tpu.dot_dimension_numbers<[1], [1], [0], [0], [0, 0, 1, 0], [], []>} : vector<8x8xf32>, vector<8x8xf32>, vector<8x8xf32> -> vector<8x8xf32>
    %cst_225 = arith.constant 0.353553385 : f32
    %610 = vector.broadcast %cst_225 : f32 to vector<8x8xf32>
    %611 = arith.mulf %609, %610 : vector<8x8xf32>
    %cst_226 = arith.constant dense<0xFF800000> : vector<8xf32>
    %612 = vector.multi_reduction <maximumf>, %611, %cst_226 [1] : vector<8x8xf32> to vector<8xf32>
    %613 = vector.shape_cast %612 : vector<8xf32> to vector<8x1xf32>
    %614 = vector.broadcast %613 : vector<8x1xf32> to vector<8x8xf32>
    %615 = arith.subf %611, %614 : vector<8x8xf32>
    %616 = math.exp %615 : vector<8x8xf32>
    %cst_227 = arith.constant dense<0.000000e+00> : vector<8xf32>
    %617 = vector.multi_reduction <add>, %616, %cst_227 [1] : vector<8x8xf32> to vector<8xf32>
    %618 = vector.shape_cast %617 : vector<8xf32> to vector<8x1xf32>
    %619 = vector.broadcast %618 : vector<8x1xf32> to vector<8x8xf32>
    %620 = arith.divf %616, %619 : vector<8x8xf32>
    %cst_228 = arith.constant dense<0.000000e+00> : vector<8x8xf32>
    %621 = tpu.matmul %620, %608, %cst_228 {dimension_numbers = #tpu.dot_dimension_numbers<[1], [0], [0], [1], [0, 0, 1, 1], [], []>} : vector<8x8xf32>, vector<8x8xf32>, vector<8x8xf32> -> vector<8x8xf32>
    %622 = vector.extract_strided_slice %380 {offsets = [8, 56], sizes = [8, 8], strides = [1, 1]} : vector<16x192xf32> to vector<8x8xf32>
    %623 = vector.extract_strided_slice %380 {offsets = [8, 120], sizes = [8, 8], strides = [1, 1]} : vector<16x192xf32> to vector<8x8xf32>
    %624 = vector.extract_strided_slice %380 {offsets = [8, 184], sizes = [8, 8], strides = [1, 1]} : vector<16x192xf32> to vector<8x8xf32>
    %cst_229 = arith.constant dense<0.000000e+00> : vector<8x8xf32>
    %625 = tpu.matmul %622, %623, %cst_229 {dimension_numbers = #tpu.dot_dimension_numbers<[1], [1], [0], [0], [0, 0, 1, 0], [], []>} : vector<8x8xf32>, vector<8x8xf32>, vector<8x8xf32> -> vector<8x8xf32>
    %cst_230 = arith.constant 0.353553385 : f32
    %626 = vector.broadcast %cst_230 : f32 to vector<8x8xf32>
    %627 = arith.mulf %625, %626 : vector<8x8xf32>
    %cst_231 = arith.constant dense<0xFF800000> : vector<8xf32>
    %628 = vector.multi_reduction <maximumf>, %627, %cst_231 [1] : vector<8x8xf32> to vector<8xf32>
    %629 = vector.shape_cast %628 : vector<8xf32> to vector<8x1xf32>
    %630 = vector.broadcast %629 : vector<8x1xf32> to vector<8x8xf32>
    %631 = arith.subf %627, %630 : vector<8x8xf32>
    %632 = math.exp %631 : vector<8x8xf32>
    %cst_232 = arith.constant dense<0.000000e+00> : vector<8xf32>
    %633 = vector.multi_reduction <add>, %632, %cst_232 [1] : vector<8x8xf32> to vector<8xf32>
    %634 = vector.shape_cast %633 : vector<8xf32> to vector<8x1xf32>
    %635 = vector.broadcast %634 : vector<8x1xf32> to vector<8x8xf32>
    %636 = arith.divf %632, %635 : vector<8x8xf32>
    %cst_233 = arith.constant dense<0.000000e+00> : vector<8x8xf32>
    %637 = tpu.matmul %636, %624, %cst_233 {dimension_numbers = #tpu.dot_dimension_numbers<[1], [0], [0], [1], [0, 0, 1, 1], [], []>} : vector<8x8xf32>, vector<8x8xf32>, vector<8x8xf32> -> vector<8x8xf32>
    %638 = tpu.concatenate %525, %541, %557, %573, %589, %605, %621, %637 in 1 : vector<8x8xf32>, vector<8x8xf32>, vector<8x8xf32>, vector<8x8xf32>, vector<8x8xf32>, vector<8x8xf32>, vector<8x8xf32>, vector<8x8xf32> -> vector<8x64xf32>
    %639 = tpu.concatenate %509, %638 in 0 : vector<8x64xf32>, vector<8x64xf32> -> vector<16x64xf32>
    %c1_234 = arith.constant 1 : index
    %c0_235 = arith.constant 0 : index
    %c0_236 = arith.constant 0 : index
    %640 = vector.load %arg9[%c1_234, %c0_235, %c0_236] : memref<2x64x64xf32, #tpu.memory_space<vmem>>, vector<1x64x64xf32>
    %641 = vector.shape_cast %640 : vector<1x64x64xf32> to vector<64x64xf32>
    %cst_237 = arith.constant dense<0.000000e+00> : vector<16x64xf32>
    %642 = tpu.matmul %639, %641, %cst_237 {dimension_numbers = #tpu.dot_dimension_numbers<[1], [0], [0], [1], [0, 0, 1, 1], [], []>} : vector<16x64xf32>, vector<64x64xf32>, vector<16x64xf32> -> vector<16x64xf32>
    %c1_238 = arith.constant 1 : index
    %c0_239 = arith.constant 0 : index
    %c0_240 = arith.constant 0 : index
    %643 = vector.load %arg10[%c1_238, %c0_239, %c0_240] : memref<2x1x64xf32, #tpu.memory_space<vmem>>, vector<1x1x64xf32>
    %644 = vector.shape_cast %643 : vector<1x1x64xf32> to vector<1x64xf32>
    %645 = vector.broadcast %644 : vector<1x64xf32> to vector<16x64xf32>
    %646 = arith.addf %642, %645 : vector<16x64xf32>
    %647 = arith.addf %373, %646 : vector<16x64xf32>
    %c1_241 = arith.constant 1 : index
    %c0_242 = arith.constant 0 : index
    %c0_243 = arith.constant 0 : index
    %648 = vector.load %arg11[%c1_241, %c0_242, %c0_243] : memref<2x1x64xf32, #tpu.memory_space<vmem>>, vector<1x1x64xf32>
    %649 = vector.shape_cast %648 : vector<1x1x64xf32> to vector<1x64xf32>
    %c1_244 = arith.constant 1 : index
    %c0_245 = arith.constant 0 : index
    %c0_246 = arith.constant 0 : index
    %650 = vector.load %arg12[%c1_244, %c0_245, %c0_246] : memref<2x1x64xf32, #tpu.memory_space<vmem>>, vector<1x1x64xf32>
    %651 = vector.shape_cast %650 : vector<1x1x64xf32> to vector<1x64xf32>
    %cst_247 = arith.constant dense<0.000000e+00> : vector<16xf32>
    %652 = vector.multi_reduction <add>, %647, %cst_247 [1] : vector<16x64xf32> to vector<16xf32>
    %653 = vector.shape_cast %652 : vector<16xf32> to vector<16x1xf32>
    %cst_248 = arith.constant 6.400000e+01 : f32
    %654 = vector.broadcast %cst_248 : f32 to vector<16x1xf32>
    %655 = arith.divf %653, %654 : vector<16x1xf32>
    %656 = vector.broadcast %655 : vector<16x1xf32> to vector<16x64xf32>
    %657 = arith.subf %647, %656 : vector<16x64xf32>
    %658 = arith.mulf %657, %657 : vector<16x64xf32>
    %cst_249 = arith.constant dense<0.000000e+00> : vector<16xf32>
    %659 = vector.multi_reduction <add>, %658, %cst_249 [1] : vector<16x64xf32> to vector<16xf32>
    %660 = vector.shape_cast %659 : vector<16xf32> to vector<16x1xf32>
    %cst_250 = arith.constant 6.400000e+01 : f32
    %661 = vector.broadcast %cst_250 : f32 to vector<16x1xf32>
    %662 = arith.divf %660, %661 : vector<16x1xf32>
    %cst_251 = arith.constant 9.99999974E-6 : f32
    %663 = vector.broadcast %cst_251 : f32 to vector<16x1xf32>
    %664 = arith.addf %662, %663 : vector<16x1xf32>
    %665 = math.rsqrt %664 : vector<16x1xf32>
    %666 = vector.broadcast %665 : vector<16x1xf32> to vector<16x64xf32>
    %667 = arith.mulf %657, %666 : vector<16x64xf32>
    %668 = vector.broadcast %649 : vector<1x64xf32> to vector<16x64xf32>
    %669 = arith.mulf %667, %668 : vector<16x64xf32>
    %670 = vector.broadcast %651 : vector<1x64xf32> to vector<16x64xf32>
    %671 = arith.addf %669, %670 : vector<16x64xf32>
    %c1_252 = arith.constant 1 : index
    %c0_253 = arith.constant 0 : index
    %c0_254 = arith.constant 0 : index
    %672 = vector.load %arg13[%c1_252, %c0_253, %c0_254] : memref<2x64x128xf32, #tpu.memory_space<vmem>>, vector<1x64x128xf32>
    %673 = vector.shape_cast %672 : vector<1x64x128xf32> to vector<64x128xf32>
    %cst_255 = arith.constant dense<0.000000e+00> : vector<16x128xf32>
    %674 = tpu.matmul %671, %673, %cst_255 {dimension_numbers = #tpu.dot_dimension_numbers<[1], [0], [0], [1], [0, 0, 1, 1], [], []>} : vector<16x64xf32>, vector<64x128xf32>, vector<16x128xf32> -> vector<16x128xf32>
    %c1_256 = arith.constant 1 : index
    %c0_257 = arith.constant 0 : index
    %c0_258 = arith.constant 0 : index
    %675 = vector.load %arg14[%c1_256, %c0_257, %c0_258] : memref<2x1x128xf32, #tpu.memory_space<vmem>>, vector<1x1x128xf32>
    %676 = vector.shape_cast %675 : vector<1x1x128xf32> to vector<1x128xf32>
    %677 = vector.broadcast %676 : vector<1x128xf32> to vector<16x128xf32>
    %678 = arith.addf %674, %677 : vector<16x128xf32>
    %cst_259 = arith.constant 0.000000e+00 : f32
    %679 = vector.broadcast %cst_259 : f32 to vector<16x128xf32>
    %680 = arith.maximumf %678, %679 : vector<16x128xf32>
    %c1_260 = arith.constant 1 : index
    %c0_261 = arith.constant 0 : index
    %c0_262 = arith.constant 0 : index
    %681 = vector.load %arg15[%c1_260, %c0_261, %c0_262] : memref<2x128x64xf32, #tpu.memory_space<vmem>>, vector<1x128x64xf32>
    %682 = vector.shape_cast %681 : vector<1x128x64xf32> to vector<128x64xf32>
    %cst_263 = arith.constant dense<0.000000e+00> : vector<16x64xf32>
    %683 = tpu.matmul %680, %682, %cst_263 {dimension_numbers = #tpu.dot_dimension_numbers<[1], [0], [0], [1], [0, 0, 1, 1], [], []>} : vector<16x128xf32>, vector<128x64xf32>, vector<16x64xf32> -> vector<16x64xf32>
    %c1_264 = arith.constant 1 : index
    %c0_265 = arith.constant 0 : index
    %c0_266 = arith.constant 0 : index
    %684 = vector.load %arg16[%c1_264, %c0_265, %c0_266] : memref<2x1x64xf32, #tpu.memory_space<vmem>>, vector<1x1x64xf32>
    %685 = vector.shape_cast %684 : vector<1x1x64xf32> to vector<1x64xf32>
    %686 = vector.broadcast %685 : vector<1x64xf32> to vector<16x64xf32>
    %687 = arith.addf %683, %686 : vector<16x64xf32>
    %688 = arith.addf %671, %687 : vector<16x64xf32>
    %c1_267 = arith.constant 1 : index
    %c0_268 = arith.constant 0 : index
    %c0_269 = arith.constant 0 : index
    %689 = vector.load %arg17[%c1_267, %c0_268, %c0_269] : memref<2x1x64xf32, #tpu.memory_space<vmem>>, vector<1x1x64xf32>
    %690 = vector.shape_cast %689 : vector<1x1x64xf32> to vector<1x64xf32>
    %c1_270 = arith.constant 1 : index
    %c0_271 = arith.constant 0 : index
    %c0_272 = arith.constant 0 : index
    %691 = vector.load %arg18[%c1_270, %c0_271, %c0_272] : memref<2x1x64xf32, #tpu.memory_space<vmem>>, vector<1x1x64xf32>
    %692 = vector.shape_cast %691 : vector<1x1x64xf32> to vector<1x64xf32>
    %cst_273 = arith.constant dense<0.000000e+00> : vector<16xf32>
    %693 = vector.multi_reduction <add>, %688, %cst_273 [1] : vector<16x64xf32> to vector<16xf32>
    %694 = vector.shape_cast %693 : vector<16xf32> to vector<16x1xf32>
    %cst_274 = arith.constant 6.400000e+01 : f32
    %695 = vector.broadcast %cst_274 : f32 to vector<16x1xf32>
    %696 = arith.divf %694, %695 : vector<16x1xf32>
    %697 = vector.broadcast %696 : vector<16x1xf32> to vector<16x64xf32>
    %698 = arith.subf %688, %697 : vector<16x64xf32>
    %699 = arith.mulf %698, %698 : vector<16x64xf32>
    %cst_275 = arith.constant dense<0.000000e+00> : vector<16xf32>
    %700 = vector.multi_reduction <add>, %699, %cst_275 [1] : vector<16x64xf32> to vector<16xf32>
    %701 = vector.shape_cast %700 : vector<16xf32> to vector<16x1xf32>
    %cst_276 = arith.constant 6.400000e+01 : f32
    %702 = vector.broadcast %cst_276 : f32 to vector<16x1xf32>
    %703 = arith.divf %701, %702 : vector<16x1xf32>
    %cst_277 = arith.constant 9.99999974E-6 : f32
    %704 = vector.broadcast %cst_277 : f32 to vector<16x1xf32>
    %705 = arith.addf %703, %704 : vector<16x1xf32>
    %706 = math.rsqrt %705 : vector<16x1xf32>
    %707 = vector.broadcast %706 : vector<16x1xf32> to vector<16x64xf32>
    %708 = arith.mulf %698, %707 : vector<16x64xf32>
    %709 = vector.broadcast %690 : vector<1x64xf32> to vector<16x64xf32>
    %710 = arith.mulf %708, %709 : vector<16x64xf32>
    %711 = vector.broadcast %692 : vector<1x64xf32> to vector<16x64xf32>
    %712 = arith.addf %710, %711 : vector<16x64xf32>
    %c0_278 = arith.constant 0 : index
    %c0_279 = arith.constant 0 : index
    %713 = vector.load %arg19[%c0_278, %c0_279] : memref<64x32xf32, #tpu.memory_space<vmem>>, vector<64x32xf32>
    %cst_280 = arith.constant dense<0.000000e+00> : vector<16x32xf32>
    %714 = tpu.matmul %712, %713, %cst_280 {dimension_numbers = #tpu.dot_dimension_numbers<[1], [0], [0], [1], [0, 0, 1, 1], [], []>} : vector<16x64xf32>, vector<64x32xf32>, vector<16x32xf32> -> vector<16x32xf32>
    %c0_281 = arith.constant 0 : index
    %c0_282 = arith.constant 0 : index
    %715 = vector.load %arg20[%c0_281, %c0_282] : memref<1x32xf32, #tpu.memory_space<vmem>>, vector<1x32xf32>
    %716 = vector.broadcast %715 : vector<1x32xf32> to vector<16x32xf32>
    %717 = arith.addf %714, %716 : vector<16x32xf32>
    %c0_283 = arith.constant 0 : index
    %c0_284 = arith.constant 0 : index
    %718 = vector.load %arg21[%c0_283, %c0_284] : memref<1x32xf32, #tpu.memory_space<vmem>>, vector<1x32xf32>
    %c0_285 = arith.constant 0 : index
    %c0_286 = arith.constant 0 : index
    %719 = vector.load %arg22[%c0_285, %c0_286] : memref<1x32xf32, #tpu.memory_space<vmem>>, vector<1x32xf32>
    %cst_287 = arith.constant dense<0.000000e+00> : vector<16xf32>
    %720 = vector.multi_reduction <add>, %717, %cst_287 [1] : vector<16x32xf32> to vector<16xf32>
    %721 = vector.shape_cast %720 : vector<16xf32> to vector<16x1xf32>
    %cst_288 = arith.constant 3.200000e+01 : f32
    %722 = vector.broadcast %cst_288 : f32 to vector<16x1xf32>
    %723 = arith.divf %721, %722 : vector<16x1xf32>
    %724 = vector.broadcast %723 : vector<16x1xf32> to vector<16x32xf32>
    %725 = arith.subf %717, %724 : vector<16x32xf32>
    %726 = arith.mulf %725, %725 : vector<16x32xf32>
    %cst_289 = arith.constant dense<0.000000e+00> : vector<16xf32>
    %727 = vector.multi_reduction <add>, %726, %cst_289 [1] : vector<16x32xf32> to vector<16xf32>
    %728 = vector.shape_cast %727 : vector<16xf32> to vector<16x1xf32>
    %cst_290 = arith.constant 3.200000e+01 : f32
    %729 = vector.broadcast %cst_290 : f32 to vector<16x1xf32>
    %730 = arith.divf %728, %729 : vector<16x1xf32>
    %cst_291 = arith.constant 9.99999974E-6 : f32
    %731 = vector.broadcast %cst_291 : f32 to vector<16x1xf32>
    %732 = arith.addf %730, %731 : vector<16x1xf32>
    %733 = math.rsqrt %732 : vector<16x1xf32>
    %734 = vector.broadcast %733 : vector<16x1xf32> to vector<16x32xf32>
    %735 = arith.mulf %725, %734 : vector<16x32xf32>
    %736 = vector.broadcast %718 : vector<1x32xf32> to vector<16x32xf32>
    %737 = arith.mulf %735, %736 : vector<16x32xf32>
    %738 = vector.broadcast %719 : vector<1x32xf32> to vector<16x32xf32>
    %739 = arith.addf %737, %738 : vector<16x32xf32>
    %740 = vector.shape_cast %739 : vector<16x32xf32> to vector<2x8x32xf32>
    %c0_292 = arith.constant 0 : index
    %c0_293 = arith.constant 0 : index
    %c0_294 = arith.constant 0 : index
    %741 = vector.load %arg23[%c0_292, %c0_293, %c0_294] : memref<2x8x32xf32, #tpu.memory_space<vmem>>, vector<2x8x32xf32>
    tpu.vector_store %arg23[%c0_292, %c0_293, %c0_294], %740 {strides = array<i32>} : memref<2x8x32xf32, #tpu.memory_space<vmem>>, vector<2x8x32xf32>,
    return
  }
  func.func @transform_0(%arg0: i32) -> (i32, i32, i32) {
    %c0_i32 = arith.constant 0 : i32
    %c0_i32_0 = arith.constant 0 : i32
    %c0_i32_1 = arith.constant 0 : i32
    return %arg0, %c0_i32, %c0_i32_0 : i32, i32, i32
  }
  func.func @transform_1(%arg0: i32) -> (i32, i32) {
    %c0_i32 = arith.constant 0 : i32
    %c0_i32_0 = arith.constant 0 : i32
    %c0_i32_1 = arith.constant 0 : i32
    return %c0_i32, %c0_i32_0 : i32, i32
  }
  func.func @transform_2(%arg0: i32) -> (i32, i32) {
    %c0_i32 = arith.constant 0 : i32
    %c0_i32_0 = arith.constant 0 : i32
    %c0_i32_1 = arith.constant 0 : i32
    return %c0_i32, %c0_i32_0 : i32, i32
  }
  func.func @transform_3(%arg0: i32) -> (i32, i32) {
    %c0_i32 = arith.constant 0 : i32
    %c0_i32_0 = arith.constant 0 : i32
    %c0_i32_1 = arith.constant 0 : i32
    return %c0_i32, %c0_i32_0 : i32, i32
  }
  func.func @transform_4(%arg0: i32) -> (i32, i32) {
    %c0_i32 = arith.constant 0 : i32
    %c0_i32_0 = arith.constant 0 : i32
    %c0_i32_1 = arith.constant 0 : i32
    return %c0_i32, %c0_i32_0 : i32, i32
  }
  func.func @transform_5(%arg0: i32) -> (i32, i32) {
    %c0_i32 = arith.constant 0 : i32
    %c0_i32_0 = arith.constant 0 : i32
    %c0_i32_1 = arith.constant 0 : i32
    return %c0_i32, %c0_i32_0 : i32, i32
  }
  func.func @transform_6(%arg0: i32) -> (i32, i32, i32) {
    %c0_i32 = arith.constant 0 : i32
    %c0_i32_0 = arith.constant 0 : i32
    %c0_i32_1 = arith.constant 0 : i32
    %c0_i32_2 = arith.constant 0 : i32
    return %c0_i32, %c0_i32_0, %c0_i32_1 : i32, i32, i32
  }
  func.func @transform_7(%arg0: i32) -> (i32, i32, i32) {
    %c0_i32 = arith.constant 0 : i32
    %c0_i32_0 = arith.constant 0 : i32
    %c0_i32_1 = arith.constant 0 : i32
    %c0_i32_2 = arith.constant 0 : i32
    return %c0_i32, %c0_i32_0, %c0_i32_1 : i32, i32, i32
  }
  func.func @transform_8(%arg0: i32) -> (i32, i32, i32) {
    %c0_i32 = arith.constant 0 : i32
    %c0_i32_0 = arith.constant 0 : i32
    %c0_i32_1 = arith.constant 0 : i32
    %c0_i32_2 = arith.constant 0 : i32
    return %c0_i32, %c0_i32_0, %c0_i32_1 : i32, i32, i32
  }
  func.func @transform_9(%arg0: i32) -> (i32, i32, i32) {
    %c0_i32 = arith.constant 0 : i32
    %c0_i32_0 = arith.constant 0 : i32
    %c0_i32_1 = arith.constant 0 : i32
    %c0_i32_2 = arith.constant 0 : i32
    return %c0_i32, %c0_i32_0, %c0_i32_1 : i32, i32, i32
  }
  func.func @transform_10(%arg0: i32) -> (i32, i32, i32) {
    %c0_i32 = arith.constant 0 : i32
    %c0_i32_0 = arith.constant 0 : i32
    %c0_i32_1 = arith.constant 0 : i32
    %c0_i32_2 = arith.constant 0 : i32
    return %c0_i32, %c0_i32_0, %c0_i32_1 : i32, i32, i32
  }
  func.func @transform_11(%arg0: i32) -> (i32, i32, i32) {
    %c0_i32 = arith.constant 0 : i32
    %c0_i32_0 = arith.constant 0 : i32
    %c0_i32_1 = arith.constant 0 : i32
    %c0_i32_2 = arith.constant 0 : i32
    return %c0_i32, %c0_i32_0, %c0_i32_1 : i32, i32, i32
  }
  func.func @transform_12(%arg0: i32) -> (i32, i32, i32) {
    %c0_i32 = arith.constant 0 : i32
    %c0_i32_0 = arith.constant 0 : i32
    %c0_i32_1 = arith.constant 0 : i32
    %c0_i32_2 = arith.constant 0 : i32
    return %c0_i32, %c0_i32_0, %c0_i32_1 : i32, i32, i32
  }
  func.func @transform_13(%arg0: i32) -> (i32, i32, i32) {
    %c0_i32 = arith.constant 0 : i32
    %c0_i32_0 = arith.constant 0 : i32
    %c0_i32_1 = arith.constant 0 : i32
    %c0_i32_2 = arith.constant 0 : i32
    return %c0_i32, %c0_i32_0, %c0_i32_1 : i32, i32, i32
  }
  func.func @transform_14(%arg0: i32) -> (i32, i32, i32) {
    %c0_i32 = arith.constant 0 : i32
    %c0_i32_0 = arith.constant 0 : i32
    %c0_i32_1 = arith.constant 0 : i32
    %c0_i32_2 = arith.constant 0 : i32
    return %c0_i32, %c0_i32_0, %c0_i32_1 : i32, i32, i32
  }
  func.func @transform_15(%arg0: i32) -> (i32, i32, i32) {
    %c0_i32 = arith.constant 0 : i32
    %c0_i32_0 = arith.constant 0 : i32
    %c0_i32_1 = arith.constant 0 : i32
    %c0_i32_2 = arith.constant 0 : i32
    return %c0_i32, %c0_i32_0, %c0_i32_1 : i32, i32, i32
  }
  func.func @transform_16(%arg0: i32) -> (i32, i32, i32) {
    %c0_i32 = arith.constant 0 : i32
    %c0_i32_0 = arith.constant 0 : i32
    %c0_i32_1 = arith.constant 0 : i32
    %c0_i32_2 = arith.constant 0 : i32
    return %c0_i32, %c0_i32_0, %c0_i32_1 : i32, i32, i32
  }
  func.func @transform_17(%arg0: i32) -> (i32, i32, i32) {
    %c0_i32 = arith.constant 0 : i32
    %c0_i32_0 = arith.constant 0 : i32
    %c0_i32_1 = arith.constant 0 : i32
    %c0_i32_2 = arith.constant 0 : i32
    return %c0_i32, %c0_i32_0, %c0_i32_1 : i32, i32, i32
  }
  func.func @transform_18(%arg0: i32) -> (i32, i32) {
    %c0_i32 = arith.constant 0 : i32
    %c0_i32_0 = arith.constant 0 : i32
    %c0_i32_1 = arith.constant 0 : i32
    return %c0_i32, %c0_i32_0 : i32, i32
  }
  func.func @transform_19(%arg0: i32) -> (i32, i32) {
    %c0_i32 = arith.constant 0 : i32
    %c0_i32_0 = arith.constant 0 : i32
    %c0_i32_1 = arith.constant 0 : i32
    return %c0_i32, %c0_i32_0 : i32, i32
  }
  func.func @transform_20(%arg0: i32) -> (i32, i32) {
    %c0_i32 = arith.constant 0 : i32
    %c0_i32_0 = arith.constant 0 : i32
    %c0_i32_1 = arith.constant 0 : i32
    return %c0_i32, %c0_i32_0 : i32, i32
  }
  func.func @transform_21(%arg0: i32) -> (i32, i32) {
    %c0_i32 = arith.constant 0 : i32
    %c0_i32_0 = arith.constant 0 : i32
    %c0_i32_1 = arith.constant 0 : i32
    return %c0_i32, %c0_i32_0 : i32, i32
  }
  func.func @transform_22(%arg0: i32) -> (i32, i32, i32) {
    %c0_i32 = arith.constant 0 : i32
    %c0_i32_0 = arith.constant 0 : i32
    %c0_i32_1 = arith.constant 0 : i32
    return %arg0, %c0_i32, %c0_i32_0 : i32, i32, i32
  }
}

</mosaic_0001>

<bundles_post_ra>
// kernel: ginka_transformer_encoder.1
= control target key start
LH: loop header
LB: loop body
LE: loop exit
PB: predicated region body
PF: predicated region fallthrough
CT: control target
= control target key end

     0   :  { %s10300_s0 = inlined_call_operand.hbm [shape: f32[2,8,32], index: 0, kind: input, shape index: {}]   ;;  %s10301_s1 = inlined_call_operand.hbm [shape: f32[8,64], index: 1, kind: input, shape index: {}]   ;;  %s10302_s2 = inlined_call_operand.vmem [shape: f32[32,64], index: 2, kind: input, shape index: {}]   ;;  %s10303_s3 = inlined_call_operand.vmem [shape: f32[1,64], index: 3, kind: input, shape index: {}]   ;;  %s10304_s4 = inlined_call_operand.hbm [shape: f32[1,64], index: 4, kind: input, shape index: {}]   ;;  %s10305_s5 = inlined_call_operand.hbm [shape: f32[1,64], index: 5, kind: input, shape index: {}]   ;;  %s10306_s6 = inlined_call_operand.vmem [shape: f32[2,64,192], index: 6, kind: input, shape index: {}]   ;;  %s10307_s7 = inlined_call_operand.vmem [shape: f32[2,1,192], index: 7, kind: input, shape index: {}]   ;;  %s10308_s8 = inlined_call_operand.vmem [shape: f32[2,64,64], index: 8, kind: input, shape index: {}]   ;;  %s10309_s9 = inlined_call_operand.vmem [shape: f32[2,1,64], index: 9, kind: input, shape index: {}]   ;;  %s10310_s10 = inlined_call_operand.hbm [shape: f32[2,1,64], index: 10, kind: input, shape index: {}]   ;;  %s10311_s11 = inlined_call_operand.hbm [shape: f32[2,1,64], index: 11, kind: input, shape index: {}]   ;;  %s10312_s12 = inlined_call_operand.hbm [shape: f32[2,64,128], index: 12, kind: input, shape index: {}]   ;;  %s10313_s13 = inlined_call_operand.hbm [shape: f32[2,1,128], index: 13, kind: input, shape index: {}]   ;;  %s10314_s14 = inlined_call_operand.vmem [shape: f32[2,128,64], index: 14, kind: input, shape index: {}]   ;;  %s10315_s15 = inlined_call_operand.hbm [shape: f32[2,1,64], index: 15, kind: input, shape index: {}]   ;;  %s10316_s16 = inlined_call_operand.hbm [shape: f32[2,1,64], index: 16, kind: input, shape index: {}]   ;;  %s10317_s17 = inlined_call_operand.hbm [shape: f32[2,1,64], index: 17, kind: input, shape index: {}]   ;;  %s10318_s18 = inlined_call_operand.vmem [shape: f32[64,32], index: 18, kind: input, shape index: {}]   ;;  %s10319_s19 = inlined_call_operand.hbm [shape: f32[1,32], index: 19, kind: input, shape index: {}]   ;;  %s10320_s20 = inlined_call_operand.hbm [shape: f32[1,32], index: 20, kind: input, shape index: {}]   ;;  %s10321_s21 = inlined_call_operand.hbm [shape: f32[1,32], index: 21, kind: input, shape index: {}]   ;;  %s10322_s22 = inlined_call_operand.hbm [shape: f32[2,8,32], index: 22, kind: output, shape index: {}]  }
   0x1   :  { %10334 = sst [smem:[#allocation35_spill]] %s10300_s0 }
   0x2   :  { %10335 = sst [smem:[#allocation36_spill]] %s10301_s1 }
   0x3   :  { %10336 = sst [smem:[#allocation37_spill]] %s10302_s2 }
   0x4   :  { %10337 = sst [smem:[#allocation38_spill]] %s10303_s3 }
   0x5   :  { %10338 = sst [smem:[#allocation39_spill]] %s10304_s4 }
   0x6   :  { %10339 = sst [smem:[#allocation40_spill]] %s10305_s5 }
   0x7   :  { %10340 = sst [smem:[#allocation41_spill]] %s10306_s6 }
   0x8   :  { %27 = vsyncpa [#allocation3], 0 }
   0x9   :  { %28 = vsyncpa [#allocation6], 0 }
   0xa   :  { %29 = vsyncpa [#allocation9], 0 }
   0xb   :  { %30 = vsyncpa [#allocation12], 0 }
   0xc   :  { %31 = vsyncpa [#allocation15], 0 }
   0xd   :  { %32 = vsyncpa [#allocation18], 0 }
   0xe   :  { %33 = vsyncpa [#allocation21], 0 }
   0xf   :  { %34 = vsyncpa [#allocation24], 0 }
  0x10   :  { %35 = vsyncpa [#allocation4], 0  ;;  %s8617_s3 = smov [#allocation5]   ;;  %s8618_s29 = smov [#allocation8]  }
  0x11   :  { %s54_s28 = sshll.u32 %s8617_s3, 4  ;;  %s78_s30 = sshll.u32 %s8618_s29, 4  ;;  %s55_s28 = int_to_ptr.vmem [resolvable:$true] %s54_s28  ;;  %s79_s30 = int_to_ptr.vmem [resolvable:$true] %s78_s30 }
  0x12   :  { %s10341_s23 = sld [smem:[#allocation36_spill]] }
  0x18   :  { %s8269_s1 = scalar_lea.hbm %s10341_s23, 128 }
  0x19   :  { %p8270_p0 = scmp.ne.s32.totalorder %s10341_s23, %s8269_s1  ;;  %p8273_p1 = scmp.lt.u32.totalorder %s8269_s1, %s10341_s23 }
  0x1b   :  { %p8275_p2 = pnand %p8273_p1, %p8270_p0 }
  0x1d   :  { %8278 = shalt.err (!%p8275_p2)
}
  0x1e   :  { %s8279_s26 = scalar_lea.vmem %s55_s28, 128  ;;  %p8284_p4 = scmp.lt.s32.totalorder %s55_s28, %s55_s28 }
  0x1f   :  { %p8280_p3 = scmp.ne.s32.totalorder %s55_s28, %s8279_s26  ;;  %p8285_p5 = scmp.lt.s32.totalorder %s8279_s26, %s8279_s26 }
  0x21   :  { %p8286_p6 = por %p8285_p5, %p8284_p4 }
  0x23   :  { %p8287_p7 = pnand %p8286_p6, %p8280_p3 }
  0x25   :  { %8290 = shalt.err (!%p8287_p7)
}
  0x26   :  { %57 = dma.hbm_to_vmem [thread:$0]  %s10341_s23, 128, %s55_s28, [#allocation6]  }
  0x27   :  { %s10342_s4 = sld [smem:[#allocation40_spill]] }
  0x2d   :  { %s8291_s0 = scalar_lea.hbm %s10342_s4, 16 }
  0x2e   :  { %p8292_p8 = scmp.ne.s32.totalorder %s10342_s4, %s8291_s0  ;;  %p8295_p9 = scmp.lt.u32.totalorder %s8291_s0, %s10342_s4 }
  0x30   :  { %p8297_p10 = pnand %p8295_p9, %p8292_p8 }
  0x32   :  { %8300 = shalt.err (!%p8297_p10)
}
  0x33   :  { %s8301_s25 = scalar_lea.vmem %s79_s30, 16  ;;  %s8305_s26 = scalar_lea.vmem %s79_s30, 32 }
  0x34   :  { %p8302_p11 = scmp.ne.s32.totalorder %s79_s30, %s8301_s25  ;;  %p8306_p12 = scmp.lt.s32.totalorder %s79_s30, %s79_s30 }
  0x35   :  { %p8307_p13 = scmp.lt.s32.totalorder %s8305_s26, %s8301_s25 }
  0x37   :  { %p8308_p0 = por %p8307_p13, %p8306_p12 }
  0x39   :  { %p8309_p1 = pnand %p8308_p0, %p8302_p11 }
  0x3b   :  { %8312 = shalt.err (!%p8309_p1)
}
  0x3c   :  { %81 = dma.hbm_to_vmem [thread:$0]  %s10342_s4, 16, %s79_s30, [#allocation9]  }
  0x3d   :  { %s8619_s2 = smov [#allocation11]   ;;  %s8620_s3 = smov [#allocation14]  }
  0x3e   :  { %s107_s27 = sshll.u32 %s8619_s2, 4  ;;  %s131_s29 = sshll.u32 %s8620_s3, 4  ;;  %s108_s27 = int_to_ptr.vmem [resolvable:$true] %s107_s27  ;;  %s8790_s29 = int_to_ptr.vmem [resolvable:$true] %s131_s29 }
  0x3f   :  { %s8313_s24 = scalar_lea.hbm %s10311_s11, 32 }
  0x40   :  { %p8314_p2 = scmp.ne.s32.totalorder %s10311_s11, %s8313_s24  ;;  %p8317_p3 = scmp.lt.u32.totalorder %s8313_s24, %s10311_s11 }
  0x42   :  { %p8319_p4 = pnand %p8317_p3, %p8314_p2 }
  0x44   :  { %8322 = shalt.err (!%p8319_p4)
}
  0x45   :  { %s8323_s30 = scalar_lea.vmem %s108_s27, 32  ;;  %p8328_p6 = scmp.lt.s32.totalorder %s108_s27, %s108_s27 }
  0x46   :  { %p8324_p5 = scmp.ne.s32.totalorder %s108_s27, %s8323_s30  ;;  %p8329_p7 = scmp.lt.s32.totalorder %s8323_s30, %s8323_s30 }
  0x48   :  { %p8330_p8 = por %p8329_p7, %p8328_p6 }
  0x4a   :  { %p8331_p9 = pnand %p8330_p8, %p8324_p5 }
  0x4c   :  { %8334 = shalt.err (!%p8331_p9)
}
  0x4d   :  { %s10329_s4 = smov 16   ;;  %s8622_s28 = smov 1  }
  0x4e   :  { %113 = dma.hbm_to_vmem [thread:$0]  %s10311_s11, 32, %s108_s27, [#allocation12], %s10329_s4, %s10329_s4, %s8622_s28  }
  0x4f   :  { %s8335_s5 = scalar_lea.hbm %s10313_s13, 32 }
  0x50   :  { %p8336_p10 = scmp.ne.s32.totalorder %s10313_s13, %s8335_s5  ;;  %p8339_p11 = scmp.lt.u32.totalorder %s8335_s5, %s10313_s13 }
  0x52   :  { %p8341_p12 = pnand %p8339_p11, %p8336_p10 }
  0x54   :  { %8344 = shalt.err (!%p8341_p12)
}
  0x55   :  { %s8345_s26 = scalar_lea.vmem %s8790_s29, 32  ;;  %p8350_p0 = scmp.lt.s32.totalorder %s8790_s29, %s8790_s29 }
  0x56   :  { %p8346_p13 = scmp.ne.s32.totalorder %s8790_s29, %s8345_s26  ;;  %p8351_p1 = scmp.lt.s32.totalorder %s8345_s26, %s8345_s26 }
  0x58   :  { %p8352_p2 = por %p8351_p1, %p8350_p0 }
  0x5a   :  { %p8353_p3 = pnand %p8352_p2, %p8346_p13 }
  0x5c   :  { %8356 = shalt.err (!%p8353_p3)
}
  0x5d   :  { %137 = dma.hbm_to_vmem [thread:$0]  %s10313_s13, 32, %s8790_s29, [#allocation15], %s10329_s4, %s10329_s4, %s8622_s28  }
  0x5e   :  { %s8623_s30 = smov [#allocation17]   ;;  %s8624_s2 = smov [#allocation20]  }
  0x5f   :  { %s157_s23 = sshll.u32 %s8623_s30, 4  ;;  %s184_s3 = sshll.u32 %s8624_s2, 4  ;;  %s158_s23 = int_to_ptr.vmem [resolvable:$true] %s157_s23  ;;  %s185_s3 = int_to_ptr.vmem [resolvable:$true] %s184_s3 }
  0x60   :  { %s8357_s24 = scalar_lea.hbm %s10316_s16, 32 }
  0x61   :  { %p8358_p4 = scmp.ne.s32.totalorder %s10316_s16, %s8357_s24  ;;  %p8361_p5 = scmp.lt.u32.totalorder %s8357_s24, %s10316_s16 }
  0x63   :  { %p8363_p6 = pnand %p8361_p5, %p8358_p4 }
  0x65   :  { %8366 = shalt.err (!%p8363_p6)
}
  0x66   :  { %s8367_s13 = scalar_lea.vmem %s158_s23, 32  ;;  %p8372_p8 = scmp.lt.s32.totalorder %s158_s23, %s158_s23 }
  0x67   :  { %p8368_p7 = scmp.ne.s32.totalorder %s158_s23, %s8367_s13  ;;  %p8373_p9 = scmp.lt.s32.totalorder %s8367_s13, %s8367_s13 }
  0x69   :  { %p8374_p10 = por %p8373_p9, %p8372_p8 }
  0x6b   :  { %p8375_p11 = pnand %p8374_p10, %p8368_p7 }
  0x6d   :  { %8378 = shalt.err (!%p8375_p11)
}
  0x6e   :  { %163 = dma.hbm_to_vmem [thread:$0]  %s10316_s16, 32, %s158_s23, [#allocation18], %s10329_s4, %s10329_s4, %s8622_s28  }
  0x6f   :  { %s8379_s2 = scalar_lea.hbm %s10319_s19, 16 }
  0x70   :  { %p8380_p12 = scmp.ne.s32.totalorder %s10319_s19, %s8379_s2  ;;  %p8383_p13 = scmp.lt.u32.totalorder %s8379_s2, %s10319_s19 }
  0x72   :  { %p8385_p0 = pnand %p8383_p13, %p8380_p12 }
  0x74   :  { %8388 = shalt.err (!%p8385_p0)
}
  0x75   :  { %s8389_s6 = scalar_lea.vmem %s185_s3, 16  ;;  %s8393_s25 = scalar_lea.vmem %s185_s3, 32 }
  0x76   :  { %p8390_p1 = scmp.ne.s32.totalorder %s185_s3, %s8389_s6  ;;  %p8394_p2 = scmp.lt.s32.totalorder %s185_s3, %s185_s3 }
  0x77   :  { %p8395_p3 = scmp.lt.s32.totalorder %s8393_s25, %s8389_s6 }
  0x79   :  { %p8396_p4 = por %p8395_p3, %p8394_p2 }
  0x7b   :  { %p8397_p5 = pnand %p8396_p4, %p8390_p1 }
  0x7d   :  { %8400 = shalt.err (!%p8397_p5)
}
  0x7e   :  { %187 = dma.hbm_to_vmem [thread:$0]  %s10319_s19, 16, %s185_s3, [#allocation21]  }
  0x7f   :  { %s8625_s26 = smov [#allocation2]   ;;  %s10343_s27 = sld [smem:[#allocation35_spill]] }
  0x80   :  { %s41_s13 = sshll.u32 %s8625_s26, 4  ;;  %s42_s13 = int_to_ptr.vmem [resolvable:$true] %s41_s13 }
  0x85   :  { %s8401_s30 = scalar_lea.hbm %s10343_s27, 256 }
  0x86   :  { %p8402_p6 = scmp.ne.s32.totalorder %s10343_s27, %s8401_s30  ;;  %p8405_p7 = scmp.lt.u32.totalorder %s8401_s30, %s10343_s27 }
  0x88   :  { %p8407_p8 = pnand %p8405_p7, %p8402_p6 }
  0x8a   :  { %8410 = shalt.err (!%p8407_p8)
}
  0x8b   :  { %s8411_s1 = scalar_lea.vmem %s42_s13, 256  ;;  %p8416_p10 = scmp.lt.s32.totalorder %s42_s13, %s42_s13 }
  0x8c   :  { %p8412_p9 = scmp.ne.s32.totalorder %s42_s13, %s8411_s1  ;;  %p8417_p11 = scmp.lt.s32.totalorder %s8411_s1, %s8411_s1 }
  0x8e   :  { %p8418_p12 = por %p8417_p11, %p8416_p10 }
  0x90   :  { %p8419_p13 = pnand %p8418_p12, %p8412_p9 }
  0x92   :  { %8422 = shalt.err (!%p8419_p13)
}
  0x93   :  { %s10331_s19 = smov 128   ;;  %s10332_s3 = smov 8  }
  0x94   :  { %47 = dma.hbm_to_vmem [thread:$0]  %s10343_s27, 256, %s42_s13, [#allocation3], %s10331_s19, %s10331_s19, %s10332_s3  }
  0x95   :  { %s8628_s16 = smov [#allocation7]   ;;  %s8629_s26 = smov [#allocation10]  }
  0x96   :  { %s68_s23 = sshll.u32 %s8628_s16, 4  ;;  %s95_s29 = sshll.u32 %s8629_s26, 4  ;;  %s69_s23 = int_to_ptr.vmem [resolvable:$true] %s68_s23  ;;  %s96_s29 = int_to_ptr.vmem [resolvable:$true] %s95_s29 }
  0x97   :  { %s10344_s2 = sld [smem:[#allocation39_spill]] }
  0x9d   :  { %s8423_s0 = scalar_lea.hbm %s10344_s2, 16 }
  0x9e   :  { %p8424_p0 = scmp.ne.s32.totalorder %s10344_s2, %s8423_s0  ;;  %p8427_p1 = scmp.lt.u32.totalorder %s8423_s0, %s10344_s2 }
  0xa0   :  { %p8429_p2 = pnand %p8427_p1, %p8424_p0 }
  0xa2   :  { %8432 = shalt.err (!%p8429_p2)
}
  0xa3   :  { %s8433_s13 = scalar_lea.vmem %s69_s23, 16  ;;  %s8437_s27 = scalar_lea.vmem %s69_s23, 32 }
  0xa4   :  { %p8434_p3 = scmp.ne.s32.totalorder %s69_s23, %s8433_s13  ;;  %p8438_p4 = scmp.lt.s32.totalorder %s69_s23, %s69_s23 }
  0xa5   :  { %p8439_p5 = scmp.lt.s32.totalorder %s8437_s27, %s8433_s13 }
  0xa7   :  { %p8440_p6 = por %p8439_p5, %p8438_p4 }
  0xa9   :  { %p8441_p7 = pnand %p8440_p6, %p8434_p3 }
  0xab   :  { %8444 = shalt.err (!%p8441_p7)
}
  0xac   :  { %71 = dma.hbm_to_vmem [thread:$0]  %s10344_s2, 16, %s69_s23, [#allocation6]  }
  0xad   :  { %s8445_s4 = scalar_lea.hbm %s10310_s10, 32 }
  0xae   :  { %p8446_p8 = scmp.ne.s32.totalorder %s10310_s10, %s8445_s4  ;;  %p8449_p9 = scmp.lt.u32.totalorder %s8445_s4, %s10310_s10 }
  0xb0   :  { %p8451_p10 = pnand %p8449_p9, %p8446_p8 }
  0xb2   :  { %8454 = shalt.err (!%p8451_p10)
}
  0xb3   :  { %s8455_s24 = scalar_lea.vmem %s96_s29, 32  ;;  %p8460_p12 = scmp.lt.s32.totalorder %s96_s29, %s96_s29 }
  0xb4   :  { %p8456_p11 = scmp.ne.s32.totalorder %s96_s29, %s8455_s24  ;;  %p8461_p13 = scmp.lt.s32.totalorder %s8455_s24, %s8455_s24 }
  0xb6   :  { %p8462_p0 = por %p8461_p13, %p8460_p12 }
  0xb8   :  { %p8463_p1 = pnand %p8462_p0, %p8456_p11 }
  0xba   :  { %8466 = shalt.err (!%p8463_p1)
}
  0xbb   :  { %s10345_s23 = smov 16   ;;  %s8630_s13 = smov [#allocation13]  }
  0xbc   :  { %101 = dma.hbm_to_vmem [thread:$0]  %s10310_s10, 32, %s96_s29, [#allocation9], %s10345_s23, %s10345_s23, %s8622_s28  }
  0xbd   :  { %s119_s27 = sshll.u32 %s8630_s13, 4  ;;  %s8631_s6 = smov [#allocation16]   ;;  %s120_s27 = int_to_ptr.vmem [resolvable:$true] %s119_s27 }
  0xbe   :  { %s145_s25 = sshll.u32 %s8631_s6, 4  ;;  %s8467_s4 = scalar_lea.hbm %s10312_s12, 2048  ;;  %s146_s25 = int_to_ptr.vmem [resolvable:$true] %s145_s25 }
  0xbf   :  { %p8468_p2 = scmp.ne.s32.totalorder %s10312_s12, %s8467_s4  ;;  %p8471_p3 = scmp.lt.u32.totalorder %s8467_s4, %s10312_s12 }
  0xc1   :  { %p8473_p4 = pnand %p8471_p3, %p8468_p2 }
  0xc3   :  { %8476 = shalt.err (!%p8473_p4)
}
  0xc4   :  { %s8477_s10 = scalar_lea.vmem %s120_s27, 2048  ;;  %p8482_p6 = scmp.lt.s32.totalorder %s120_s27, %s120_s27 }
  0xc5   :  { %p8478_p5 = scmp.ne.s32.totalorder %s120_s27, %s8477_s10  ;;  %p8483_p7 = scmp.lt.s32.totalorder %s8477_s10, %s8477_s10 }
  0xc7   :  { %p8484_p8 = por %p8483_p7, %p8482_p6 }
  0xc9   :  { %p8485_p9 = pnand %p8484_p8, %p8478_p5 }
  0xcb   :  { %8488 = shalt.err (!%p8485_p9)
}
  0xcc   :  { %125 = dma.hbm_to_vmem [thread:$0]  %s10312_s12, 2048, %s120_s27, [#allocation12], %s10331_s19, %s10331_s19, %s10332_s3  }
  0xcd   :  { %s8489_s13 = scalar_lea.hbm %s10315_s15, 32 }
  0xce   :  { %p8490_p10 = scmp.ne.s32.totalorder %s10315_s15, %s8489_s13  ;;  %p8493_p11 = scmp.lt.u32.totalorder %s8489_s13, %s10315_s15 }
  0xd0   :  { %p8495_p12 = pnand %p8493_p11, %p8490_p10 }
  0xd2   :  { %8498 = shalt.err (!%p8495_p12)
}
  0xd3   :  { %s8499_s11 = scalar_lea.vmem %s146_s25, 32  ;;  %p8504_p0 = scmp.lt.s32.totalorder %s146_s25, %s146_s25 }
  0xd4   :  { %p8500_p13 = scmp.ne.s32.totalorder %s146_s25, %s8499_s11  ;;  %p8505_p1 = scmp.lt.s32.totalorder %s8499_s11, %s8499_s11 }
  0xd6   :  { %p8506_p2 = por %p8505_p1, %p8504_p0 }
  0xd8   :  { %p8507_p3 = pnand %p8506_p2, %p8500_p13 }
  0xda   :  { %8510 = shalt.err (!%p8507_p3)
}
  0xdb   :  { %151 = dma.hbm_to_vmem [thread:$0]  %s10315_s15, 32, %s146_s25, [#allocation15], %s10345_s23, %s10345_s23, %s8622_s28  }
  0xdc   :  { %s8632_s30 = smov [#allocation19]   ;;  %s8633_s5 = smov [#allocation22]  }
  0xdd   :  { %s169_s0 = sshll.u32 %s8632_s30, 4  ;;  %s194_s10 = sshll.u32 %s8633_s5, 4  ;;  %s170_s0 = int_to_ptr.vmem [resolvable:$true] %s169_s0  ;;  %s195_s10 = int_to_ptr.vmem [resolvable:$true] %s194_s10 }
  0xde   :  { %s8511_s2 = scalar_lea.hbm %s10317_s17, 32 }
  0xdf   :  { %p8512_p4 = scmp.ne.s32.totalorder %s10317_s17, %s8511_s2  ;;  %p8515_p5 = scmp.lt.u32.totalorder %s8511_s2, %s10317_s17 }
  0xe1   :  { %p8517_p6 = pnand %p8515_p5, %p8512_p4 }
  0xe3   :  { %8520 = shalt.err (!%p8517_p6)
}
  0xe4   :  { %s8521_s15 = scalar_lea.vmem %s170_s0, 32  ;;  %p8526_p8 = scmp.lt.s32.totalorder %s170_s0, %s170_s0 }
  0xe5   :  { %p8522_p7 = scmp.ne.s32.totalorder %s170_s0, %s8521_s15  ;;  %p8527_p9 = scmp.lt.s32.totalorder %s8521_s15, %s8521_s15 }
  0xe7   :  { %p8528_p10 = por %p8527_p9, %p8526_p8 }
  0xe9   :  { %p8529_p11 = pnand %p8528_p10, %p8522_p7 }
  0xeb   :  { %8532 = shalt.err (!%p8529_p11)
}
  0xec   :  { %175 = dma.hbm_to_vmem [thread:$0]  %s10317_s17, 32, %s170_s0, [#allocation18], %s10345_s23, %s10345_s23, %s8622_s28  }
  0xed   :  { %s8533_s12 = scalar_lea.hbm %s10320_s20, 16 }
  0xee   :  { %p8534_p12 = scmp.ne.s32.totalorder %s10320_s20, %s8533_s12  ;;  %p8537_p13 = scmp.lt.u32.totalorder %s8533_s12, %s10320_s20 }
  0xf0   :  { %p8539_p0 = pnand %p8537_p13, %p8534_p12 }
  0xf2   :  { %8542 = shalt.err (!%p8539_p0)
}
  0xf3   :  { %s8543_s24 = scalar_lea.vmem %s195_s10, 16  ;;  %s8547_s2 = scalar_lea.vmem %s195_s10, 32 }
  0xf4   :  { %p8544_p1 = scmp.ne.s32.totalorder %s195_s10, %s8543_s24  ;;  %p8548_p2 = scmp.lt.s32.totalorder %s195_s10, %s195_s10 }
  0xf5   :  { %p8549_p3 = scmp.lt.s32.totalorder %s8547_s2, %s8543_s24 }
  0xf7   :  { %p8550_p4 = por %p8549_p3, %p8548_p2 }
  0xf9   :  { %p8551_p5 = pnand %p8550_p4, %p8544_p1 }
  0xfb   :  { %8554 = shalt.err (!%p8551_p5)
}
  0xfc   :  { %197 = dma.hbm_to_vmem [thread:$0]  %s10320_s20, 16, %s195_s10, [#allocation21]  }
  0xfd   :  { %s8634_s0 = smov [#allocation23]   ;;  %s8555_s16 = scalar_lea.hbm %s10321_s21, 16 }
  0xfe   :  { %s204_s1 = sshll.u32 %s8634_s0, 4  ;;  %p8556_p6 = scmp.ne.s32.totalorder %s10321_s21, %s8555_s16  ;;  %s205_s1 = int_to_ptr.vmem [resolvable:$true] %s204_s1 }
  0xff   :  { %p8559_p7 = scmp.lt.u32.totalorder %s8555_s16, %s10321_s21 }
 0x101   :  { %p8561_p8 = pnand %p8559_p7, %p8556_p6 }
 0x103   :  { %8564 = shalt.err (!%p8561_p8)
}
 0x104   :  { %s8565_s11 = scalar_lea.vmem %s205_s1, 16  ;;  %s8569_s20 = scalar_lea.vmem %s205_s1, 32 }
 0x105   :  { %p8566_p9 = scmp.ne.s32.totalorder %s205_s1, %s8565_s11  ;;  %p8570_p10 = scmp.lt.s32.totalorder %s205_s1, %s205_s1 }
 0x106   :  { %p8571_p11 = scmp.lt.s32.totalorder %s8569_s20, %s8565_s11 }
 0x108   :  { %p8572_p12 = por %p8571_p11, %p8570_p10 }
 0x10a   :  { %p8573_p13 = pnand %p8572_p12, %p8566_p9 }
 0x10c   :  { %8576 = shalt.err (!%p8573_p13)
}
 0x10d   :  { %207 = dma.hbm_to_vmem [thread:$0]  %s10321_s21, 16, %s205_s1, [#allocation24]  }
 0x10e   :  { %8599 = dma.done.wait [#allocation3], 256  }
 0x10f   :  { %8600 = vsyncadd [#allocation3], 4294967040 }
 0x110   :  { %8601 = dma.done.wait [#allocation6], 144  }
 0x111   :  { %8602 = vsyncadd [#allocation6], 4294967152 }
 0x112   :  { %8603 = dma.done.wait [#allocation9], 48  }
 0x113   :  { %8604 = vsyncadd [#allocation9], 4294967248 }
 0x114   :  { %8605 = dma.done.wait [#allocation12], 2080  }
 0x115   :  { %8606 = vsyncadd [#allocation12], 4294965216 }
 0x116   :  { %8607 = dma.done.wait [#allocation15], 64  }
 0x117   :  { %8608 = vsyncadd [#allocation15], 4294967232 }
 0x118   :  { %8609 = dma.done.wait [#allocation18], 64  }
 0x119   :  { %8610 = vsyncadd [#allocation18], 4294967232 }
 0x11a   :  { %8611 = dma.done.wait [#allocation21], 32  }
 0x11b   :  { %8612 = vsyncadd [#allocation21], 4294967264 }
 0x11c   :  { %8613 = dma.done.wait [#allocation24], 16  }
 0x11d   :  { %8614 = vsyncadd [#allocation24], 4294967280  ;;  %vm263_vm0 = vcmask 261120   ;;  %s10346_s21 = sld [smem:[#allocation37_spill]]  ;;  %v250_v5 = vld [vmem:[#allocation2] sm:$0xff]  ;;  %v251_v7 = vld [vmem:[#allocation2 + $0x8] sm:$0xff]  ;;  %v412_v55 = vlaneseq }
 0x11e   :  { %7411 = vmatprep.mubr.msk.f32.mxu1 %vm263_vm0, %v250_v5  ;;  %s10347_s13 = sld [smem:[#allocation38_spill]]  ;;  %vm347_vm1 = vcmask 523264   ;;  %s10348_s15 = sld [smem:[#allocation41_spill]]  ;;  %v8635_v43 = vmov 0.0   ;;  %v7012_v48 = vld [vmem:[#allocation7] ss:$0 sm:$0xff] }
 0x11f   :  { %7414 = vmatprep.subr.mxu0 %v8635_v43  ;;  %v7013_v50 = vld [vmem:[#allocation8] ss:$0 sm:$0xff]  ;;  %v391_v52 = vld [vmem:[#allocation5] sm:$0xff]  ;;  %v9042_v56 = vshrl.u32 %v412_v55, 7  ;;  %vm8636_vm2 = vmmov 0   ;;  %s8637_s29 = smov 64  }
 0x120   :  { %7416 = vmatprep.mubr.msk.f32.mxu0 %vm8636_vm2, %v8635_v43  ;;  %v410_v58 = vld [vmem:[%s10307_s7] sm:$0x3]  ;;  %s8638_s24 = smov 120   ;;  %s8639_s2 = smov 32   ;;  %vm508_vm3 = vcmask 64512   ;;  %vm1860_vm4 = vcmask 130048  }
 0x121   :  { %v414_v57 = vsub.s32 0, %v9042_v56  ;;  %s8640_s17 = smov 24   ;;  %s8641_s28 = smov 56   ;;  %vm1862_vm5 = vcmask 195584   ;;  %vm1865_vm6 = vcmask 326656   ;;  %vm1867_vm7 = vcmask 392192  }
 0x122   :  { %s8642_s0 = smov 48   ;;  %s8643_s1 = smov 112   ;;  %vm1869_vm8 = vcmask 457728  }
 0x123   :  { %v252_v0 = vld [vmem:[%s10346_s21] sm:$0xff]  ;;  %v253_v1 = vld [vmem:[%s10346_s21 + $0x8] sm:$0xff]  ;;  %v254_v2 = vld [vmem:[%s10346_s21 + $0x10] sm:$0xff]  ;;  %v9052_v59 = vrot.slane %v410_v58, %v414_v57  ;;  %s8645_s6 = smov 104   ;;  %s8646_s16 = smov 96  }
 0x124   :  { %v7899_v3 = vpack.c.bf16 %v253_v1, %v252_v0  ;;  %v255_v4 = vld [vmem:[%s10346_s21 + $0x18] sm:$0xff]  ;;  %v7009_v8 = vld [vmem:[%s10347_s13] ss:$0 sm:$0xff]  ;;  %v395_v19 = vld [vmem:[%s10348_s15 + $0x8] sm:$0xff]  ;;  %v418_v0 = vsub.s32 1, %v9042_v56  ;;  %s8644_s13 = smov 40  }
 0x125   :  { %v7903_v6 = vpack.c.bf16 %v255_v4, %v254_v2  ;;  %v397_v20 = vld [vmem:[%s10348_s15 + $0x18] sm:$0xff]  ;;  %v394_v22 = vld [vmem:[%s10348_s15] sm:$0xff]  ;;  %v396_v23 = vld [vmem:[%s10348_s15 + $0x10] sm:$0xff]  ;;  %s8647_s25 = smov 88   ;;  %s8648_s26 = smov 80  }
 0x126   :  { %7900 = vmatprep.subr.bf16.mxu1 %v7899_v3  ;;  %v7907_v21 = vpack.c.bf16 %v397_v20, %v395_v19  ;;  %v7909_v24 = vpack.c.bf16 %v396_v23, %v394_v22  ;;  %v399_v25 = vld [vmem:[%s10348_s15 + $0x28] sm:$0xff]  ;;  %v401_v26 = vld [vmem:[%s10348_s15 + $0x38] sm:$0xff]  ;;  %v398_v28 = vld [vmem:[%s10348_s15 + $0x20] sm:$0xff]  ;;  %v9074_v1 = vrot.slane %v410_v58, %v418_v0  ;;  %s8649_s4 = smov 72  }
 0x127   :  { %7902 = vmatpush3.bf16.msra.mxu1 %v7899_v3  ;;  %v7911_v27 = vpack.c.bf16 %v401_v26, %v399_v25  ;;  %v400_v29 = vld [vmem:[%s10348_s15 + $0x30] sm:$0xff]  ;;  %v403_v31 = vld [vmem:[%s10348_s15 + $0x48] sm:$0xff]  ;;  %v405_v32 = vld [vmem:[%s10348_s15 + $0x58] sm:$0xff] }
 0x128   :  { %7904 = vmatprep.subr.bf16.mxu1 %v7903_v6  ;;  %v7913_v30 = vpack.c.bf16 %v400_v29, %v398_v28  ;;  %v7915_v33 = vpack.c.bf16 %v405_v32, %v403_v31  ;;  %v402_v34 = vld [vmem:[%s10348_s15 + $0x40] sm:$0xff]  ;;  %v404_v35 = vld [vmem:[%s10348_s15 + $0x50] sm:$0xff]  ;;  %v407_v37 = vld [vmem:[%s10348_s15 + $0x68] sm:$0xff] }
 0x129   :  { %v7917_v36 = vpack.c.bf16 %v404_v35, %v402_v34  ;;  %v409_v38 = vld [vmem:[%s10348_s15 + $0x78] sm:$0xff]  ;;  %v406_v40 = vld [vmem:[%s10348_s15 + $0x60] sm:$0xff]  ;;  %v408_v41 = vld [vmem:[%s10348_s15 + $0x70] sm:$0xff] }
 0x12a   :  { %v7919_v39 = vpack.c.bf16 %v409_v38, %v407_v37  ;;  %v7921_v42 = vpack.c.bf16 %v408_v41, %v406_v40 }
 0x12b   :  { %7906 = vmatpush3.bf16.msra.mxu1 %v7903_v6 }
 0x12c   :  { %7908 = vmatprep.subr.bf16.mxu1 %v7907_v21 }
 0x12e   :  { %7412 = vmatmul.mubr.msk.f32.vlgmr.msra.gmra.mrb[0].mxu1 %vm263_vm0, %v251_v7 }
 0x12f   :  { %7910 = vmatpush1.bf16.msra.mxu1 %v7909_v24  ;;  %492 = vmatprep.mubr.f32.mxu1 %v8635_v43 }
 0x130   :  { %7912 = vmatprep.subr.bf16.mxu1 %v7911_v27 }
 0x133   :  { %7914 = vmatpush1.bf16.msra.mxu1 %v7913_v30 }
 0x134   :  { %7916 = vmatprep.subr.bf16.mxu1 %v7915_v33 }
 0x137   :  { %7918 = vmatpush1.bf16.msra.mxu1 %v7917_v36 }
 0x138   :  { %7920 = vmatprep.subr.bf16.mxu1 %v7919_v39 }
 0x13b   :  { %7922 = vmatpush1.bf16.msra.mxu1 %v7921_v42 }
 0x13c   :  { %7434 = vmatprep.subr.mxu1 %v8635_v43 }
 0x201   :  { %v7413_v9 = vpop.f32.mrb[0].mxu1 }
 0x202   :  { %v8982_v10 = vadd.f32 %v7413_v9, %v7009_v8  ;;  %v336_v11 = vpop.f32.mrb[1].mxu1 }
 0x203   :  { %v337_v12 = vadd.f32 %v7009_v8, %v336_v11 }
 0x204   :  { %v351_v63 = vsel %vm347_vm1, %v8982_v10, 0.0 }
 0x205   :  { %v348_v13 = vsel %vm347_vm1, %v337_v12, 0.0 }
 0x206   :  { %349 = vadd.xlane.f32.xlu0 %v348_v13 }
 0x293   :  { %v350_v14 = vpop.xlane.xlu0 %349 }
 0x294   :  { %v355_v15 = vmul.f32 0.015625, %v350_v14 }
 0x296   :  { %v357_v16 = vsub.f32 %v337_v12, %v355_v15 }
 0x298   :  { %v359_v17 = vmul.f32 %v357_v16, %v357_v16 }
 0x29a   :  { %v361_v18 = vsel %vm347_vm1, %v359_v17, 0.0 }
 0x29b   :  { %362 = vadd.xlane.f32.xlu0 %v361_v18 }
 0x328   :  { %v363_v44 = vpop.xlane.xlu0 %362 }
 0x329   :  { %v367_v45 = vmul.f32 0.015625, %v363_v44 }
 0x32b   :  { %v369_v46 = vadd.f32 1e-05, %v367_v45 }
 0x32d   :  { %8117 = vrsqrt.f32 %v369_v46 }
 0x337   :  { %v8118_v47 = vpop.eup %8117 }
 0x338   :  { %v373_v49 = vmul.f32 %v8118_v47, %v357_v16 }
 0x33a   :  { %v381_v51 = vmul.f32 %v7012_v48, %v373_v49 }
 0x33c   :  { %v389_v53 = vadd.f32 %v7013_v50, %v381_v51 }
 0x33e   :  { %v9037_v54 = vadd.f32 %v391_v52, %v389_v53 }
 0x340   :  { %7014 = vmatmul.mubr.msk.f32.vlgmr.msra.gmra.mrb[2].mxu1 %vm347_vm1, %v9037_v54 }
 0x341   :  { %498 = vmatprep.mubr.f32.mxu1 %v8635_v43 }
 0x413   :  { %v494_v60 = vpop.f32.mrb[2].mxu1 }
 0x414   :  { %v9055_v61 = vadd.f32 %v494_v60, %v9052_v59  ;;  %v496_v62 = vpop.f32.mrb[3].mxu1 }
 0x415   :  { %v9079_v3 = vadd.f32 %v496_v62, %v9074_v1 }
 0x416   :  { %506 = vrot.lane.b32.xlu1 %v9055_v61, %s8637_s29 }
 0x43a   :  { %352 = vadd.xlane.f32.xlu1 %v351_v63 }
 0x44b   :  { %668 = vrot.lane.b32.xlu1 %v9055_v61, %s8638_s24 }
 0x44f   :  { %1169 = vrot.lane.b32.xlu1 %v9055_v61, %s8639_s2 }
 0x453   :  { %1335 = vrot.lane.b32.xlu1 %v9055_v61, %s8640_s17 }
 0x457   :  { %1501 = vrot.lane.b32.xlu1 %v9055_v61, %s10345_s23 }
 0x45b   :  { %1667 = vrot.lane.b32.xlu1 %v9055_v61, %s10332_s3 }
 0x488   :  { %v507_v2 = vpop.permute.xlu1 %506 }
 0x489   :  { %7415 = vmatpush3.xpose.msk.msra.mxu0 %vm508_vm3, %v507_v2 }
 0x48a   :  { %7419 = vmatprep.subr.mxu0 %v8635_v43 }
 0x48c   :  { %7417 = vmatmul.mubr.msk.f32.vlgmr.msra.gmra.mrb[0].mxu0 %vm508_vm3, %v9055_v61 }
 0x48d   :  { %7420 = vmatpush3.msra.mxu0 %v9079_v3  ;;  %7421 = vmatprep.mubr.msk.f32.mxu0 %vm8636_vm2, %v8635_v43 }
 0x48e   :  { %7424 = vmatprep.subr.mxu0 %v8635_v43 }
 0x4c7   :  { %v353_v4 = vpop.xlane.xlu1 %352 }
 0x4c8   :  { %v356_v5 = vmul.f32 0.015625, %v353_v4 }
 0x4ca   :  { %v358_v6 = vsub.f32 %v8982_v10, %v356_v5 }
 0x4cb   :  { %v669_v32 = vpop.permute.xlu1 %668 }
 0x4cc   :  { %v360_v7 = vmul.f32 %v358_v6, %v358_v6 }
 0x4ce   :  { %v364_v8 = vsel %vm347_vm1, %v360_v7, 0.0 }
 0x4cf   :  { %365 = vadd.xlane.f32.xlu0 %v364_v8  ;;  %v1170_v34 = vpop.permute.xlu1 %1169 }
 0x4d3   :  { %v1336_v39 = vpop.permute.xlu1 %1335 }
 0x4d7   :  { %v1502_v41 = vpop.permute.xlu1 %1501 }
 0x4db   :  { %v1668_v45 = vpop.permute.xlu1 %1667 }
 0x55c   :  { %v366_v9 = vpop.xlane.xlu0 %365 }
 0x55d   :  { %v368_v11 = vmul.f32 0.015625, %v366_v9 }
 0x55f   :  { %v370_v12 = vadd.f32 1e-05, %v368_v11  ;;  %v579_v13 = vpop.f32.mrb[0].mxu0 }
 0x560   :  { %v583_v14 = vmul.f32 0.35355338, %v579_v13  ;;  %v7418_v15 = vpop.f32.mrb[1].mxu0 }
 0x561   :  { %8119 = vrsqrt.f32 %v370_v12 }
 0x562   :  { %v584_v16 = vsel %vm508_vm3, %v583_v14, -inf }
 0x563   :  { %585 = vmax.xlane.f32.xlu0 %v584_v16 }
 0x56b   :  { %v8120_v17 = vpop.eup %8119 }
 0x56c   :  { %v374_v18 = vmul.f32 %v8120_v17, %v358_v6 }
 0x56e   :  { %v382_v19 = vmul.f32 %v7012_v48, %v374_v18 }
 0x570   :  { %v390_v20 = vadd.f32 %v7013_v50, %v382_v19 }
 0x572   :  { %v9090_v21 = vadd.f32 %v391_v52, %v390_v20 }
 0x574   :  { %7015 = vmatmul.mubr.msk.f32.gmra.mrb[4].mxu1 %vm347_vm1, %v9090_v21 }
 0x575   :  { %7436 = vmatprep.mubr.msk.f32.mxu1 %vm8636_vm2, %v8635_v43 }
 0x579   :  { %670 = vrot.lane.b32.xlu0 %v9055_v61, %s8641_s28 }
 0x57d   :  { %837 = vrot.lane.b32.xlu0 %v9055_v61, %s8642_s0 }
 0x5f0   :  { %v586_v10 = vpop.xlane.xlu0 %585 }
 0x5f1   :  { %v587_v22 = vsub.f32 %v583_v14, %v586_v10 }
 0x5f3   :  { %v588_v23 = vmul.f32 1.442695, %v587_v22 }
 0x5f4   :  { %v671_v24 = vpop.permute.xlu0 %670 }
 0x5f5   :  { %8121 = vpow2.f32 %v588_v23 }
 0x5f8   :  { %v838_v25 = vpop.permute.xlu0 %837 }
 0x5f9   :  { %7435 = vmatpush3.xpose.msk.msra.mxu1 %vm508_vm3, %v838_v25 }
 0x5fa   :  { %7444 = vmatprep.subr.mxu1 %v8635_v43 }
 0x5ff   :  { %v8122_v26 = vpop.eup %8121 }
 0x600   :  { %v590_v27 = vsel %vm508_vm3, %v8122_v26, 0.0 }
 0x601   :  { %591 = vadd.xlane.f32.xlu0 %v590_v27 }
 0x617   :  { %835 = vrot.lane.b32.xlu0 %v9055_v61, %s8643_s1 }
 0x61b   :  { %1003 = vrot.lane.b32.xlu0 %v9055_v61, %s8644_s13 }
 0x61f   :  { %1001 = vrot.lane.b32.xlu0 %v9055_v61, %s8645_s6 }
 0x623   :  { %1167 = vrot.lane.b32.xlu0 %v9055_v61, %s8646_s16 }
 0x627   :  { %1333 = vrot.lane.b32.xlu0 %v9055_v61, %s8647_s25 }
 0x62b   :  { %1499 = vrot.lane.b32.xlu0 %v9055_v61, %s8648_s26 }
 0x62f   :  { %1665 = vrot.lane.b32.xlu0 %v9055_v61, %s8649_s4 }
 0x647   :  { %v500_v28 = vpop.f32.mrb[4].mxu1 }
 0x648   :  { %v9118_v29 = vadd.f32 %v500_v28, %v9052_v59  ;;  %v9120_v30 = vpop.f32.mrb[5].mxu1 }
 0x64a   :  { %1872 = vrot.lane.b32.xlu1 %v9118_v29, %s8637_s29  ;;  %2035 = vrot.lane.b32.xlu0 %v9118_v29, %s8641_s28 }
 0x64e   :  { %2033 = vrot.lane.b32.xlu1 %v9118_v29, %s8638_s24  ;;  %2202 = vrot.lane.b32.xlu0 %v9118_v29, %s8642_s0 }
 0x652   :  { %2200 = vrot.lane.b32.xlu1 %v9118_v29, %s8643_s1  ;;  %2368 = vrot.lane.b32.xlu0 %v9118_v29, %s8644_s13 }
 0x656   :  { %2366 = vrot.lane.b32.xlu1 %v9118_v29, %s8645_s6  ;;  %2534 = vrot.lane.b32.xlu0 %v9118_v29, %s8639_s2 }
 0x65a   :  { %2532 = vrot.lane.b32.xlu1 %v9118_v29, %s8646_s16  ;;  %2700 = vrot.lane.b32.xlu0 %v9118_v29, %s8640_s17 }
 0x65e   :  { %2698 = vrot.lane.b32.xlu1 %v9118_v29, %s8647_s25  ;;  %2866 = vrot.lane.b32.xlu0 %v9118_v29, %s10345_s23 }
 0x662   :  { %2864 = vrot.lane.b32.xlu1 %v9118_v29, %s8648_s26  ;;  %3032 = vrot.lane.b32.xlu0 %v9118_v29, %s10332_s3 }
 0x666   :  { %3030 = vrot.lane.b32.xlu1 %v9118_v29, %s8649_s4 }
 0x68e   :  { %v592_v31 = vpop.xlane.xlu0 %591 }
 0x68f   :  { %8123 = vrcp.f32 %v592_v31 }
 0x692   :  { %v836_v33 = vpop.permute.xlu0 %835 }
 0x693   :  { %7437 = vmatmul.mubr.msk.f32.vlgmr.msra.gmra.mrb[6].mxu1 %vm508_vm3, %v836_v33 }
 0x694   :  { %7446 = vmatprep.mubr.msk.f32.mxu1 %vm8636_vm2, %v8635_v43 }
 0x696   :  { %v1004_v35 = vpop.permute.xlu0 %1003 }
 0x697   :  { %7445 = vmatpush3.xpose.msk.msra.mxu1 %vm508_vm3, %v1004_v35 }
 0x698   :  { %7454 = vmatprep.subr.mxu1 %v8635_v43 }
 0x699   :  { %v8124_v36 = vpop.eup %8123 }
 0x69a   :  { %v1002_v37 = vpop.permute.xlu0 %1001  ;;  %v594_v38 = vmul.f32 %v8124_v36, %v8122_v26 }
 0x69b   :  { %7447 = vmatmul.mubr.msk.f32.vlgmr.msra.gmra.mrb[8].mxu1 %vm508_vm3, %v1002_v37 }
 0x69c   :  { %7455 = vmatpush3.xpose.msk.msra.mxu1 %vm508_vm3, %v1170_v34  ;;  %7422 = vmatmul.mubr.msk.f32.vlgmr.msra.gmra.mrb[2].mxu0 %vm508_vm3, %v594_v38 }
 0x69d   :  { %7425 = vmatpush3.xpose.msk.msra.mxu0 %vm508_vm3, %v671_v24  ;;  %7456 = vmatprep.mubr.msk.f32.mxu1 %vm8636_vm2, %v8635_v43 }
 0x69e   :  { %v1168_v40 = vpop.permute.xlu0 %1167  ;;  %7464 = vmatprep.subr.mxu1 %v8635_v43  ;;  %7426 = vmatprep.mubr.msk.f32.mxu0 %vm8636_vm2, %v8635_v43 }
 0x69f   :  { %7457 = vmatmul.mubr.msk.f32.vlgmr.msra.gmra.mrb[10].mxu1 %vm508_vm3, %v1168_v40  ;;  %7429 = vmatprep.subr.mxu0 %v8635_v43 }
 0x6a0   :  { %7465 = vmatpush3.xpose.msk.msra.mxu1 %vm508_vm3, %v1336_v39  ;;  %7427 = vmatmul.mubr.msk.f32.vlgmr.msra.gmra.mrb[4].mxu0 %vm508_vm3, %v669_v32 }
 0x6a1   :  { %7466 = vmatprep.mubr.msk.f32.mxu1 %vm8636_vm2, %v8635_v43  ;;  %7474 = vmatprep.subr.mxu1 %v8635_v43 }
 0x6a2   :  { %v1334_v42 = vpop.permute.xlu0 %1333  ;;  %7431 = vmatprep.mubr.msk.f32.mxu0 %vm8636_vm2, %v8635_v43 }
 0x6a3   :  { %7467 = vmatmul.mubr.msk.f32.vlgmr.msra.gmra.mrb[12].mxu1 %vm508_vm3, %v1334_v42 }
 0x6a4   :  { %7475 = vmatpush3.xpose.msk.msra.mxu1 %vm508_vm3, %v1502_v41  ;;  %7476 = vmatprep.mubr.msk.f32.mxu1 %vm8636_vm2, %v8635_v43 }
 0x6a5   :  { %7484 = vmatprep.subr.mxu1 %v8635_v43 }
 0x6a6   :  { %v1500_v44 = vpop.permute.xlu0 %1499 }
 0x6a7   :  { %7477 = vmatmul.mubr.msk.f32.vlgmr.msra.gmra.mrb[14].mxu1 %vm508_vm3, %v1500_v44 }
 0x6a8   :  { %7485 = vmatpush3.xpose.msk.msra.mxu1 %vm508_vm3, %v1668_v45  ;;  %7486 = vmatprep.mubr.msk.f32.mxu1 %vm8636_vm2, %v8635_v43 }
 0x6a9   :  { %7494 = vmatprep.subr.mxu1 %v8635_v43 }
 0x6aa   :  { %v1666_v46 = vpop.permute.xlu0 %1665 }
 0x6ab   :  { %7487 = vmatmul.mubr.msk.f32.vlgmr.msra.gmra.mrb[16].mxu1 %vm508_vm3, %v1666_v46 }
 0x6ac   :  { %7496 = vmatprep.mubr.msk.f32.mxu1 %vm8636_vm2, %v8635_v43 }
 0x6bc   :  { %v2036_v47 = vpop.permute.xlu0 %2035  ;;  %v1873_v48 = vpop.permute.xlu1 %1872 }
 0x6bd   :  { %7495 = vmatpush3.xpose.msk.msra.mxu1 %vm508_vm3, %v1873_v48 }
 0x6be   :  { %7504 = vmatprep.subr.mxu1 %v8635_v43 }
 0x6c0   :  { %v2203_v49 = vpop.permute.xlu0 %2202  ;;  %7497 = vmatmul.mubr.msk.f32.vlgmr.msra.gmra.mrb[18].mxu1 %vm508_vm3, %v9118_v29  ;;  %v2034_v50 = vpop.permute.xlu1 %2033 }
 0x6c1   :  { %7505 = vmatpush3.xpose.msk.msra.mxu1 %vm508_vm3, %v2036_v47  ;;  %7506 = vmatprep.mubr.msk.f32.mxu1 %vm8636_vm2, %v8635_v43 }
 0x6c2   :  { %7514 = vmatprep.subr.mxu1 %v8635_v43 }
 0x6c4   :  { %v2369_v51 = vpop.permute.xlu0 %2368  ;;  %7507 = vmatmul.mubr.msk.f32.vlgmr.msra.gmra.mrb[20].mxu1 %vm508_vm3, %v2034_v50  ;;  %v2201_v52 = vpop.permute.xlu1 %2200 }
 0x6c5   :  { %7515 = vmatpush3.xpose.msk.msra.mxu1 %vm508_vm3, %v2203_v49  ;;  %7516 = vmatprep.mubr.msk.f32.mxu1 %vm8636_vm2, %v8635_v43 }
 0x6c6   :  { %7524 = vmatprep.subr.mxu1 %v8635_v43 }
 0x6c8   :  { %v2535_v53 = vpop.permute.xlu0 %2534  ;;  %7517 = vmatmul.mubr.msk.f32.vlgmr.msra.gmra.mrb[22].mxu1 %vm508_vm3, %v2201_v52  ;;  %v2367_v55 = vpop.permute.xlu1 %2366 }
 0x6c9   :  { %7525 = vmatpush3.xpose.msk.msra.mxu1 %vm508_vm3, %v2369_v51  ;;  %7526 = vmatprep.mubr.msk.f32.mxu1 %vm8636_vm2, %v8635_v43 }
 0x6ca   :  { %7534 = vmatprep.subr.mxu1 %v8635_v43 }
 0x6cc   :  { %v2701_v58 = vpop.permute.xlu0 %2700  ;;  %7527 = vmatmul.mubr.msk.f32.vlgmr.msra.gmra.mrb[24].mxu1 %vm508_vm3, %v2367_v55  ;;  %v2533_v59 = vpop.permute.xlu1 %2532 }
 0x6cd   :  { %7535 = vmatpush3.xpose.msk.msra.mxu1 %vm508_vm3, %v2535_v53  ;;  %7536 = vmatprep.mubr.msk.f32.mxu1 %vm8636_vm2, %v8635_v43 }
 0x6ce   :  { %7544 = vmatprep.subr.mxu1 %v8635_v43 }
 0x6d0   :  { %7537 = vmatmul.mubr.msk.f32.vlgmr.msra.gmra.mrb[26].mxu1 %vm508_vm3, %v2533_v59  ;;  %v2699_v60 = vpop.permute.xlu1 %2698  ;;  %v2867_v61 = vpop.permute.xlu0 %2866 }
 0x6d1   :  { %7545 = vmatpush3.xpose.msk.msra.mxu1 %vm508_vm3, %v2701_v58  ;;  %7546 = vmatprep.mubr.msk.f32.mxu1 %vm8636_vm2, %v8635_v43 }
 0x6d2   :  { %7554 = vmatprep.subr.mxu1 %v8635_v43 }
 0x6d4   :  { %7547 = vmatmul.mubr.msk.f32.vlgmr.msra.gmra.mrb[28].mxu1 %vm508_vm3, %v2699_v60  ;;  %v2865_v62 = vpop.permute.xlu1 %2864  ;;  %v3033_v63 = vpop.permute.xlu0 %3032 }
 0x6d5   :  { %7555 = vmatpush3.xpose.msk.msra.mxu1 %vm508_vm3, %v2867_v61  ;;  %7556 = vmatprep.mubr.msk.f32.mxu1 %vm8636_vm2, %v8635_v43 }
 0x6d6   :  { %7564 = vmatprep.subr.mxu1 %v8635_v43 }
 0x6d8   :  { %7557 = vmatmul.mubr.msk.f32.vlgmr.msra.gmra.mrb[30].mxu1 %vm508_vm3, %v2865_v62  ;;  %v3031_v2 = vpop.permute.xlu1 %3030 }
 0x6d9   :  { %7565 = vmatpush3.xpose.msk.msra.mxu1 %vm508_vm3, %v3033_v63  ;;  %7566 = vmatprep.mubr.msk.f32.mxu1 %vm8636_vm2, %v8635_v43 }
 0x6dc   :  { %7567 = vmatmul.mubr.msk.f32.vlgmr.msra.gmra.mrb[32].mxu1 %vm508_vm3, %v3031_v2 }
 0x766   :  { %v909_v4 = vpop.f32.mrb[6].mxu1 }
 0x767   :  { %v9226_v5 = vmul.f32 0.35355338, %v909_v4  ;;  %v7438_v6 = vpop.f32.mrb[7].mxu1 }
 0x769   :  { %v914_v7 = vsel %vm508_vm3, %v9226_v5, -inf }
 0x76a   :  { %915 = vmax.xlane.f32.xlu1 %v914_v7 }
 0x76e   :  { %v1075_v8 = vpop.f32.mrb[8].mxu1 }
 0x76f   :  { %v9230_v9 = vmul.f32 0.35355338, %v1075_v8  ;;  %v9232_v11 = vpop.f32.mrb[2].mxu0  ;;  %v7448_v12 = vpop.f32.mrb[9].mxu1 }
 0x770   :  { %v7423_v13 = vpop.f32.mrb[3].mxu0 }
 0x771   :  { %v1080_v14 = vsel %vm508_vm3, %v9230_v9, -inf }
 0x772   :  { %1081 = vmax.xlane.f32.xlu0 %v1080_v14  ;;  %v1241_v15 = vpop.f32.mrb[10].mxu1 }
 0x773   :  { %v9236_v16 = vmul.f32 0.35355338, %v1241_v15  ;;  %v9238_v17 = vpop.f32.mrb[4].mxu0  ;;  %v7458_v18 = vpop.f32.mrb[11].mxu1 }
 0x774   :  { %v7428_v19 = vpop.f32.mrb[5].mxu0 }
 0x775   :  { %v1246_v20 = vsel %vm508_vm3, %v9236_v16, -inf }
 0x776   :  { %1247 = vmax.xlane.f32.xlu0 %v1246_v20  ;;  %v1407_v10 = vpop.f32.mrb[12].mxu1 }
 0x777   :  { %v9242_v22 = vmul.f32 0.35355338, %v1407_v10  ;;  %v7468_v23 = vpop.f32.mrb[13].mxu1 }
 0x779   :  { %v1412_v24 = vsel %vm508_vm3, %v9242_v22, -inf }
 0x77a   :  { %1413 = vmax.xlane.f32.xlu0 %v1412_v24  ;;  %v1573_v25 = vpop.f32.mrb[14].mxu1 }
 0x77b   :  { %v9246_v26 = vmul.f32 0.35355338, %v1573_v25  ;;  %v7478_v27 = vpop.f32.mrb[15].mxu1 }
 0x77d   :  { %v1578_v28 = vsel %vm508_vm3, %v9246_v26, -inf }
 0x77e   :  { %1579 = vmax.xlane.f32.xlu1 %v1578_v28  ;;  %v1739_v29 = vpop.f32.mrb[16].mxu1 }
 0x77f   :  { %v9250_v31 = vmul.f32 0.35355338, %v1739_v29  ;;  %v7488_v32 = vpop.f32.mrb[17].mxu1 }
 0x781   :  { %v1744_v33 = vsel %vm508_vm3, %v9250_v31, -inf }
 0x782   :  { %1745 = vmax.xlane.f32.xlu0 %v1744_v33 }
 0x793   :  { %v1944_v34 = vpop.f32.mrb[18].mxu1 }
 0x794   :  { %v9254_v35 = vmul.f32 0.35355338, %v1944_v34  ;;  %v7498_v36 = vpop.f32.mrb[19].mxu1 }
 0x796   :  { %v1949_v37 = vsel %vm508_vm3, %v9254_v35, -inf }
 0x797   :  { %1950 = vmax.xlane.f32.xlu1 %v1949_v37  ;;  %v2107_v38 = vpop.f32.mrb[20].mxu1 }
 0x798   :  { %v9258_v39 = vmul.f32 0.35355338, %v2107_v38  ;;  %v7508_v40 = vpop.f32.mrb[21].mxu1 }
 0x79a   :  { %v2112_v41 = vsel %vm508_vm3, %v9258_v39, -inf }
 0x79b   :  { %2113 = vmax.xlane.f32.xlu0 %v2112_v41  ;;  %v2274_v42 = vpop.f32.mrb[22].mxu1 }
 0x79c   :  { %v9262_v44 = vmul.f32 0.35355338, %v2274_v42  ;;  %v7518_v45 = vpop.f32.mrb[23].mxu1 }
 0x79d   :  { %v746_v45 = vmul.f32 0.35355338, %v9238_v17 }
 0x79e   :  { %v2279_v46 = vsel %vm508_vm3, %v9262_v44, -inf }
 0x79f   :  { %2280 = vmax.xlane.f32.xlu1 %v2279_v46  ;;  %v2440_v47 = vpop.f32.mrb[24].mxu1 }
 0x7a0   :  { %v9266_v48 = vmul.f32 0.35355338, %v2440_v47  ;;  %v7528_v49 = vpop.f32.mrb[25].mxu1 }
 0x7a1   :  { %v747_v49 = vsel %vm508_vm3, %v746_v45, -inf }
 0x7a2   :  { %v2445_v50 = vsel %vm508_vm3, %v9266_v48, -inf }
 0x7a3   :  { %2446 = vmax.xlane.f32.xlu0 %v2445_v50  ;;  %v2606_v51 = vpop.f32.mrb[26].mxu1 }
 0x7a4   :  { %v9270_v52 = vmul.f32 0.35355338, %v2606_v51  ;;  %v7538_v53 = vpop.f32.mrb[27].mxu1 }
 0x7a6   :  { %v2611_v55 = vsel %vm508_vm3, %v9270_v52, -inf }
 0x7a7   :  { %2612 = vmax.xlane.f32.xlu1 %v2611_v55  ;;  %v2772_v58 = vpop.f32.mrb[28].mxu1 }
 0x7a8   :  { %v9274_v59 = vmul.f32 0.35355338, %v2772_v58  ;;  %v7548_v60 = vpop.f32.mrb[29].mxu1 }
 0x7aa   :  { %v2777_v61 = vsel %vm508_vm3, %v9274_v59, -inf }
 0x7ab   :  { %2778 = vmax.xlane.f32.xlu0 %v2777_v61  ;;  %v2938_v62 = vpop.f32.mrb[30].mxu1 }
 0x7ac   :  { %v9278_v63 = vmul.f32 0.35355338, %v2938_v62  ;;  %v7558_v2 = vpop.f32.mrb[31].mxu1 }
 0x7ae   :  { %v2943_v4 = vsel %vm508_vm3, %v9278_v63, -inf }
 0x7af   :  { %2944 = vmax.xlane.f32.xlu1 %v2943_v4  ;;  %v3104_v6 = vpop.f32.mrb[32].mxu1 }
 0x7b0   :  { %v9282_v7 = vmul.f32 0.35355338, %v3104_v6  ;;  %v7568_v8 = vpop.f32.mrb[33].mxu1 }
 0x7b2   :  { %v3109_v12 = vsel %vm508_vm3, %v9282_v7, -inf }
 0x7b3   :  { %3110 = vmax.xlane.f32.xlu0 %v3109_v12 }
 0x7c0   :  { %925 = vrot.lane.b32.xlu1 %v9079_v3, %s8643_s1 }
 0x7c9   :  { %759 = vrot.lane.b32.xlu0 %v9079_v3, %s8638_s24 }
 0x7f7   :  { %v916_v13 = vpop.xlane.xlu1 %915 }
 0x7f8   :  { %v917_v14 = vsub.f32 %v9226_v5, %v916_v13 }
 0x7fa   :  { %v918_v15 = vmul.f32 1.442695, %v917_v14 }
 0x7fc   :  { %8125 = vpow2.f32 %v918_v15 }
 0x7ff   :  { %v1082_v18 = vpop.xlane.xlu0 %1081 }
 0x800   :  { %v1083_v19 = vsub.f32 %v9230_v9, %v1082_v18 }
 0x802   :  { %v1084_v20 = vmul.f32 1.442695, %v1083_v19 }
 0x803   :  { %v1248_v10 = vpop.xlane.xlu0 %1247 }
 0x804   :  { %8127 = vpow2.f32 %v1084_v20  ;;  %v1249_v23 = vsub.f32 %v9236_v16, %v1248_v10 }
 0x806   :  { %v9293_v24 = vpop.eup %8125  ;;  %v1250_v25 = vmul.f32 1.442695, %v1249_v23 }
 0x807   :  { %v1414_v27 = vpop.xlane.xlu0 %1413  ;;  %v920_v28 = vsel %vm508_vm3, %v9293_v24, 0.0 }
 0x808   :  { %8129 = vpow2.f32 %v1250_v25  ;;  %v1415_v5 = vsub.f32 %v9242_v22, %v1414_v27  ;;  %921 = vadd.xlane.f32.xlu0 %v920_v28 }
 0x80a   :  { %v1416_v29 = vmul.f32 1.442695, %v1415_v5  ;;  %v9358_v5 = vadd.f32 %v9120_v30, %v9074_v1 }
 0x80b   :  { %v1580_v32 = vpop.xlane.xlu1 %1579 }
 0x80c   :  { %8131 = vpow2.f32 %v1416_v29  ;;  %v1581_v9 = vsub.f32 %v9246_v26, %v1580_v32 }
 0x80e   :  { %v9299_v33 = vpop.eup %8127  ;;  %v1582_v34 = vmul.f32 1.442695, %v1581_v9 }
 0x80f   :  { %v1746_v16 = vpop.xlane.xlu0 %1745  ;;  %v1086_v36 = vsel %vm508_vm3, %v9299_v33, 0.0 }
 0x810   :  { %8133 = vpow2.f32 %v1582_v34  ;;  %v1747_v37 = vsub.f32 %v9250_v31, %v1746_v16  ;;  %1087 = vadd.xlane.f32.xlu1 %v1086_v36 }
 0x812   :  { %v9304_v38 = vpop.eup %8129  ;;  %v1748_v22 = vmul.f32 1.442695, %v1747_v37 }
 0x813   :  { %v1252_v40 = vsel %vm508_vm3, %v9304_v38, 0.0 }
 0x814   :  { %8135 = vpow2.f32 %v1748_v22  ;;  %1253 = vadd.xlane.f32.xlu0 %v1252_v40 }
 0x816   :  { %v9308_v26 = vpop.eup %8131 }
 0x817   :  { %v1418_v41 = vsel %vm508_vm3, %v9308_v26, 0.0 }
 0x818   :  { %1419 = vadd.xlane.f32.xlu1 %v1418_v41 }
 0x81a   :  { %v9312_v42 = vpop.eup %8133 }
 0x81b   :  { %v1584_v31 = vsel %vm508_vm3, %v9312_v42, 0.0 }
 0x81c   :  { %1585 = vadd.xlane.f32.xlu0 %v1584_v31 }
 0x81e   :  { %v9317_v46 = vpop.eup %8135 }
 0x81f   :  { %v1750_v47 = vsel %vm508_vm3, %v9317_v46, 0.0 }
 0x820   :  { %1751 = vadd.xlane.f32.xlu1 %v1750_v47  ;;  %748 = vmax.xlane.f32.xlu0 %v747_v49 }
 0x824   :  { %v1951_v50 = vpop.xlane.xlu1 %1950 }
 0x825   :  { %v1952_v51 = vsub.f32 %v9254_v35, %v1951_v50 }
 0x827   :  { %v1953_v53 = vmul.f32 1.442695, %v1952_v51 }
 0x828   :  { %v2114_v55 = vpop.xlane.xlu0 %2113 }
 0x829   :  { %8137 = vpow2.f32 %v1953_v53  ;;  %v2115_v17 = vsub.f32 %v9258_v39, %v2114_v55 }
 0x82b   :  { %v2116_v58 = vmul.f32 1.442695, %v2115_v17 }
 0x82c   :  { %v2281_v6 = vpop.xlane.xlu1 %2280 }
 0x82d   :  { %8139 = vpow2.f32 %v2116_v58  ;;  %v2282_v12 = vsub.f32 %v9262_v44, %v2281_v6 }
 0x82f   :  { %v2283_v15 = vmul.f32 1.442695, %v2282_v12 }
 0x830   :  { %v2447_v60 = vpop.xlane.xlu0 %2446 }
 0x831   :  { %v2448_v61 = vsub.f32 %v9266_v48, %v2447_v60 }
 0x833   :  { %v9325_v62 = vpop.eup %8137  ;;  %v2449_v2 = vmul.f32 1.442695, %v2448_v61 }
 0x834   :  { %v1955_v4 = vsel %vm508_vm3, %v9325_v62, 0.0  ;;  %v2613_v1 = vpop.xlane.xlu1 %2612 }
 0x835   :  { %8141 = vpow2.f32 %v2449_v2  ;;  %1956 = vadd.xlane.f32.xlu1 %v1955_v4  ;;  %v2614_v30 = vsub.f32 %v9270_v52, %v2613_v1 }
 0x836   :  { %1091 = vrot.lane.b32.xlu0 %v9079_v3, %s8645_s6  ;;  %8143 = vpow2.f32 %v2283_v15 }
 0x837   :  { %v9331_v35 = vpop.eup %8139  ;;  %v2615_v37 = vmul.f32 1.442695, %v2614_v30 }
 0x838   :  { %v2118_v39 = vsel %vm508_vm3, %v9331_v35, 0.0  ;;  %v2779_v8 = vpop.xlane.xlu0 %2778 }
 0x839   :  { %2119 = vadd.xlane.f32.xlu1 %v2118_v39  ;;  %v2780_v44 = vsub.f32 %v9274_v59, %v2779_v8 }
 0x83b   :  { %v2781_v10 = vmul.f32 1.442695, %v2780_v44 }
 0x83c   :  { %v2945_v36 = vpop.xlane.xlu1 %2944 }
 0x83d   :  { %8145 = vpow2.f32 %v2781_v10  ;;  %v2946_v22 = vsub.f32 %v9278_v63, %v2945_v36 }
 0x83f   :  { %v9335_v48 = vpop.eup %8141  ;;  %v2947_v40 = vmul.f32 1.442695, %v2946_v22 }
 0x840   :  { %v3111_v13 = vpop.xlane.xlu0 %3110  ;;  %v2451_v14 = vsel %vm508_vm3, %v9335_v48, 0.0  ;;  %v9341_v19 = vpop.eup %8143 }
 0x841   :  { %2452 = vadd.xlane.f32.xlu1 %v2451_v14  ;;  %v2285_v20 = vsel %vm508_vm3, %v9341_v19, 0.0  ;;  %v3112_v41 = vsub.f32 %v9282_v7, %v3111_v13  ;;  %v926_v7 = vpop.permute.xlu1 %925 }
 0x844   :  { %v760_v18 = vpop.permute.xlu0 %759 }
 0x845   :  { %7430 = vmatpush3.msra.mxu0 %v760_v18 }
 0x846   :  { %7439 = vmatprep.subr.mxu0 %v8635_v43 }
 0x847   :  { %v9350_v23 = vpop.eup %8145 }
 0x848   :  { %v2783_v25 = vsel %vm508_vm3, %v9350_v23, 0.0 }
 0x855   :  { %2286 = vadd.xlane.f32.xlu0 %v2285_v20 }
 0x86b   :  { %1257 = vrot.lane.b32.xlu0 %v9079_v3, %s8646_s16 }
 0x86f   :  { %1589 = vrot.lane.b32.xlu0 %v9079_v3, %s8648_s26 }
 0x88e   :  { %2784 = vadd.xlane.f32.xlu0 %v2783_v25 }
 0x895   :  { %v922_v27 = vpop.xlane.xlu0 %921 }
 0x89d   :  { %v1088_v50 = vpop.xlane.xlu1 %1087 }
 0x8a1   :  { %v1254_v28 = vpop.xlane.xlu0 %1253 }
 0x8a4   :  { %1755 = vrot.lane.b32.xlu0 %v9079_v3, %s8649_s4 }
 0x8a5   :  { %v1420_v51 = vpop.xlane.xlu1 %1419 }
 0x8a8   :  { %2290 = vrot.lane.b32.xlu0 %v9358_v5, %s8643_s1 }
 0x8a9   :  { %v1586_v59 = vpop.xlane.xlu0 %1585 }
 0x8ac   :  { %2622 = vrot.lane.b32.xlu0 %v9358_v5, %s8646_s16 }
 0x8ad   :  { %v749_v29 = vpop.xlane.xlu0 %748  ;;  %v1752_v53 = vpop.xlane.xlu1 %1751 }
 0x8ae   :  { %v750_v32 = vsub.f32 %v746_v45, %v749_v29  ;;  %v3113_v45 = vmul.f32 1.442695, %v3112_v41 }
 0x8b0   :  { %v751_v9 = vmul.f32 1.442695, %v750_v32  ;;  %2954 = vrot.lane.b32.xlu0 %v9358_v5, %s8648_s26 }
 0x8b1   :  { %v1092_v61 = vpop.permute.xlu0 %1091 }
 0x8b2   :  { %8147 = vpow2.f32 %v751_v9 }
 0x8b3   :  { %8149 = vpow2.f32 %v2615_v37 }
 0x8b4   :  { %8151 = vpow2.f32 %v2947_v40 }
 0x8b5   :  { %8153 = vpow2.f32 %v3113_v45 }
 0x8bc   :  { %v8148_v34 = vpop.eup %8147 }
 0x8bd   :  { %v753_v16 = vsel %vm508_vm3, %v8148_v34, 0.0  ;;  %v9372_v31 = vpop.eup %8149 }
 0x8be   :  { %754 = vadd.xlane.f32.xlu1 %v753_v16  ;;  %v2617_v47 = vsel %vm508_vm3, %v9372_v31, 0.0 }
 0x8c2   :  { %v1957_v55 = vpop.xlane.xlu1 %1956 }
 0x8c6   :  { %v9392_v17 = vpop.xlane.xlu1 %2119 }
 0x8ce   :  { %v9394_v58 = vpop.xlane.xlu1 %2452 }
 0x8cf   :  { %1423 = vrot.lane.b32.xlu1 %v9079_v3, %s8647_s25  ;;  %v9376_v3 = vpop.eup %8151 }
 0x8d0   :  { %v2949_v52 = vsel %vm508_vm3, %v9376_v3, 0.0  ;;  %v9380_v49 = vpop.eup %8153 }
 0x8d1   :  { %v3115_v63 = vsel %vm508_vm3, %v9380_v49, 0.0 }
 0x8e2   :  { %v2287_v4 = vpop.xlane.xlu0 %2286 }
 0x8e6   :  { %v1258_v13 = vpop.permute.xlu0 %1257 }
 0x8f3   :  { %2618 = vadd.xlane.f32.xlu1 %v2617_v47 }
 0x8f7   :  { %2950 = vadd.xlane.f32.xlu1 %v2949_v52 }
 0x8fb   :  { %3116 = vadd.xlane.f32.xlu1 %v3115_v63 }
 0x90c   :  { %2124 = vrot.lane.b32.xlu1 %v9358_v5, %s8638_s24 }
 0x910   :  { %2456 = vrot.lane.b32.xlu1 %v9358_v5, %s8645_s6 }
 0x914   :  { %2788 = vrot.lane.b32.xlu1 %v9358_v5, %s8647_s25 }
 0x918   :  { %3120 = vrot.lane.b32.xlu1 %v9358_v5, %s8649_s4 }
 0x94b   :  { %v755_v60 = vpop.xlane.xlu1 %754 }
 0x94c   :  { %8155 = vrcp.f32 %v755_v60 }
 0x94d   :  { %8157 = vrcp.f32 %v922_v27 }
 0x94e   :  { %8159 = vrcp.f32 %v1088_v50 }
 0x94f   :  { %8161 = vrcp.f32 %v1254_v28  ;;  %v1424_v44 = vpop.permute.xlu1 %1423 }
 0x950   :  { %8163 = vrcp.f32 %v1420_v51 }
 0x951   :  { %8165 = vrcp.f32 %v1586_v59 }
 0x952   :  { %8167 = vrcp.f32 %v1752_v53 }
 0x953   :  { %8169 = vrcp.f32 %v1957_v55 }
 0x954   :  { %8171 = vrcp.f32 %v9392_v17 }
 0x955   :  { %8173 = vrcp.f32 %v2287_v4 }
 0x956   :  { %v8156_v2 = vpop.eup %8155  ;;  %8175 = vrcp.f32 %v9394_v58 }
 0x957   :  { %v757_v39 = vmul.f32 %v8156_v2, %v8148_v34  ;;  %v8158_v6 = vpop.eup %8157 }
 0x958   :  { %v924_v8 = vmul.f32 %v8158_v6, %v9293_v24  ;;  %v8160_v12 = vpop.eup %8159  ;;  %v1590_v24 = vpop.permute.xlu0 %1589 }
 0x959   :  { %7432 = vmatmul.mubr.msk.f32.vlgmr.msra.gmra.mrb[6].mxu0 %vm508_vm3, %v757_v39  ;;  %v1090_v14 = vmul.f32 %v8160_v12, %v9299_v33  ;;  %v8162_v15 = vpop.eup %8161  ;;  %v3231_v12 = vld [vmem:[%s10308_s8] sm:$0xff] }
 0x95a   :  { %7440 = vmatpush3.msra.mxu0 %v926_v7  ;;  %7441 = vmatprep.mubr.msk.f32.mxu0 %vm8636_vm2, %v8635_v43  ;;  %v1256_v18 = vmul.f32 %v8162_v15, %v9304_v38  ;;  %v8164_v20 = vpop.eup %8163  ;;  %v3233_v15 = vld [vmem:[%s10308_s8 + $0x10] sm:$0xff] }
 0x95b   :  { %7449 = vmatprep.subr.mxu0 %v8635_v43  ;;  %v1422_v10 = vmul.f32 %v8164_v20, %v9308_v26  ;;  %v8166_v25 = vpop.eup %8165 }
 0x95c   :  { %v2785_v33 = vpop.xlane.xlu0 %2784  ;;  %v1588_v38 = vmul.f32 %v8166_v25, %v9312_v42  ;;  %v8168_v27 = vpop.eup %8167 }
 0x95d   :  { %7442 = vmatmul.mubr.msk.f32.vlgmr.msra.gmra.mrb[8].mxu0 %vm508_vm3, %v924_v8  ;;  %v1754_v26 = vmul.f32 %v8168_v27, %v9317_v46  ;;  %v8170_v59 = vpop.eup %8169 }
 0x95e   :  { %7450 = vmatpush3.msra.mxu0 %v1092_v61  ;;  %7451 = vmatprep.mubr.msk.f32.mxu0 %vm8636_vm2, %v8635_v43  ;;  %v1959_v42 = vmul.f32 %v8170_v59, %v9325_v62  ;;  %v8172_v32 = vpop.eup %8171 }
 0x95f   :  { %7459 = vmatprep.subr.mxu0 %v8635_v43  ;;  %v2122_v62 = vmul.f32 %v8172_v32, %v9331_v35  ;;  %v8174_v34 = vpop.eup %8173 }
 0x960   :  { %v1756_v28 = vpop.permute.xlu0 %1755  ;;  %v2289_v30 = vmul.f32 %v8174_v34, %v9341_v19  ;;  %v8176_v36 = vpop.eup %8175 }
 0x961   :  { %7452 = vmatmul.mubr.msk.f32.vlgmr.msra.gmra.mrb[10].mxu0 %vm508_vm3, %v1090_v14  ;;  %v2455_v35 = vmul.f32 %v8176_v36, %v9335_v48 }
 0x962   :  { %7460 = vmatpush3.msra.mxu0 %v1258_v13  ;;  %7461 = vmatprep.mubr.msk.f32.mxu0 %vm8636_vm2, %v8635_v43  ;;  %v3232_v13 = vld [vmem:[%s10308_s8 + $0x8] sm:$0xff] }
 0x963   :  { %7469 = vmatprep.subr.mxu0 %v8635_v43  ;;  %v7923_v14 = vpack.c.bf16 %v3232_v13, %v3231_v12 }
 0x964   :  { %v2291_v16 = vpop.permute.xlu0 %2290 }
 0x965   :  { %7462 = vmatmul.mubr.msk.f32.vlgmr.msra.gmra.mrb[12].mxu0 %vm508_vm3, %v1256_v18  ;;  %7924 = vmatprep.subr.bf16.mxu1 %v7923_v14 }
 0x966   :  { %7470 = vmatpush3.msra.mxu0 %v1424_v44  ;;  %7471 = vmatprep.mubr.msk.f32.mxu0 %vm8636_vm2, %v8635_v43 }
 0x967   :  { %7479 = vmatprep.subr.mxu0 %v8635_v43  ;;  %7926 = vmatpush3.bf16.msra.mxu1 %v7923_v14 }
 0x968   :  { %v2623_v22 = vpop.permute.xlu0 %2622 }
 0x969   :  { %7472 = vmatmul.mubr.msk.f32.vlgmr.msra.gmra.mrb[14].mxu0 %vm508_vm3, %v1422_v10  ;;  %v3236_v10 = vld [vmem:[%s10308_s8 + $0x28] sm:$0xff] }
 0x96a   :  { %7480 = vmatpush3.msra.mxu0 %v1590_v24  ;;  %7481 = vmatprep.mubr.msk.f32.mxu0 %vm8636_vm2, %v8635_v43  ;;  %v3234_v24 = vld [vmem:[%s10308_s8 + $0x18] sm:$0xff] }
 0x96b   :  { %7489 = vmatprep.subr.mxu0 %v8635_v43  ;;  %v7927_v20 = vpack.c.bf16 %v3234_v24, %v3233_v15 }
 0x96c   :  { %v2955_v47 = vpop.permute.xlu0 %2954 }
 0x96d   :  { %7482 = vmatmul.mubr.msk.f32.vlgmr.msra.gmra.mrb[16].mxu0 %vm508_vm3, %v1588_v38  ;;  %7928 = vmatprep.subr.bf16.mxu1 %v7927_v20 }
 0x96e   :  { %7490 = vmatpush3.msra.mxu0 %v1756_v28  ;;  %7491 = vmatprep.mubr.msk.f32.mxu0 %vm8636_vm2, %v8635_v43  ;;  %v3237_v28 = vld [vmem:[%s10308_s8 + $0x30] sm:$0xff] }
 0x96f   :  { %7499 = vmatprep.subr.mxu0 %v8635_v43  ;;  %7930 = vmatpush3.bf16.msra.mxu1 %v7927_v20 }
 0x971   :  { %7492 = vmatmul.mubr.msk.f32.vlgmr.msra.gmra.mrb[18].mxu0 %vm508_vm3, %v1754_v26  ;;  %v3238_v26 = vld [vmem:[%s10308_s8 + $0x38] sm:$0xff] }
 0x972   :  { %7500 = vmatpush3.msra.mxu0 %v9358_v5  ;;  %7501 = vmatprep.mubr.msk.f32.mxu0 %vm8636_vm2, %v8635_v43 }
 0x973   :  { %7509 = vmatprep.subr.mxu0 %v8635_v43 }
 0x975   :  { %7502 = vmatmul.mubr.msk.f32.vlgmr.msra.gmra.mrb[20].mxu0 %vm508_vm3, %v1959_v42  ;;  %v7935_v42 = vpack.c.bf16 %v3238_v26, %v3237_v28  ;;  %v3373_v28 = vld [vmem:[#allocation13] sm:$0xff]  ;;  %v3374_v26 = vld [vmem:[#allocation13 + $0x8] sm:$0xff] }
 0x976   :  { %7511 = vmatprep.mubr.msk.f32.mxu0 %vm8636_vm2, %v8635_v43 }
 0x980   :  { %v2619_v46 = vpop.xlane.xlu1 %2618 }
 0x981   :  { %8177 = vrcp.f32 %v2619_v46 }
 0x982   :  { %8179 = vrcp.f32 %v2785_v33  ;;  %v3235_v33 = vld [vmem:[%s10308_s8 + $0x20] sm:$0xff] }
 0x983   :  { %v7931_v38 = vpack.c.bf16 %v3236_v10, %v3235_v33 }
 0x984   :  { %v2951_v29 = vpop.xlane.xlu1 %2950 }
 0x985   :  { %8181 = vrcp.f32 %v2951_v29  ;;  %7932 = vmatprep.subr.bf16.mxu1 %v7931_v38 }
 0x986   :  { %7934 = vmatpush3.bf16.msra.mxu1 %v7931_v38 }
 0x987   :  { %7936 = vmatprep.subr.bf16.mxu1 %v7935_v42 }
 0x988   :  { %v3117_v5 = vpop.xlane.xlu1 %3116 }
 0x989   :  { %8183 = vrcp.f32 %v3117_v5 }
 0x98a   :  { %7938 = vmatpush3.bf16.msra.mxu1 %v7935_v42  ;;  %v3375_v42 = vld [vmem:[#allocation13 + $0x10] sm:$0xff] }
 0x98b   :  { %v8178_v37 = vpop.eup %8177 }
 0x98c   :  { %v2125_v9 = vpop.permute.xlu1 %2124  ;;  %v2621_v19 = vmul.f32 %v8178_v37, %v9372_v31  ;;  %v8180_v40 = vpop.eup %8179 }
 0x98d   :  { %7510 = vmatpush3.msra.mxu0 %v2125_v9  ;;  %v2787_v48 = vmul.f32 %v8180_v40, %v9350_v23 }
 0x98e   :  { %7512 = vmatmul.mubr.msk.f32.vlgmr.msra.gmra.mrb[22].mxu0 %vm508_vm3, %v2122_v62  ;;  %7519 = vmatprep.subr.mxu0 %v8635_v43 }
 0x98f   :  { %7520 = vmatpush3.msra.mxu0 %v2291_v16  ;;  %7521 = vmatprep.mubr.msk.f32.mxu0 %vm8636_vm2, %v8635_v43  ;;  %v8182_v45 = vpop.eup %8181 }
 0x990   :  { %v2457_v1 = vpop.permute.xlu1 %2456  ;;  %7529 = vmatprep.subr.mxu0 %v8635_v43  ;;  %v2953_v31 = vmul.f32 %v8182_v45, %v9376_v3 }
 0x992   :  { %7522 = vmatmul.mubr.msk.f32.vlgmr.msra.gmra.mrb[24].mxu0 %vm508_vm3, %v2289_v30 }
 0x993   :  { %7530 = vmatpush3.msra.mxu0 %v2457_v1  ;;  %7531 = vmatprep.mubr.msk.f32.mxu0 %vm8636_vm2, %v8635_v43  ;;  %v8184_v52 = vpop.eup %8183 }
 0x994   :  { %7539 = vmatprep.subr.mxu0 %v8635_v43  ;;  %v2789_v41 = vpop.permute.xlu1 %2788  ;;  %v3119_v23 = vmul.f32 %v8184_v52, %v9380_v49 }
 0x996   :  { %7532 = vmatmul.mubr.msk.f32.vlgmr.msra.gmra.mrb[26].mxu0 %vm508_vm3, %v2455_v35 }
 0x997   :  { %7540 = vmatpush3.msra.mxu0 %v2623_v22  ;;  %7541 = vmatprep.mubr.msk.f32.mxu0 %vm8636_vm2, %v8635_v43 }
 0x998   :  { %7549 = vmatprep.subr.mxu0 %v8635_v43  ;;  %v3121_v63 = vpop.permute.xlu1 %3120 }
 0x99a   :  { %7542 = vmatmul.mubr.msk.f32.vlgmr.msra.gmra.mrb[28].mxu0 %vm508_vm3, %v2621_v19 }
 0x99b   :  { %7550 = vmatpush3.msra.mxu0 %v2789_v41  ;;  %7551 = vmatprep.mubr.msk.f32.mxu0 %vm8636_vm2, %v8635_v43 }
 0x99c   :  { %7559 = vmatprep.subr.mxu0 %v8635_v43 }
 0x99e   :  { %7552 = vmatmul.mubr.msk.f32.vlgmr.msra.gmra.mrb[30].mxu0 %vm508_vm3, %v2787_v48 }
 0x99f   :  { %7560 = vmatpush3.msra.mxu0 %v2955_v47  ;;  %7561 = vmatprep.mubr.msk.f32.mxu0 %vm8636_vm2, %v8635_v43 }
 0x9a0   :  { %7569 = vmatprep.subr.mxu0 %v8635_v43 }
 0x9a2   :  { %7562 = vmatmul.mubr.msk.f32.vlgmr.msra.gmra.mrb[32].mxu0 %vm508_vm3, %v2953_v31 }
 0x9a3   :  { %7570 = vmatpush3.msra.mxu0 %v3121_v63  ;;  %7571 = vmatprep.mubr.msk.f32.mxu0 %vm8636_vm2, %v8635_v43 }
 0x9a6   :  { %7572 = vmatmul.mubr.msk.f32.vlgmr.msra.gmra.mrb[34].mxu0 %vm508_vm3, %v3119_v23 }
 0xa2c   :  { %v831_v7 = vpop.f32.mrb[6].mxu0 }
 0xa2d   :  { %1832 = vrot.lane.b32.xlu0 %v831_v7, %s10332_s3  ;;  %v7433_v50 = vpop.f32.mrb[7].mxu0 }
 0xa30   :  { %v997_v51 = vpop.f32.mrb[8].mxu0 }
 0xa31   :  { %1836 = vrot.lane.b32.xlu1 %v997_v51, %s10345_s23  ;;  %v7443_v3 = vpop.f32.mrb[9].mxu0 }
 0xa34   :  { %v1163_v53 = vpop.f32.mrb[10].mxu0 }
 0xa35   :  { %1840 = vrot.lane.b32.xlu1 %v1163_v53, %s8640_s17  ;;  %v7453_v55 = vpop.f32.mrb[11].mxu0 }
 0xa38   :  { %v1329_v17 = vpop.f32.mrb[12].mxu0 }
 0xa39   :  { %1844 = vrot.lane.b32.xlu1 %v1329_v17, %s8639_s2  ;;  %v7463_v58 = vpop.f32.mrb[13].mxu0 }
 0xa3c   :  { %v1495_v60 = vpop.f32.mrb[14].mxu0 }
 0xa3d   :  { %1848 = vrot.lane.b32.xlu1 %v1495_v60, %s8644_s13  ;;  %v7473_v49 = vpop.f32.mrb[15].mxu0 }
 0xa40   :  { %v1661_v61 = vpop.f32.mrb[16].mxu0 }
 0xa41   :  { %1852 = vrot.lane.b32.xlu1 %v1661_v61, %s8642_s0  ;;  %v7483_v2 = vpop.f32.mrb[17].mxu0 }
 0xa44   :  { %v1827_v4 = vpop.f32.mrb[18].mxu0 }
 0xa45   :  { %1856 = vrot.lane.b32.xlu1 %v1827_v4, %s8641_s28  ;;  %v7493_v39 = vpop.f32.mrb[19].mxu0  ;;  %v7064_v4 = vld [vmem:[%s10309_s9] ss:$0 sm:$0xff] }
 0xa48   :  { %v9476_v6 = vpop.f32.mrb[20].mxu0 }
 0xa49   :  { %v7503_v8 = vpop.f32.mrb[21].mxu0 }
 0xa61   :  { %v2196_v18 = vpop.f32.mrb[22].mxu0 }
 0xa62   :  { %3197 = vrot.lane.b32.xlu0 %v2196_v18, %s10332_s3  ;;  %v7513_v44 = vpop.f32.mrb[23].mxu0 }
 0xa65   :  { %v2362_v25 = vpop.f32.mrb[24].mxu0 }
 0xa66   :  { %3201 = vrot.lane.b32.xlu0 %v2362_v25, %s10345_s23  ;;  %v7523_v27 = vpop.f32.mrb[25].mxu0 }
 0xa69   :  { %v2528_v59 = vpop.f32.mrb[26].mxu0 }
 0xa6a   :  { %3205 = vrot.lane.b32.xlu0 %v2528_v59, %s8640_s17  ;;  %v7533_v46 = vpop.f32.mrb[27].mxu0  ;;  %v7939_v59 = vpack.c.bf16 %v3374_v26, %v3373_v28 }
 0xa6b   :  { %v3376_v46 = vld [vmem:[#allocation13 + $0x18] sm:$0xff] }
 0xa6c   :  { %7940 = vmatprep.subr.bf16.mxu0 %v7939_v59 }
 0xa6d   :  { %v2694_v29 = vpop.f32.mrb[28].mxu0  ;;  %7942 = vmatpush3.bf16.msra.mxu0 %v7939_v59 }
 0xa6e   :  { %3209 = vrot.lane.b32.xlu0 %v2694_v29, %s8639_s2  ;;  %v7543_v5 = vpop.f32.mrb[29].mxu0  ;;  %v7943_v29 = vpack.c.bf16 %v3376_v46, %v3375_v42 }
 0xa6f   :  { %v3377_v5 = vld [vmem:[#allocation13 + $0x20] sm:$0xff] }
 0xa70   :  { %7944 = vmatprep.subr.bf16.mxu0 %v7943_v29 }
 0xa71   :  { %v2860_v32 = vpop.f32.mrb[30].mxu0  ;;  %7946 = vmatpush3.bf16.msra.mxu0 %v7943_v29 }
 0xa72   :  { %3213 = vrot.lane.b32.xlu0 %v2860_v32, %s8644_s13  ;;  %v7553_v9 = vpop.f32.mrb[31].mxu0  ;;  %v3378_v32 = vld [vmem:[#allocation13 + $0x28] sm:$0xff] }
 0xa73   :  { %v7947_v9 = vpack.c.bf16 %v3378_v32, %v3377_v5 }
 0xa75   :  { %v3026_v62 = vpop.f32.mrb[32].mxu0  ;;  %7948 = vmatprep.subr.bf16.mxu0 %v7947_v9 }
 0xa76   :  { %3217 = vrot.lane.b32.xlu0 %v3026_v62, %s8642_s0  ;;  %v7563_v34 = vpop.f32.mrb[33].mxu0  ;;  %v3379_v62 = vld [vmem:[#allocation13 + $0x30] sm:$0xff]  ;;  %7950 = vmatpush3.bf16.msra.mxu0 %v7947_v9 }
 0xa77   :  { %v3380_v34 = vld [vmem:[#allocation13 + $0x38] sm:$0xff] }
 0xa79   :  { %v3192_v16 = vpop.f32.mrb[34].mxu0 }
 0xa7a   :  { %3221 = vrot.lane.b32.xlu1 %v3192_v16, %s8641_s28  ;;  %v7573_v1 = vpop.f32.mrb[35].mxu0  ;;  %v7951_v16 = vpack.c.bf16 %v3380_v34, %v3379_v62 }
 0xa7b   :  { %v3471_v1 = vld [vmem:[%s10314_s14] sm:$0xff] }
 0xa7c   :  { %7952 = vmatprep.subr.bf16.mxu0 %v7951_v16 }
 0xa7d   :  { %7954 = vmatpush3.bf16.msra.mxu0 %v7951_v16 }
 0xa9f   :  { %v1833_v37 = vpop.permute.xlu0 %1832 }
 0xaa0   :  { %v1859_v19 = vsel %vm508_vm3, %v9232_v11, %v1833_v37  ;;  %v3474_v37 = vld [vmem:[%s10314_s14 + $0x18] sm:$0xff] }
 0xaa3   :  { %v1837_v30 = vpop.permute.xlu1 %1836 }
 0xaa4   :  { %v1861_v40 = vsel %vm1860_vm4, %v1859_v19, %v1837_v30  ;;  %v3472_v30 = vld [vmem:[%s10314_s14 + $0x8] sm:$0xff]  ;;  %v3475_v19 = vld [vmem:[%s10314_s14 + $0x20] sm:$0xff] }
 0xaa7   :  { %v1841_v36 = vpop.permute.xlu1 %1840 }
 0xaa8   :  { %v1863_v48 = vsel %vm1862_vm5, %v1861_v40, %v1841_v36  ;;  %v3473_v36 = vld [vmem:[%s10314_s14 + $0x10] sm:$0xff]  ;;  %v3476_v40 = vld [vmem:[%s10314_s14 + $0x28] sm:$0xff] }
 0xaab   :  { %v1845_v35 = vpop.permute.xlu1 %1844 }
 0xaac   :  { %v1864_v45 = vsel %vm263_vm0, %v1863_v48, %v1845_v35  ;;  %v7955_v35 = vpack.c.bf16 %v3472_v30, %v3471_v1  ;;  %v3477_v48 = vld [vmem:[%s10314_s14 + $0x30] sm:$0xff] }
 0xaae   :  { %7956 = vmatprep.subr.bf16.mxu1 %v7955_v35 }
 0xaaf   :  { %v1849_v22 = vpop.permute.xlu1 %1848 }
 0xab0   :  { %v1866_v47 = vsel %vm1865_vm6, %v1864_v45, %v1849_v22  ;;  %v7959_v22 = vpack.c.bf16 %v3474_v37, %v3473_v36  ;;  %v3478_v45 = vld [vmem:[%s10314_s14 + $0x38] sm:$0xff] }
 0xab3   :  { %v1853_v41 = vpop.permute.xlu1 %1852 }
 0xab4   :  { %v1868_v31 = vsel %vm1867_vm7, %v1866_v47, %v1853_v41  ;;  %v7963_v41 = vpack.c.bf16 %v3476_v40, %v3475_v19  ;;  %v7967_v47 = vpack.c.bf16 %v3478_v45, %v3477_v48  ;;  %v7076_v19 = vld [vmem:[%s10348_s15 + $0x88] sm:$0xff]  ;;  %v7078_v40 = vld [vmem:[%s10348_s15 + $0x98] sm:$0xff]  ;;  %v7075_v48 = vld [vmem:[%s10348_s15 + $0x80] sm:$0xff] }
 0xab5   :  { %v7077_v45 = vld [vmem:[%s10348_s15 + $0x90] sm:$0xff] }
 0xab7   :  { %v1857_v52 = vpop.permute.xlu1 %1856 }
 0xab8   :  { %v1870_v63 = vsel %vm1869_vm8, %v1868_v31, %v1857_v52  ;;  %v3479_v31 = vld [vmem:[%s10314_s14 + $0x40] sm:$0xff]  ;;  %v3480_v52 = vld [vmem:[%s10314_s14 + $0x48] sm:$0xff] }
 0xab9   :  { %7590 = vmatprep.mubr.msk.f32.mxu1 %vm347_vm1, %v1870_v63  ;;  %v7971_v63 = vpack.c.bf16 %v3480_v52, %v3479_v31  ;;  %v7080_v31 = vld [vmem:[%s10348_s15 + $0xa8] sm:$0xff]  ;;  %v7082_v52 = vld [vmem:[%s10348_s15 + $0xb8] sm:$0xff] }
 0xad4   :  { %v3198_v11 = vpop.permute.xlu0 %3197 }
 0xad5   :  { %v3224_v3 = vsel %vm508_vm3, %v9476_v6, %v3198_v11  ;;  %v3481_v11 = vld [vmem:[%s10314_s14 + $0x50] sm:$0xff] }
 0xad8   :  { %v3202_v23 = vpop.permute.xlu0 %3201 }
 0xad9   :  { %v3225_v53 = vsel %vm1860_vm4, %v3224_v3, %v3202_v23  ;;  %v3482_v23 = vld [vmem:[%s10314_s14 + $0x58] sm:$0xff] }
 0xadc   :  { %v3206_v7 = vpop.permute.xlu0 %3205 }
 0xadd   :  { %v3226_v55 = vsel %vm1862_vm5, %v3225_v53, %v3206_v7  ;;  %v7975_v7 = vpack.c.bf16 %v3482_v23, %v3481_v11  ;;  %v7079_v11 = vld [vmem:[%s10348_s15 + $0xa0] sm:$0xff]  ;;  %v7081_v23 = vld [vmem:[%s10348_s15 + $0xb0] sm:$0xff] }
 0xae0   :  { %v3210_v50 = vpop.permute.xlu0 %3209 }
 0xae1   :  { %v3227_v58 = vsel %vm263_vm0, %v3226_v55, %v3210_v50  ;;  %v3483_v50 = vld [vmem:[%s10314_s14 + $0x60] sm:$0xff] }
 0xae4   :  { %v3214_v51 = vpop.permute.xlu0 %3213 }
 0xae5   :  { %v3228_v60 = vsel %vm1865_vm6, %v3227_v58, %v3214_v51  ;;  %v3484_v51 = vld [vmem:[%s10314_s14 + $0x68] sm:$0xff] }
 0xae6   :  { %v7979_v3 = vpack.c.bf16 %v3484_v51, %v3483_v50  ;;  %v7084_v50 = vld [vmem:[%s10348_s15 + $0xc8] sm:$0xff]  ;;  %v7086_v51 = vld [vmem:[%s10348_s15 + $0xd8] sm:$0xff] }
 0xae8   :  { %v3218_v17 = vpop.permute.xlu0 %3217 }
 0xae9   :  { %v3229_v49 = vsel %vm1867_vm7, %v3228_v60, %v3218_v17 }
 0xaec   :  { %v3222_v61 = vpop.permute.xlu1 %3221 }
 0xaed   :  { %v3230_v2 = vsel %vm1869_vm8, %v3229_v49, %v3222_v61 }
 0xaee   :  { %7591 = vmatmul.mubr.msk.f32.vlgmr.msra.gmra.mrb[34].mxu1 %vm347_vm1, %v3230_v2  ;;  %v7067_v2 = vld [vmem:[#allocation10] ss:$0 sm:$0xff] }
 0xaef   :  { %7958 = vmatpush3.bf16.msra.mxu1 %v7955_v35 }
 0xaf0   :  { %7960 = vmatprep.subr.bf16.mxu1 %v7959_v22 }
 0xaf3   :  { %7962 = vmatpush3.bf16.msra.mxu1 %v7959_v22 }
 0xaf4   :  { %7964 = vmatprep.subr.bf16.mxu1 %v7963_v41 }
 0xaf7   :  { %7966 = vmatpush3.bf16.msra.mxu1 %v7963_v41  ;;  %v7987_v41 = vpack.c.bf16 %v7078_v40, %v7076_v19 }
 0xaf8   :  { %7968 = vmatprep.subr.bf16.mxu1 %v7967_v47 }
 0xaf9   :  { %7988 = vmatprep.subr.bf16.mxu0 %v7987_v41 }
 0xafb   :  { %7970 = vmatpush3.bf16.msra.mxu1 %v7967_v47  ;;  %v7989_v47 = vpack.c.bf16 %v7077_v45, %v7075_v48 }
 0xafc   :  { %7972 = vmatprep.subr.bf16.mxu1 %v7971_v63 }
 0xaff   :  { %7974 = vmatpush3.bf16.msra.mxu1 %v7971_v63  ;;  %v7991_v63 = vpack.c.bf16 %v7082_v52, %v7080_v31 }
 0xb00   :  { %7976 = vmatprep.subr.bf16.mxu1 %v7975_v7 }
 0xb03   :  { %7978 = vmatpush3.bf16.msra.mxu1 %v7975_v7  ;;  %v7993_v7 = vpack.c.bf16 %v7081_v23, %v7079_v11 }
 0xb04   :  { %7980 = vmatprep.subr.bf16.mxu1 %v7979_v3 }
 0xb07   :  { %7982 = vmatpush3.bf16.msra.mxu1 %v7979_v3  ;;  %v7995_v3 = vpack.c.bf16 %v7086_v51, %v7084_v50 }
 0xbc1   :  { %v7592_v39 = vpop.f32.mrb[34].mxu1 }
 0xbc2   :  { %v3324_v6 = vadd.f32 %v7592_v39, %v7064_v4  ;;  %v3318_v8 = vpop.f32.mrb[35].mxu1  ;;  %v7068_v39 = vld [vmem:[#allocation11] ss:$0 sm:$0xff] }
 0xbc3   :  { %v3319_v12 = vadd.f32 %v7064_v4, %v3318_v8 }
 0xbc4   :  { %v3328_v13 = vadd.f32 %v3324_v6, %v9090_v21 }
 0xbc5   :  { %v3327_v14 = vadd.f32 %v3319_v12, %v9037_v54 }
 0xbc6   :  { %v3334_v15 = vsel %vm347_vm1, %v3328_v13, 0.0 }
 0xbc7   :  { %3335 = vadd.xlane.f32.xlu1 %v3334_v15  ;;  %v3331_v24 = vsel %vm347_vm1, %v3327_v14, 0.0 }
 0xbc8   :  { %3332 = vadd.xlane.f32.xlu0 %v3331_v24  ;;  %v3485_v24 = vld [vmem:[%s10314_s14 + $0x70] sm:$0xff] }
 0xc54   :  { %v3336_v18 = vpop.xlane.xlu1 %3335 }
 0xc55   :  { %v3338_v20 = vmul.f32 0.015625, %v3336_v18  ;;  %v3333_v44 = vpop.xlane.xlu0 %3332  ;;  %v3486_v18 = vld [vmem:[%s10314_s14 + $0x78] sm:$0xff] }
 0xc56   :  { %v3337_v33 = vmul.f32 0.015625, %v3333_v44  ;;  %v7069_v44 = vld [vmem:[#allocation14] ss:$0 sm:$0xff] }
 0xc57   :  { %v9534_v10 = vsub.f32 %v3328_v13, %v3338_v20  ;;  %v7983_v20 = vpack.c.bf16 %v3486_v18, %v3485_v24  ;;  %v7073_v24 = vld [vmem:[#allocation17] ss:$0 sm:$0xff] }
 0xc58   :  { %v9536_v25 = vsub.f32 %v3327_v14, %v3337_v33 }
 0xc59   :  { %v3342_v54 = vmul.f32 %v9534_v10, %v9534_v10  ;;  %7984 = vmatprep.subr.bf16.mxu1 %v7983_v20 }
 0xc5a   :  { %v3341_v38 = vmul.f32 %v9536_v25, %v9536_v25  ;;  %7986 = vmatpush3.bf16.msra.mxu1 %v7983_v20  ;;  %v7074_v20 = vld [vmem:[#allocation19] ss:$0 sm:$0xff] }
 0xc5b   :  { %v3346_v27 = vsel %vm347_vm1, %v3342_v54, 0.0  ;;  %7662 = vmatprep.subr.mxu1 %v8635_v43 }
 0xc5c   :  { %v3343_v21 = vsel %vm347_vm1, %v3341_v38, 0.0 }
 0xc5d   :  { %3344 = vadd.xlane.f32.xlu0 %v3343_v21 }
 0xc61   :  { %3347 = vadd.xlane.f32.xlu0 %v3346_v27  ;;  %v7072_v27 = vld [vmem:[#allocation16] ss:$0 sm:$0xff] }
 0xcea   :  { %v3345_v53 = vpop.xlane.xlu0 %3344 }
 0xceb   :  { %v3349_v55 = vmul.f32 0.015625, %v3345_v53  ;;  %v7083_v53 = vld [vmem:[%s10348_s15 + $0xc0] sm:$0xff] }
 0xced   :  { %v3351_v17 = vadd.f32 1e-05, %v3349_v55  ;;  %v7085_v55 = vld [vmem:[%s10348_s15 + $0xd0] sm:$0xff] }
 0xcee   :  { %v3348_v58 = vpop.xlane.xlu0 %3347 }
 0xcef   :  { %8185 = vrsqrt.f32 %v3351_v17  ;;  %v3350_v60 = vmul.f32 0.015625, %v3348_v58  ;;  %v7997_v17 = vpack.c.bf16 %v7085_v55, %v7083_v53  ;;  %v7088_v58 = vld [vmem:[%s10348_s15 + $0xe8] sm:$0xff] }
 0xcf1   :  { %v3352_v49 = vadd.f32 1e-05, %v3350_v60  ;;  %v7090_v60 = vld [vmem:[%s10348_s15 + $0xf8] sm:$0xff] }
 0xcf3   :  { %8187 = vrsqrt.f32 %v3352_v49  ;;  %v7087_v49 = vld [vmem:[%s10348_s15 + $0xe0] sm:$0xff] }
 0xcf9   :  { %v8186_v61 = vpop.eup %8185 }
 0xcfa   :  { %v3355_v4 = vmul.f32 %v8186_v61, %v9536_v25  ;;  %v7999_v61 = vpack.c.bf16 %v7090_v60, %v7088_v58 }
 0xcfc   :  { %v3363_v6 = vmul.f32 %v7067_v2, %v3355_v4 }
 0xcfd   :  { %v8188_v8 = vpop.eup %8187 }
 0xcfe   :  { %v3356_v12 = vmul.f32 %v8188_v8, %v9534_v10  ;;  %v3371_v13 = vadd.f32 %v7068_v39, %v3363_v6 }
 0xd00   :  { %v3364_v14 = vmul.f32 %v7067_v2, %v3356_v12  ;;  %7609 = vmatprep.mubr.msk.f32.mxu0 %vm347_vm1, %v3371_v13  ;;  %v7089_v2 = vld [vmem:[%s10348_s15 + $0xf0] sm:$0xff] }
 0xd01   :  { %v8001_v4 = vpack.c.bf16 %v7089_v2, %v7087_v49 }
 0xd02   :  { %v3372_v15 = vadd.f32 %v7068_v39, %v3364_v14 }
 0xd04   :  { %7610 = vmatmul.mubr.msk.f32.vlgmr.msra.gmra.mrb[36].mxu0 %vm347_vm1, %v3372_v15 }
 0xd05   :  { %3715 = vmatprep.mubr.f32.mxu0 %v8635_v43  ;;  %7990 = vmatpush1.bf16.msra.mxu0 %v7989_v47 }
 0xd06   :  { %7992 = vmatprep.subr.bf16.mxu0 %v7991_v63 }
 0xd09   :  { %7994 = vmatpush1.bf16.msra.mxu0 %v7993_v7 }
 0xd0a   :  { %7996 = vmatprep.subr.bf16.mxu0 %v7995_v3 }
 0xd0d   :  { %7998 = vmatpush1.bf16.msra.mxu0 %v7997_v17 }
 0xd0e   :  { %8000 = vmatprep.subr.bf16.mxu0 %v7999_v61 }
 0xd11   :  { %8002 = vmatpush1.bf16.msra.mxu0 %v8001_v4 }
 0xd12   :  { %7647 = vmatprep.subr.mxu0 %v8635_v43 }
 0xdd7   :  { %v7611_v33 = vpop.f32.mrb[36].mxu0 }
 0xdd8   :  { %v3466_v10 = vadd.f32 %v7611_v33, %v7069_v44  ;;  %v3460_v25 = vpop.f32.mrb[37].mxu0 }
 0xdd9   :  { %v3461_v38 = vadd.f32 %v7069_v44, %v3460_v25 }
 0xdda   :  { %v3470_v54 = vmax.f32 %v3466_v10, 0.0 }
 0xddb   :  { %v3469_v21 = vmax.f32 %v3461_v38, 0.0 }
 0xddd   :  { %7644 = vmatprep.mubr.f32.mxu1 %v3469_v21 }
 0xdde   :  { %7645 = vmatmul.mubr.f32.vlgmr.msra.gmra.mrb[36].mxu1 %v3470_v54  ;;  %v7091_v54 = vld [vmem:[%s10307_s7 + $0x2] sm:$0x3]  ;;  %s10349_s7 = smov 8  }
 0xddf   :  { %7664 = vmatprep.mubr.msk.f32.mxu1 %vm8636_vm2, %v8635_v43 }
 0xeb1   :  { %v7646_v28 = vpop.f32.mrb[36].mxu1 }
 0xeb2   :  { %v3560_v26 = vpop.f32.mrb[37].mxu1  ;;  %v3566_v59 = vadd.f32 %v7646_v28, %v7072_v27 }
 0xeb3   :  { %v3561_v42 = vadd.f32 %v7072_v27, %v3560_v26  ;;  %v3638_v27 = vrot.slane %v7091_v54, %v414_v57 }
 0xeb4   :  { %v3570_v29 = vadd.f32 %v3566_v59, %v3372_v15 }
 0xeb5   :  { %v3569_v46 = vadd.f32 %v3561_v42, %v3371_v13  ;;  %v3642_v42 = vrot.slane %v7091_v54, %v418_v0 }
 0xeb6   :  { %v3576_v32 = vsel %vm347_vm1, %v3570_v29, 0.0 }
 0xeb7   :  { %v3573_v5 = vsel %vm347_vm1, %v3569_v46, 0.0 }
 0xeb8   :  { %3574 = vadd.xlane.f32.xlu0 %v3573_v5 }
 0xebc   :  { %3577 = vadd.xlane.f32.xlu0 %v3576_v32 }
 0xf45   :  { %v3575_v9 = vpop.xlane.xlu0 %3574 }
 0xf46   :  { %v3579_v62 = vmul.f32 0.015625, %v3575_v9 }
 0xf48   :  { %v3581_v34 = vsub.f32 %v3569_v46, %v3579_v62 }
 0xf49   :  { %v3578_v16 = vpop.xlane.xlu0 %3577 }
 0xf4a   :  { %v3580_v1 = vmul.f32 0.015625, %v3578_v16  ;;  %v3583_v30 = vmul.f32 %v3581_v34, %v3581_v34 }
 0xf4c   :  { %v3582_v36 = vsub.f32 %v3570_v29, %v3580_v1  ;;  %v3585_v35 = vsel %vm347_vm1, %v3583_v30, 0.0 }
 0xf4d   :  { %3586 = vadd.xlane.f32.xlu1 %v3585_v35 }
 0xf4e   :  { %v3584_v37 = vmul.f32 %v3582_v36, %v3582_v36 }
 0xf50   :  { %v3588_v22 = vsel %vm347_vm1, %v3584_v37, 0.0 }
 0xf51   :  { %3589 = vadd.xlane.f32.xlu1 %v3588_v22 }
 0xfda   :  { %v3587_v39 = vpop.xlane.xlu1 %3586 }
 0xfdb   :  { %v3591_v6 = vmul.f32 0.015625, %v3587_v39 }
 0xfdd   :  { %v3593_v8 = vadd.f32 1e-05, %v3591_v6 }
 0xfde   :  { %v3590_v12 = vpop.xlane.xlu1 %3589 }
 0xfdf   :  { %8189 = vrsqrt.f32 %v3593_v8  ;;  %v3592_v13 = vmul.f32 0.015625, %v3590_v12 }
 0xfe1   :  { %v3594_v14 = vadd.f32 1e-05, %v3592_v13 }
 0xfe3   :  { %8191 = vrsqrt.f32 %v3594_v14 }
 0xfe9   :  { %v8190_v15 = vpop.eup %8189 }
 0xfea   :  { %v3597_v18 = vmul.f32 %v8190_v15, %v3581_v34 }
 0xfec   :  { %v3605_v44 = vmul.f32 %v7073_v24, %v3597_v18 }
 0xfed   :  { %v8192_v33 = vpop.eup %8191 }
 0xfee   :  { %v9653_v10 = vadd.f32 %v7074_v20, %v3605_v44  ;;  %v3598_v25 = vmul.f32 %v8192_v33, %v3582_v36 }
 0xff0   :  { %7092 = vmatmul.mubr.msk.f32.vlgmr.msra.gmra.mrb[38].mxu0 %vm347_vm1, %v9653_v10  ;;  %v3606_v38 = vmul.f32 %v7073_v24, %v3598_v25 }
 0xff1   :  { %3721 = vmatprep.mubr.f32.mxu0 %v8635_v43 }
 0xff2   :  { %v9658_v21 = vadd.f32 %v7074_v20, %v3606_v38 }
 0xff4   :  { %7093 = vmatmul.mubr.msk.f32.gmra.mrb[40].mxu0 %vm347_vm1, %v9658_v21 }
 0xff5   :  { %7649 = vmatprep.mubr.msk.f32.mxu0 %vm8636_vm2, %v8635_v43 }
0x10c3   :  { %v3717_v28 = vpop.f32.mrb[38].mxu0 }
0x10c4   :  { %v9669_v26 = vadd.f32 %v3717_v28, %v3638_v27  ;;  %v3719_v59 = vpop.f32.mrb[39].mxu0 }
0x10c5   :  { %v3720_v57 = vadd.f32 %v3719_v59, %v3642_v42 }
0x10c6   :  { %3729 = vrot.lane.b32.xlu0 %v9669_v26, %s8637_s29 }
0x10c7   :  { %v3723_v46 = vpop.f32.mrb[40].mxu0 }
0x10c8   :  { %v3725_v29 = vpop.f32.mrb[41].mxu0  ;;  %v9691_v56 = vadd.f32 %v3723_v46, %v3638_v27 }
0x10c9   :  { %v9675_v5 = vadd.f32 %v3725_v29, %v3642_v42 }
0x10ca   :  { %3890 = vrot.lane.b32.xlu0 %v9669_v26, %s8638_s24 }
0x10ce   :  { %4057 = vrot.lane.b32.xlu0 %v9669_v26, %s8643_s1 }
0x10d2   :  { %4223 = vrot.lane.b32.xlu0 %v9669_v26, %s8645_s6 }
0x10d6   :  { %4389 = vrot.lane.b32.xlu0 %v9669_v26, %s8646_s16 }
0x10da   :  { %4555 = vrot.lane.b32.xlu0 %v9669_v26, %s8647_s25 }
0x10de   :  { %4721 = vrot.lane.b32.xlu0 %v9669_v26, %s8648_s26 }
0x10e2   :  { %4887 = vrot.lane.b32.xlu0 %v9669_v26, %s8649_s4 }
0x10e6   :  { %5252 = vrot.lane.b32.xlu0 %v9691_v56, %s8641_s28 }
0x10ea   :  { %5419 = vrot.lane.b32.xlu0 %v9691_v56, %s8642_s0 }
0x10ee   :  { %5585 = vrot.lane.b32.xlu0 %v9691_v56, %s8644_s13 }
0x10f2   :  { %5751 = vrot.lane.b32.xlu0 %v9691_v56, %s8639_s2 }
0x10f6   :  { %5917 = vrot.lane.b32.xlu0 %v9691_v56, %s8640_s17 }
0x10fa   :  { %6083 = vrot.lane.b32.xlu0 %v9691_v56, %s10345_s23 }
0x10fe   :  { %6249 = vrot.lane.b32.xlu0 %v9691_v56, %s10349_s7 }
0x1102   :  { %3981 = vrot.lane.b32.xlu0 %v3720_v57, %s8638_s24 }
0x1106   :  { %4313 = vrot.lane.b32.xlu0 %v3720_v57, %s8645_s6 }
0x110a   :  { %4479 = vrot.lane.b32.xlu0 %v3720_v57, %s8646_s16 }
0x110e   :  { %4811 = vrot.lane.b32.xlu0 %v3720_v57, %s8648_s26 }
0x1112   :  { %4977 = vrot.lane.b32.xlu0 %v3720_v57, %s8649_s4 }
0x1138   :  { %v3730_v0 = vpop.permute.xlu0 %3729 }
0x1139   :  { %7648 = vmatpush3.xpose.msk.msra.mxu0 %vm508_vm3, %v3730_v0 }
0x113a   :  { %7652 = vmatprep.subr.mxu0 %v8635_v43 }
0x113c   :  { %7650 = vmatmul.mubr.msk.f32.vlgmr.msra.gmra.mrb[42].mxu0 %vm508_vm3, %v9669_v26  ;;  %v9716_v32 = vpop.permute.xlu0 %3890 }
0x113d   :  { %7653 = vmatpush3.msra.mxu0 %v3720_v57  ;;  %7654 = vmatprep.mubr.msk.f32.mxu0 %vm8636_vm2, %v8635_v43 }
0x113e   :  { %7657 = vmatprep.subr.mxu0 %v8635_v43 }
0x1140   :  { %v9721_v9 = vpop.permute.xlu0 %4057 }
0x1144   :  { %v9723_v62 = vpop.permute.xlu0 %4223 }
0x1148   :  { %v9725_v34 = vpop.permute.xlu0 %4389 }
0x114c   :  { %v9727_v16 = vpop.permute.xlu0 %4555 }
0x1150   :  { %v9729_v1 = vpop.permute.xlu0 %4721 }
0x1154   :  { %v9731_v30 = vpop.permute.xlu0 %4887 }
0x1158   :  { %v9733_v36 = vpop.permute.xlu0 %5252 }
0x115c   :  { %v9735_v35 = vpop.permute.xlu0 %5419 }
0x1160   :  { %v9737_v37 = vpop.permute.xlu0 %5585 }
0x1164   :  { %v9739_v22 = vpop.permute.xlu0 %5751 }
0x1168   :  { %v9741_v19 = vpop.permute.xlu0 %5917 }
0x116c   :  { %v9743_v40 = vpop.permute.xlu0 %6083 }
0x1170   :  { %v9745_v41 = vpop.permute.xlu0 %6249 }
0x1174   :  { %v3982_v48 = vpop.permute.xlu0 %3981 }
0x1175   :  { %7663 = vmatpush3.msra.mxu1 %v3982_v48 }
0x1176   :  { %7672 = vmatprep.subr.mxu1 %v8635_v43 }
0x120f   :  { %v3801_v45 = vpop.f32.mrb[42].mxu0 }
0x1210   :  { %v3805_v47 = vmul.f32 0.35355338, %v3801_v45  ;;  %v7651_v31 = vpop.f32.mrb[43].mxu0 }
0x1212   :  { %v3806_v52 = vsel %vm508_vm3, %v3805_v47, -inf }
0x1213   :  { %3807 = vmax.xlane.f32.xlu1 %v3806_v52 }
0x1224   :  { %3892 = vrot.lane.b32.xlu1 %v9669_v26, %s8641_s28 }
0x1228   :  { %4059 = vrot.lane.b32.xlu1 %v9669_v26, %s8642_s0 }
0x12a0   :  { %v3808_v63 = vpop.xlane.xlu1 %3807 }
0x12a1   :  { %v3809_v11 = vsub.f32 %v3805_v47, %v3808_v63 }
0x12a3   :  { %v3810_v23 = vmul.f32 1.442695, %v3809_v11 }
0x12a4   :  { %v3893_v51 = vpop.permute.xlu1 %3892 }
0x12a5   :  { %8193 = vpow2.f32 %v3810_v23 }
0x12a8   :  { %v4060_v3 = vpop.permute.xlu1 %4059 }
0x12af   :  { %v8194_v7 = vpop.eup %8193 }
0x12b0   :  { %v3812_v50 = vsel %vm508_vm3, %v8194_v7, 0.0 }
0x12b1   :  { %3813 = vadd.xlane.f32.xlu1 %v3812_v50 }
0x12c2   :  { %4225 = vrot.lane.b32.xlu1 %v9669_v26, %s8644_s13 }
0x12c6   :  { %4391 = vrot.lane.b32.xlu1 %v9669_v26, %s8639_s2 }
0x12ca   :  { %4557 = vrot.lane.b32.xlu1 %v9669_v26, %s8640_s17 }
0x12ce   :  { %4723 = vrot.lane.b32.xlu1 %v9669_v26, %s10345_s23 }
0x12d2   :  { %4889 = vrot.lane.b32.xlu1 %v9669_v26, %s10349_s7 }
0x12d6   :  { %5089 = vrot.lane.b32.xlu1 %v9691_v56, %s8637_s29 }
0x12da   :  { %5250 = vrot.lane.b32.xlu1 %v9691_v56, %s8638_s24 }
0x12de   :  { %5417 = vrot.lane.b32.xlu1 %v9691_v56, %s8643_s1 }
0x12e2   :  { %5583 = vrot.lane.b32.xlu1 %v9691_v56, %s8645_s6 }
0x12e6   :  { %5749 = vrot.lane.b32.xlu1 %v9691_v56, %s8646_s16 }
0x12ea   :  { %5915 = vrot.lane.b32.xlu1 %v9691_v56, %s8647_s25 }
0x12ee   :  { %6081 = vrot.lane.b32.xlu1 %v9691_v56, %s8648_s26 }
0x12f2   :  { %6247 = vrot.lane.b32.xlu1 %v9691_v56, %s8649_s4 }
0x12f6   :  { %4147 = vrot.lane.b32.xlu1 %v3720_v57, %s8643_s1 }
0x12fa   :  { %4645 = vrot.lane.b32.xlu1 %v3720_v57, %s8647_s25 }
0x12fe   :  { %5341 = vrot.lane.b32.xlu1 %v9675_v5, %s8638_s24 }
0x133e   :  { %v3814_v53 = vpop.xlane.xlu1 %3813 }
0x133f   :  { %8195 = vrcp.f32 %v3814_v53 }
0x1342   :  { %v4226_v55 = vpop.permute.xlu1 %4225 }
0x1346   :  { %v4392_v17 = vpop.permute.xlu1 %4391 }
0x1349   :  { %v8196_v58 = vpop.eup %8195 }
0x134a   :  { %v3816_v60 = vmul.f32 %v8196_v58, %v8194_v7  ;;  %v4558_v49 = vpop.permute.xlu1 %4557 }
0x134c   :  { %7655 = vmatmul.mubr.msk.f32.vlgmr.msra.gmra.mrb[44].mxu0 %vm508_vm3, %v3816_v60 }
0x134d   :  { %7658 = vmatpush3.xpose.msk.msra.mxu0 %vm508_vm3, %v3893_v51  ;;  %7659 = vmatprep.mubr.msk.f32.mxu0 %vm8636_vm2, %v8635_v43 }
0x134e   :  { %7667 = vmatprep.subr.mxu0 %v8635_v43  ;;  %v4724_v61 = vpop.permute.xlu1 %4723 }
0x1350   :  { %7660 = vmatmul.mubr.msk.f32.vlgmr.msra.gmra.mrb[46].mxu0 %vm508_vm3, %v9716_v32 }
0x1351   :  { %7668 = vmatpush3.xpose.msk.msra.mxu0 %vm508_vm3, %v4060_v3  ;;  %7669 = vmatprep.mubr.msk.f32.mxu0 %vm8636_vm2, %v8635_v43 }
0x1352   :  { %7677 = vmatprep.subr.mxu0 %v8635_v43  ;;  %v4890_v2 = vpop.permute.xlu1 %4889 }
0x1354   :  { %7670 = vmatmul.mubr.msk.f32.vlgmr.msra.gmra.mrb[48].mxu0 %vm508_vm3, %v9721_v9 }
0x1355   :  { %7678 = vmatpush3.xpose.msk.msra.mxu0 %vm508_vm3, %v4226_v55  ;;  %7679 = vmatprep.mubr.msk.f32.mxu0 %vm8636_vm2, %v8635_v43 }
0x1356   :  { %7687 = vmatprep.subr.mxu0 %v8635_v43  ;;  %v5090_v4 = vpop.permute.xlu1 %5089 }
0x1358   :  { %7680 = vmatmul.mubr.msk.f32.vlgmr.msra.gmra.mrb[50].mxu0 %vm508_vm3, %v9723_v62 }
0x1359   :  { %7688 = vmatpush3.xpose.msk.msra.mxu0 %vm508_vm3, %v4392_v17  ;;  %7689 = vmatprep.mubr.msk.f32.mxu0 %vm8636_vm2, %v8635_v43 }
0x135a   :  { %7697 = vmatprep.subr.mxu0 %v8635_v43  ;;  %v5251_v39 = vpop.permute.xlu1 %5250 }
0x135c   :  { %7690 = vmatmul.mubr.msk.f32.vlgmr.msra.gmra.mrb[52].mxu0 %vm508_vm3, %v9725_v34 }
0x135d   :  { %7698 = vmatpush3.xpose.msk.msra.mxu0 %vm508_vm3, %v4558_v49  ;;  %7699 = vmatprep.mubr.msk.f32.mxu0 %vm8636_vm2, %v8635_v43 }
0x135e   :  { %7707 = vmatprep.subr.mxu0 %v8635_v43  ;;  %v5418_v6 = vpop.permute.xlu1 %5417 }
0x1360   :  { %7700 = vmatmul.mubr.msk.f32.vlgmr.msra.gmra.mrb[54].mxu0 %vm508_vm3, %v9727_v16 }
0x1361   :  { %7708 = vmatpush3.xpose.msk.msra.mxu0 %vm508_vm3, %v4724_v61  ;;  %7709 = vmatprep.mubr.msk.f32.mxu0 %vm8636_vm2, %v8635_v43 }
0x1362   :  { %7717 = vmatprep.subr.mxu0 %v8635_v43  ;;  %v5584_v8 = vpop.permute.xlu1 %5583 }
0x1364   :  { %7710 = vmatmul.mubr.msk.f32.vlgmr.msra.gmra.mrb[56].mxu0 %vm508_vm3, %v9729_v1 }
0x1365   :  { %7718 = vmatpush3.xpose.msk.msra.mxu0 %vm508_vm3, %v4890_v2  ;;  %7719 = vmatprep.mubr.msk.f32.mxu0 %vm8636_vm2, %v8635_v43 }
0x1366   :  { %7727 = vmatprep.subr.mxu0 %v8635_v43  ;;  %v5750_v12 = vpop.permute.xlu1 %5749 }
0x1368   :  { %7720 = vmatmul.mubr.msk.f32.vlgmr.msra.gmra.mrb[58].mxu0 %vm508_vm3, %v9731_v30 }
0x1369   :  { %7728 = vmatpush3.xpose.msk.msra.mxu0 %vm508_vm3, %v5090_v4  ;;  %7729 = vmatprep.mubr.msk.f32.mxu0 %vm8636_vm2, %v8635_v43 }
0x136a   :  { %7737 = vmatprep.subr.mxu0 %v8635_v43  ;;  %v5916_v13 = vpop.permute.xlu1 %5915 }
0x136c   :  { %7730 = vmatmul.mubr.msk.f32.vlgmr.msra.gmra.mrb[60].mxu0 %vm508_vm3, %v9691_v56 }
0x136d   :  { %7738 = vmatpush3.xpose.msk.msra.mxu0 %vm508_vm3, %v9733_v36  ;;  %7739 = vmatprep.mubr.msk.f32.mxu0 %vm8636_vm2, %v8635_v43 }
0x136e   :  { %7747 = vmatprep.subr.mxu0 %v8635_v43  ;;  %v6082_v14 = vpop.permute.xlu1 %6081 }
0x1370   :  { %7740 = vmatmul.mubr.msk.f32.vlgmr.msra.gmra.mrb[62].mxu0 %vm508_vm3, %v5251_v39 }
0x1371   :  { %7748 = vmatpush3.xpose.msk.msra.mxu0 %vm508_vm3, %v9735_v35  ;;  %7749 = vmatprep.mubr.msk.f32.mxu0 %vm8636_vm2, %v8635_v43 }
0x1372   :  { %7757 = vmatprep.subr.mxu0 %v8635_v43  ;;  %v6248_v15 = vpop.permute.xlu1 %6247 }
0x1374   :  { %7750 = vmatmul.mubr.msk.f32.vlgmr.msra.gmra.mrb[64].mxu0 %vm508_vm3, %v5418_v6 }
0x1375   :  { %7758 = vmatpush3.xpose.msk.msra.mxu0 %vm508_vm3, %v9737_v37  ;;  %7759 = vmatprep.mubr.msk.f32.mxu0 %vm8636_vm2, %v8635_v43 }
0x1376   :  { %7767 = vmatprep.subr.mxu0 %v8635_v43 }
0x1378   :  { %7760 = vmatmul.mubr.msk.f32.vlgmr.msra.gmra.mrb[66].mxu0 %vm508_vm3, %v5584_v8 }
0x1379   :  { %7768 = vmatpush3.xpose.msk.msra.mxu0 %vm508_vm3, %v9739_v22  ;;  %7769 = vmatprep.mubr.msk.f32.mxu0 %vm8636_vm2, %v8635_v43 }
0x137a   :  { %7777 = vmatprep.subr.mxu0 %v8635_v43 }
0x137c   :  { %7770 = vmatmul.mubr.msk.f32.vlgmr.msra.gmra.mrb[68].mxu0 %vm508_vm3, %v5750_v12 }
0x137d   :  { %7778 = vmatpush3.xpose.msk.msra.mxu0 %vm508_vm3, %v9741_v19  ;;  %7779 = vmatprep.mubr.msk.f32.mxu0 %vm8636_vm2, %v8635_v43 }
0x137e   :  { %7787 = vmatprep.subr.mxu0 %v8635_v43 }
0x1380   :  { %7780 = vmatmul.mubr.msk.f32.vlgmr.msra.gmra.mrb[70].mxu0 %vm508_vm3, %v5916_v13 }
0x1381   :  { %7788 = vmatpush3.xpose.msk.msra.mxu0 %vm508_vm3, %v9743_v40  ;;  %7789 = vmatprep.mubr.msk.f32.mxu0 %vm8636_vm2, %v8635_v43 }
0x1382   :  { %7797 = vmatprep.subr.mxu0 %v8635_v43 }
0x1384   :  { %7790 = vmatmul.mubr.msk.f32.vlgmr.msra.gmra.mrb[72].mxu0 %vm508_vm3, %v6082_v14 }
0x1385   :  { %7798 = vmatpush3.xpose.msk.msra.mxu0 %vm508_vm3, %v9745_v41  ;;  %7799 = vmatprep.mubr.msk.f32.mxu0 %vm8636_vm2, %v8635_v43 }
0x1388   :  { %7800 = vmatmul.mubr.msk.f32.vlgmr.msra.gmra.mrb[74].mxu0 %vm508_vm3, %v6248_v15 }
0x141f   :  { %v9874_v24 = vpop.f32.mrb[44].mxu0 }
0x1420   :  { %v7656_v18 = vpop.f32.mrb[45].mxu0 }
0x1423   :  { %v3964_v20 = vpop.f32.mrb[46].mxu0 }
0x1424   :  { %v9876_v44 = vmul.f32 0.35355338, %v3964_v20  ;;  %v7661_v33 = vpop.f32.mrb[47].mxu0 }
0x1425   :  { %v9940_v33 = vpop.permute.xlu0 %4313 }
0x1426   :  { %v3969_v25 = vsel %vm508_vm3, %v9876_v44, -inf }
0x1427   :  { %3970 = vmax.xlane.f32.xlu0 %v3969_v25  ;;  %v4131_v38 = vpop.f32.mrb[48].mxu0 }
0x1428   :  { %v9880_v54 = vmul.f32 0.35355338, %v4131_v38  ;;  %v7671_v27 = vpop.f32.mrb[49].mxu0  ;;  %v9944_v38 = vpop.permute.xlu1 %4147 }
0x1429   :  { %v9942_v25 = vpop.permute.xlu0 %4479 }
0x142a   :  { %v4136_v28 = vsel %vm508_vm3, %v9880_v54, -inf }
0x142b   :  { %4137 = vmax.xlane.f32.xlu1 %v4136_v28  ;;  %v4297_v26 = vpop.f32.mrb[50].mxu0 }
0x142c   :  { %v9884_v59 = vmul.f32 0.35355338, %v4297_v26  ;;  %v7681_v42 = vpop.f32.mrb[51].mxu0  ;;  %v9948_v28 = vpop.permute.xlu1 %4645 }
0x142d   :  { %v9946_v27 = vpop.permute.xlu0 %4811 }
0x142e   :  { %v4302_v46 = vsel %vm508_vm3, %v9884_v59, -inf }
0x142f   :  { %4303 = vmax.xlane.f32.xlu0 %v4302_v46  ;;  %v4463_v29 = vpop.f32.mrb[52].mxu0 }
0x1430   :  { %v9888_v56 = vmul.f32 0.35355338, %v4463_v29  ;;  %v7691_v57 = vpop.f32.mrb[53].mxu0  ;;  %v9952_v42 = vpop.permute.xlu1 %5341 }
0x1431   :  { %v9950_v26 = vpop.permute.xlu0 %4977 }
0x1432   :  { %v4468_v0 = vsel %vm508_vm3, %v9888_v56, -inf }
0x1433   :  { %4469 = vmax.xlane.f32.xlu0 %v4468_v0  ;;  %v4629_v32 = vpop.f32.mrb[54].mxu0 }
0x1434   :  { %v9892_v9 = vmul.f32 0.35355338, %v4629_v32  ;;  %v7701_v62 = vpop.f32.mrb[55].mxu0 }
0x1436   :  { %v4634_v34 = vsel %vm508_vm3, %v9892_v9, -inf }
0x1437   :  { %4635 = vmax.xlane.f32.xlu0 %v4634_v34  ;;  %v4795_v16 = vpop.f32.mrb[56].mxu0 }
0x1438   :  { %v9896_v1 = vmul.f32 0.35355338, %v4795_v16  ;;  %v7711_v30 = vpop.f32.mrb[57].mxu0 }
0x143a   :  { %v4800_v36 = vsel %vm508_vm3, %v9896_v1, -inf }
0x143b   :  { %4801 = vmax.xlane.f32.xlu1 %v4800_v36  ;;  %v4961_v35 = vpop.f32.mrb[58].mxu0 }
0x143c   :  { %v9900_v37 = vmul.f32 0.35355338, %v4961_v35  ;;  %v7721_v22 = vpop.f32.mrb[59].mxu0 }
0x143e   :  { %v4966_v19 = vsel %vm508_vm3, %v9900_v37, -inf }
0x143f   :  { %4967 = vmax.xlane.f32.xlu0 %v4966_v19  ;;  %v5161_v40 = vpop.f32.mrb[60].mxu0 }
0x1440   :  { %v9904_v41 = vmul.f32 0.35355338, %v5161_v40  ;;  %v7731_v48 = vpop.f32.mrb[61].mxu0 }
0x1442   :  { %v5166_v45 = vsel %vm508_vm3, %v9904_v41, -inf }
0x1443   :  { %5167 = vmax.xlane.f32.xlu1 %v5166_v45  ;;  %v5324_v47 = vpop.f32.mrb[62].mxu0 }
0x1444   :  { %v9908_v31 = vmul.f32 0.35355338, %v5324_v47  ;;  %v7741_v52 = vpop.f32.mrb[63].mxu0 }
0x1446   :  { %v5329_v63 = vsel %vm508_vm3, %v9908_v31, -inf }
0x1447   :  { %5330 = vmax.xlane.f32.xlu0 %v5329_v63  ;;  %v5491_v11 = vpop.f32.mrb[64].mxu0 }
0x1448   :  { %v9912_v23 = vmul.f32 0.35355338, %v5491_v11  ;;  %v7751_v7 = vpop.f32.mrb[65].mxu0 }
0x144a   :  { %v5496_v50 = vsel %vm508_vm3, %v9912_v23, -inf }
0x144b   :  { %5497 = vmax.xlane.f32.xlu1 %v5496_v50  ;;  %v5657_v51 = vpop.f32.mrb[66].mxu0 }
0x144c   :  { %v9916_v3 = vmul.f32 0.35355338, %v5657_v51  ;;  %v7761_v53 = vpop.f32.mrb[67].mxu0 }
0x144e   :  { %v5662_v55 = vsel %vm508_vm3, %v9916_v3, -inf }
0x144f   :  { %5663 = vmax.xlane.f32.xlu0 %v5662_v55  ;;  %v5823_v17 = vpop.f32.mrb[68].mxu0 }
0x1450   :  { %v9920_v58 = vmul.f32 0.35355338, %v5823_v17  ;;  %v7771_v60 = vpop.f32.mrb[69].mxu0 }
0x1452   :  { %v5828_v49 = vsel %vm508_vm3, %v9920_v58, -inf }
0x1453   :  { %5829 = vmax.xlane.f32.xlu1 %v5828_v49  ;;  %v5989_v61 = vpop.f32.mrb[70].mxu0 }
0x1454   :  { %v9924_v2 = vmul.f32 0.35355338, %v5989_v61  ;;  %v7781_v4 = vpop.f32.mrb[71].mxu0 }
0x1456   :  { %v5994_v39 = vsel %vm508_vm3, %v9924_v2, -inf }
0x1457   :  { %5995 = vmax.xlane.f32.xlu0 %v5994_v39  ;;  %v6155_v6 = vpop.f32.mrb[72].mxu0 }
0x1458   :  { %v9928_v8 = vmul.f32 0.35355338, %v6155_v6  ;;  %v7791_v12 = vpop.f32.mrb[73].mxu0 }
0x145a   :  { %v6160_v13 = vsel %vm508_vm3, %v9928_v8, -inf }
0x145b   :  { %6161 = vmax.xlane.f32.xlu1 %v6160_v13  ;;  %v6321_v14 = vpop.f32.mrb[74].mxu0 }
0x145c   :  { %v9932_v15 = vmul.f32 0.35355338, %v6321_v14  ;;  %v7801_v18 = vpop.f32.mrb[75].mxu0 }
0x145e   :  { %v6326_v20 = vsel %vm508_vm3, %v9932_v15, -inf }
0x145f   :  { %6327 = vmax.xlane.f32.xlu0 %v6326_v20 }
0x146c   :  { %5673 = vrot.lane.b32.xlu1 %v9675_v5, %s8645_s6 }
0x1475   :  { %5507 = vrot.lane.b32.xlu0 %v9675_v5, %s8643_s1 }
0x14b4   :  { %v3971_v46 = vpop.xlane.xlu0 %3970 }
0x14b5   :  { %v3972_v29 = vsub.f32 %v9876_v44, %v3971_v46 }
0x14b7   :  { %v3973_v57 = vmul.f32 1.442695, %v3972_v29 }
0x14b8   :  { %v4138_v0 = vpop.xlane.xlu1 %4137 }
0x14b9   :  { %8197 = vpow2.f32 %v3973_v57  ;;  %v4139_v32 = vsub.f32 %v9880_v54, %v4138_v0 }
0x14bb   :  { %v4140_v62 = vmul.f32 1.442695, %v4139_v32 }
0x14bc   :  { %v4304_v34 = vpop.xlane.xlu0 %4303 }
0x14bd   :  { %8199 = vpow2.f32 %v4140_v62  ;;  %v4305_v16 = vsub.f32 %v9884_v59, %v4304_v34 }
0x14bf   :  { %v4306_v30 = vmul.f32 1.442695, %v4305_v16 }
0x14c0   :  { %v4470_v36 = vpop.xlane.xlu0 %4469 }
0x14c1   :  { %8201 = vpow2.f32 %v4306_v30  ;;  %v4471_v35 = vsub.f32 %v9888_v56, %v4470_v36 }
0x14c3   :  { %v9958_v22 = vpop.eup %8197  ;;  %v4472_v19 = vmul.f32 1.442695, %v4471_v35 }
0x14c4   :  { %v4636_v40 = vpop.xlane.xlu0 %4635  ;;  %v3975_v44 = vsel %vm508_vm3, %v9958_v22, 0.0 }
0x14c5   :  { %8203 = vpow2.f32 %v4472_v19  ;;  %v4637_v54 = vsub.f32 %v9892_v9, %v4636_v40  ;;  %3976 = vadd.xlane.f32.xlu1 %v3975_v44 }
0x14c7   :  { %v9963_v48 = vpop.eup %8199  ;;  %v4638_v45 = vmul.f32 1.442695, %v4637_v54 }
0x14c8   :  { %v4802_v59 = vpop.xlane.xlu1 %4801  ;;  %v4142_v47 = vsel %vm508_vm3, %v9963_v48, 0.0 }
0x14c9   :  { %8205 = vpow2.f32 %v4638_v45  ;;  %v4803_v56 = vsub.f32 %v9896_v1, %v4802_v59  ;;  %4143 = vadd.xlane.f32.xlu0 %v4142_v47 }
0x14cb   :  { %v9968_v52 = vpop.eup %8201  ;;  %v4804_v63 = vmul.f32 1.442695, %v4803_v56 }
0x14cc   :  { %v4968_v11 = vpop.xlane.xlu0 %4967  ;;  %v4308_v7 = vsel %vm508_vm3, %v9968_v52, 0.0 }
0x14cd   :  { %8207 = vpow2.f32 %v4804_v63  ;;  %v4969_v9 = vsub.f32 %v9900_v37, %v4968_v11  ;;  %4309 = vadd.xlane.f32.xlu1 %v4308_v7 }
0x14cf   :  { %v9973_v50 = vpop.eup %8203  ;;  %v4970_v51 = vmul.f32 1.442695, %v4969_v9 }
0x14d0   :  { %v5168_v53 = vpop.xlane.xlu1 %5167  ;;  %v4474_v55 = vsel %vm508_vm3, %v9973_v50, 0.0 }
0x14d1   :  { %8209 = vpow2.f32 %v4970_v51  ;;  %v5169_v1 = vsub.f32 %v9904_v41, %v5168_v53  ;;  %4475 = vadd.xlane.f32.xlu0 %v4474_v55 }
0x14d3   :  { %v9978_v17 = vpop.eup %8205  ;;  %v5170_v60 = vmul.f32 1.442695, %v5169_v1 }
0x14d4   :  { %v5331_v49 = vpop.xlane.xlu0 %5330  ;;  %v4640_v61 = vsel %vm508_vm3, %v9978_v17, 0.0 }
0x14d5   :  { %8211 = vpow2.f32 %v5170_v60  ;;  %v5332_v37 = vsub.f32 %v9908_v31, %v5331_v49  ;;  %4641 = vadd.xlane.f32.xlu1 %v4640_v61 }
0x14d7   :  { %v9983_v4 = vpop.eup %8207  ;;  %v5333_v39 = vmul.f32 1.442695, %v5332_v37 }
0x14d8   :  { %v5498_v6 = vpop.xlane.xlu1 %5497  ;;  %v4806_v12 = vsel %vm508_vm3, %v9983_v4, 0.0 }
0x14d9   :  { %8213 = vpow2.f32 %v5333_v39  ;;  %v5499_v41 = vsub.f32 %v9912_v23, %v5498_v6  ;;  %4807 = vadd.xlane.f32.xlu0 %v4806_v12 }
0x14db   :  { %v9988_v13 = vpop.eup %8209  ;;  %v5500_v14 = vmul.f32 1.442695, %v5499_v41 }
0x14dc   :  { %v4972_v18 = vsel %vm508_vm3, %v9988_v13, 0.0  ;;  %v5664_v0 = vpop.xlane.xlu0 %5663 }
0x14dd   :  { %8215 = vpow2.f32 %v5500_v14  ;;  %4973 = vadd.xlane.f32.xlu1 %v4972_v18  ;;  %v5665_v32 = vsub.f32 %v9916_v3, %v5664_v0 }
0x14df   :  { %v9992_v31 = vpop.eup %8211  ;;  %v5666_v30 = vmul.f32 1.442695, %v5665_v32 }
0x14e0   :  { %v5172_v20 = vsel %vm508_vm3, %v9992_v31, 0.0  ;;  %v5830_v62 = vpop.xlane.xlu1 %5829 }
0x14e1   :  { %5173 = vadd.xlane.f32.xlu1 %v5172_v20  ;;  %v5831_v16 = vsub.f32 %v9920_v58, %v5830_v62  ;;  %8217 = vpow2.f32 %v5666_v30 }
0x14e3   :  { %v9996_v46 = vpop.eup %8213  ;;  %v5832_v19 = vmul.f32 1.442695, %v5831_v16 }
0x14e4   :  { %v5335_v23 = vsel %vm508_vm3, %v9996_v46, 0.0  ;;  %v5996_v34 = vpop.xlane.xlu0 %5995 }
0x14e5   :  { %5336 = vadd.xlane.f32.xlu1 %v5335_v23  ;;  %v5997_v36 = vsub.f32 %v9924_v2, %v5996_v34  ;;  %8219 = vpow2.f32 %v5832_v19 }
0x14e7   :  { %v10000_v29 = vpop.eup %8215  ;;  %v5998_v40 = vmul.f32 1.442695, %v5997_v36 }
0x14e8   :  { %v5502_v57 = vsel %vm508_vm3, %v10000_v29, 0.0  ;;  %v6162_v35 = vpop.xlane.xlu1 %6161 }
0x14e9   :  { %5503 = vadd.xlane.f32.xlu0 %v5502_v57  ;;  %v6163_v44 = vsub.f32 %v9928_v8, %v6162_v35  ;;  %8221 = vpow2.f32 %v5998_v40 }
0x14eb   :  { %v6164_v45 = vmul.f32 1.442695, %v6163_v44  ;;  %v10013_v47 = vpop.eup %8217 }
0x14ec   :  { %v6328_v54 = vpop.xlane.xlu0 %6327  ;;  %v5668_v2 = vsel %vm508_vm3, %v10013_v47, 0.0  ;;  %v10037_v51 = vpop.permute.xlu1 %5673 }
0x14ed   :  { %v6329_v59 = vsub.f32 %v9932_v15, %v6328_v54  ;;  %8223 = vpow2.f32 %v6164_v45 }
0x14ef   :  { %v6330_v3 = vmul.f32 1.442695, %v6329_v59  ;;  %v10015_v58 = vpop.eup %8219 }
0x14f0   :  { %v5834_v8 = vsel %vm508_vm3, %v10015_v58, 0.0  ;;  %v10039_v53 = vpop.permute.xlu0 %5507 }
0x14f1   :  { %8225 = vpow2.f32 %v6330_v3 }
0x14f3   :  { %v10019_v56 = vpop.eup %8221 }
0x14f4   :  { %v6000_v63 = vsel %vm508_vm3, %v10019_v56, 0.0 }
0x14f6   :  { %6005 = vrot.lane.b32.xlu1 %v9675_v5, %s8647_s25 }
0x14f7   :  { %v10025_v15 = vpop.eup %8223 }
0x14f8   :  { %v6166_v11 = vsel %vm508_vm3, %v10025_v15, 0.0 }
0x14fb   :  { %v10029_v7 = vpop.eup %8225 }
0x14fc   :  { %v6332_v9 = vsel %vm508_vm3, %v10029_v7, 0.0 }
0x14ff   :  { %5839 = vrot.lane.b32.xlu0 %v9675_v5, %s8646_s16 }
0x151a   :  { %5669 = vadd.xlane.f32.xlu1 %v5668_v2 }
0x151e   :  { %5835 = vadd.xlane.f32.xlu1 %v5834_v8  ;;  %6001 = vadd.xlane.f32.xlu0 %v6000_v63 }
0x1522   :  { %6167 = vadd.xlane.f32.xlu1 %v6166_v11 }
0x1526   :  { %6333 = vadd.xlane.f32.xlu1 %v6332_v9 }
0x1534   :  { %6171 = vrot.lane.b32.xlu0 %v9675_v5, %s8648_s26 }
0x1537   :  { %6337 = vrot.lane.b32.xlu1 %v9675_v5, %s8649_s4 }
0x1552   :  { %v3977_v55 = vpop.xlane.xlu1 %3976 }
0x1553   :  { %8227 = vrcp.f32 %v3977_v55 }
0x1556   :  { %v4144_v1 = vpop.xlane.xlu0 %4143 }
0x1557   :  { %8229 = vrcp.f32 %v4144_v1 }
0x155a   :  { %v4310_v60 = vpop.xlane.xlu1 %4309 }
0x155b   :  { %8231 = vrcp.f32 %v4310_v60 }
0x155d   :  { %v8228_v49 = vpop.eup %8227 }
0x155e   :  { %v3979_v61 = vmul.f32 %v8228_v49, %v9958_v22  ;;  %v4476_v37 = vpop.xlane.xlu0 %4475 }
0x155f   :  { %8233 = vrcp.f32 %v4476_v37 }
0x1560   :  { %7665 = vmatmul.mubr.msk.f32.vlgmr.msra.gmra.mrb[38].mxu1 %vm508_vm3, %v3979_v61 }
0x1561   :  { %v8230_v39 = vpop.eup %8229  ;;  %7673 = vmatpush3.msra.mxu1 %v9944_v38  ;;  %7674 = vmatprep.mubr.msk.f32.mxu1 %vm8636_vm2, %v8635_v43 }
0x1562   :  { %v4146_v6 = vmul.f32 %v8230_v39, %v9963_v48  ;;  %v4642_v12 = vpop.xlane.xlu1 %4641  ;;  %7682 = vmatprep.subr.mxu1 %v8635_v43 }
0x1563   :  { %8235 = vrcp.f32 %v4642_v12  ;;  %v7142_v12 = vld [vmem:[%s10308_s8 + $0x40] sm:$0xff] }
0x1564   :  { %7675 = vmatmul.mubr.msk.f32.vlgmr.msra.gmra.mrb[40].mxu1 %vm508_vm3, %v4146_v6 }
0x1565   :  { %v8232_v41 = vpop.eup %8231  ;;  %7683 = vmatpush3.msra.mxu1 %v9940_v33  ;;  %7684 = vmatprep.mubr.msk.f32.mxu1 %vm8636_vm2, %v8635_v43 }
0x1566   :  { %v4312_v22 = vmul.f32 %v8232_v41, %v9968_v52  ;;  %v4808_v38 = vpop.xlane.xlu0 %4807  ;;  %7692 = vmatprep.subr.mxu1 %v8635_v43  ;;  %v7143_v41 = vld [vmem:[%s10308_s8 + $0x48] sm:$0xff] }
0x1567   :  { %8237 = vrcp.f32 %v4808_v38  ;;  %v7144_v38 = vld [vmem:[%s10308_s8 + $0x50] sm:$0xff] }
0x1568   :  { %7685 = vmatmul.mubr.msk.f32.vlgmr.msra.gmra.mrb[42].mxu1 %vm508_vm3, %v4312_v22  ;;  %v8003_v22 = vpack.c.bf16 %v7143_v41, %v7142_v12 }
0x1569   :  { %v8234_v48 = vpop.eup %8233  ;;  %7693 = vmatpush3.msra.mxu1 %v9942_v25  ;;  %7694 = vmatprep.mubr.msk.f32.mxu1 %vm8636_vm2, %v8635_v43 }
0x156a   :  { %v4478_v14 = vmul.f32 %v8234_v48, %v9973_v50  ;;  %v4974_v33 = vpop.xlane.xlu1 %4973  ;;  %7702 = vmatprep.subr.mxu1 %v8635_v43  ;;  %8004 = vmatprep.subr.bf16.mxu0 %v8003_v22  ;;  %v7145_v48 = vld [vmem:[%s10308_s8 + $0x58] sm:$0xff] }
0x156b   :  { %8239 = vrcp.f32 %v4974_v33  ;;  %8006 = vmatpush3.bf16.msra.mxu0 %v8003_v22  ;;  %v7146_v33 = vld [vmem:[%s10308_s8 + $0x60] sm:$0xff] }
0x156c   :  { %7695 = vmatmul.mubr.msk.f32.vlgmr.msra.gmra.mrb[44].mxu1 %vm508_vm3, %v4478_v14  ;;  %v8007_v14 = vpack.c.bf16 %v7145_v48, %v7144_v38 }
0x156d   :  { %v8236_v52 = vpop.eup %8235  ;;  %7703 = vmatpush3.msra.mxu1 %v9948_v28  ;;  %7704 = vmatprep.mubr.msk.f32.mxu1 %vm8636_vm2, %v8635_v43 }
0x156e   :  { %v4644_v18 = vmul.f32 %v8236_v52, %v9978_v17  ;;  %v5174_v25 = vpop.xlane.xlu1 %5173  ;;  %7712 = vmatprep.subr.mxu1 %v8635_v43  ;;  %8008 = vmatprep.subr.bf16.mxu0 %v8007_v14  ;;  %v7147_v52 = vld [vmem:[%s10308_s8 + $0x68] sm:$0xff] }
0x156f   :  { %8241 = vrcp.f32 %v5174_v25  ;;  %8010 = vmatpush3.bf16.msra.mxu0 %v8007_v14  ;;  %v7148_v25 = vld [vmem:[%s10308_s8 + $0x70] sm:$0xff]  ;;  %v6595_v14 = vld [vmem:[#allocation13 + $0x40] sm:$0xff] }
0x1570   :  { %7705 = vmatmul.mubr.msk.f32.vlgmr.msra.gmra.mrb[46].mxu1 %vm508_vm3, %v4644_v18  ;;  %v8011_v18 = vpack.c.bf16 %v7147_v52, %v7146_v33  ;;  %v6596_v33 = vld [vmem:[#allocation13 + $0x48] sm:$0xff] }
0x1571   :  { %v8238_v50 = vpop.eup %8237  ;;  %7713 = vmatpush3.msra.mxu1 %v9946_v27  ;;  %7714 = vmatprep.mubr.msk.f32.mxu1 %vm8636_vm2, %v8635_v43  ;;  %v8019_v52 = vpack.c.bf16 %v6596_v33, %v6595_v14 }
0x1572   :  { %v4810_v20 = vmul.f32 %v8238_v50, %v9983_v4  ;;  %v5337_v28 = vpop.xlane.xlu1 %5336  ;;  %7722 = vmatprep.subr.mxu1 %v8635_v43  ;;  %8012 = vmatprep.subr.bf16.mxu0 %v8011_v18  ;;  %v7149_v50 = vld [vmem:[%s10308_s8 + $0x78] sm:$0xff] }
0x1573   :  { %8243 = vrcp.f32 %v5337_v28  ;;  %8014 = vmatpush3.bf16.msra.mxu0 %v8011_v18  ;;  %v8015_v28 = vpack.c.bf16 %v7149_v50, %v7148_v25  ;;  %v6597_v18 = vld [vmem:[#allocation13 + $0x50] sm:$0xff]  ;;  %v6598_v25 = vld [vmem:[#allocation13 + $0x58] sm:$0xff] }
0x1574   :  { %7715 = vmatmul.mubr.msk.f32.vlgmr.msra.gmra.mrb[48].mxu1 %vm508_vm3, %v4810_v20  ;;  %v8023_v50 = vpack.c.bf16 %v6598_v25, %v6597_v18 }
0x1575   :  { %v8240_v17 = vpop.eup %8239  ;;  %7723 = vmatpush3.msra.mxu1 %v9950_v26  ;;  %7724 = vmatprep.mubr.msk.f32.mxu1 %vm8636_vm2, %v8635_v43 }
0x1576   :  { %v4976_v23 = vmul.f32 %v8240_v17, %v9988_v13  ;;  %v5504_v27 = vpop.xlane.xlu0 %5503  ;;  %7732 = vmatprep.subr.mxu1 %v8635_v43  ;;  %8016 = vmatprep.subr.bf16.mxu0 %v8015_v28 }
0x1577   :  { %8245 = vrcp.f32 %v5504_v27  ;;  %8018 = vmatpush3.bf16.msra.mxu0 %v8015_v28  ;;  %v6600_v28 = vld [vmem:[#allocation13 + $0x68] sm:$0xff] }
0x1578   :  { %7725 = vmatmul.mubr.msk.f32.vlgmr.msra.gmra.mrb[50].mxu1 %vm508_vm3, %v4976_v23 }
0x1579   :  { %v8242_v4 = vpop.eup %8241  ;;  %7733 = vmatpush3.msra.mxu1 %v9675_v5  ;;  %7734 = vmatprep.mubr.msk.f32.mxu1 %vm8636_vm2, %v8635_v43 }
0x157a   :  { %v5176_v57 = vmul.f32 %v8242_v4, %v9992_v31  ;;  %7742 = vmatprep.subr.mxu1 %v8635_v43 }
0x157c   :  { %7735 = vmatmul.mubr.msk.f32.vlgmr.msra.gmra.mrb[52].mxu1 %vm508_vm3, %v5176_v57 }
0x157d   :  { %v8244_v26 = vpop.eup %8243  ;;  %7743 = vmatpush3.msra.mxu1 %v9952_v42  ;;  %7744 = vmatprep.mubr.msk.f32.mxu1 %vm8636_vm2, %v8635_v43  ;;  %v6006_v42 = vpop.permute.xlu1 %6005 }
0x157e   :  { %v5339_v13 = vmul.f32 %v8244_v26, %v9996_v46  ;;  %7752 = vmatprep.subr.mxu1 %v8635_v43  ;;  %v5840_v46 = vpop.permute.xlu0 %5839 }
0x1580   :  { %7745 = vmatmul.mubr.msk.f32.vlgmr.msra.gmra.mrb[54].mxu1 %vm508_vm3, %v5339_v13 }
0x1581   :  { %v8246_v5 = vpop.eup %8245  ;;  %7753 = vmatpush3.msra.mxu1 %v10039_v53  ;;  %7754 = vmatprep.mubr.msk.f32.mxu1 %vm8636_vm2, %v8635_v43 }
0x1582   :  { %v5506_v31 = vmul.f32 %v8246_v5, %v10000_v29  ;;  %7762 = vmatprep.subr.mxu1 %v8635_v43 }
0x1584   :  { %7755 = vmatmul.mubr.msk.f32.vlgmr.msra.gmra.mrb[56].mxu1 %vm508_vm3, %v5506_v31 }
0x1585   :  { %7763 = vmatpush3.msra.mxu1 %v10037_v51  ;;  %7764 = vmatprep.mubr.msk.f32.mxu1 %vm8636_vm2, %v8635_v43 }
0x1586   :  { %7772 = vmatprep.subr.mxu1 %v8635_v43 }
0x15a7   :  { %v5670_v0 = vpop.xlane.xlu1 %5669 }
0x15a8   :  { %8247 = vrcp.f32 %v5670_v0 }
0x15ab   :  { %v5836_v32 = vpop.xlane.xlu1 %5835  ;;  %v6002_v62 = vpop.xlane.xlu0 %6001 }
0x15ac   :  { %8249 = vrcp.f32 %v5836_v32 }
0x15ad   :  { %8251 = vrcp.f32 %v6002_v62 }
0x15af   :  { %v6168_v29 = vpop.xlane.xlu1 %6167  ;;  %v6172_v54 = vpop.permute.xlu0 %6171 }
0x15b0   :  { %8253 = vrcp.f32 %v6168_v29 }
0x15b2   :  { %v8248_v34 = vpop.eup %8247 }
0x15b3   :  { %v5672_v16 = vmul.f32 %v8248_v34, %v10013_v47  ;;  %v6334_v30 = vpop.xlane.xlu1 %6333 }
0x15b4   :  { %8255 = vrcp.f32 %v6334_v30 }
0x15b5   :  { %7765 = vmatmul.mubr.msk.f32.vlgmr.msra.gmra.mrb[58].mxu1 %vm508_vm3, %v5672_v16 }
0x15b6   :  { %v8250_v36 = vpop.eup %8249  ;;  %7773 = vmatpush3.msra.mxu1 %v5840_v46  ;;  %7774 = vmatprep.mubr.msk.f32.mxu1 %vm8636_vm2, %v8635_v43 }
0x15b7   :  { %v5838_v35 = vmul.f32 %v8250_v36, %v10015_v58  ;;  %7782 = vmatprep.subr.mxu1 %v8635_v43  ;;  %v8252_v19 = vpop.eup %8251  ;;  %v6338_v3 = vpop.permute.xlu1 %6337 }
0x15b8   :  { %v6004_v40 = vmul.f32 %v8252_v19, %v10019_v56 }
0x15b9   :  { %7775 = vmatmul.mubr.msk.f32.vlgmr.msra.gmra.mrb[60].mxu1 %vm508_vm3, %v5838_v35 }
0x15ba   :  { %7783 = vmatpush3.msra.mxu1 %v6006_v42  ;;  %7784 = vmatprep.mubr.msk.f32.mxu1 %vm8636_vm2, %v8635_v43  ;;  %v8254_v44 = vpop.eup %8253 }
0x15bb   :  { %7792 = vmatprep.subr.mxu1 %v8635_v43  ;;  %v6170_v45 = vmul.f32 %v8254_v44, %v10025_v15 }
0x15bd   :  { %7785 = vmatmul.mubr.msk.f32.vlgmr.msra.gmra.mrb[62].mxu1 %vm508_vm3, %v6004_v40 }
0x15be   :  { %7793 = vmatpush3.msra.mxu1 %v6172_v54  ;;  %7794 = vmatprep.mubr.msk.f32.mxu1 %vm8636_vm2, %v8635_v43  ;;  %v8256_v59 = vpop.eup %8255 }
0x15bf   :  { %7802 = vmatprep.subr.mxu1 %v8635_v43  ;;  %v6336_v47 = vmul.f32 %v8256_v59, %v10029_v7 }
0x15c1   :  { %7795 = vmatmul.mubr.msk.f32.vlgmr.msra.gmra.mrb[64].mxu1 %vm508_vm3, %v6170_v45 }
0x15c2   :  { %7803 = vmatpush3.msra.mxu1 %v6338_v3  ;;  %7804 = vmatprep.mubr.msk.f32.mxu1 %vm8636_vm2, %v8635_v43 }
0x15c3   :  { %8020 = vmatprep.subr.bf16.mxu1 %v8019_v52 }
0x15c5   :  { %7805 = vmatmul.mubr.msk.f32.vlgmr.msra.gmra.mrb[66].mxu1 %vm508_vm3, %v6336_v47 }
0x15c6   :  { %8022 = vmatpush3.bf16.msra.mxu1 %v8019_v52 }
0x15c7   :  { %8024 = vmatprep.subr.bf16.mxu1 %v8023_v50 }
0x15ca   :  { %8026 = vmatpush3.bf16.msra.mxu1 %v8023_v50 }
0x1633   :  { %v4053_v58 = vpop.f32.mrb[38].mxu1 }
0x1634   :  { %v7666_v2 = vpop.f32.mrb[39].mxu1  ;;  %5054 = vrot.lane.b32.xlu0 %v4053_v58, %s10349_s7 }
0x1637   :  { %v4219_v56 = vpop.f32.mrb[40].mxu1 }
0x1638   :  { %5058 = vrot.lane.b32.xlu1 %v4219_v56, %s10345_s23  ;;  %v7676_v8 = vpop.f32.mrb[41].mxu1 }
0x163b   :  { %v4385_v63 = vpop.f32.mrb[42].mxu1 }
0x163c   :  { %5062 = vrot.lane.b32.xlu1 %v4385_v63, %s8640_s17  ;;  %v7686_v15 = vpop.f32.mrb[43].mxu1 }
0x163f   :  { %v4551_v11 = vpop.f32.mrb[44].mxu1 }
0x1640   :  { %5066 = vrot.lane.b32.xlu1 %v4551_v11, %s8639_s2  ;;  %v7696_v43 = vpop.f32.mrb[45].mxu1 }
0x1643   :  { %v4717_v9 = vpop.f32.mrb[46].mxu1 }
0x1644   :  { %5070 = vrot.lane.b32.xlu1 %v4717_v9, %s8644_s13  ;;  %v7706_v7 = vpop.f32.mrb[47].mxu1  ;;  %v7151_v9 = vld [vmem:[%s10309_s9 + $0x1] ss:$0 sm:$0xff] }
0x1647   :  { %v4883_v51 = vpop.f32.mrb[48].mxu1 }
0x1648   :  { %5074 = vrot.lane.b32.xlu1 %v4883_v51, %s8642_s0  ;;  %v7716_v53 = vpop.f32.mrb[49].mxu1 }
0x164b   :  { %v5049_v55 = vpop.f32.mrb[50].mxu1 }
0x164c   :  { %5078 = vrot.lane.b32.xlu1 %v5049_v55, %s8641_s28  ;;  %v7726_v1 = vpop.f32.mrb[51].mxu1 }
0x164f   :  { %v10129_v60 = vpop.f32.mrb[52].mxu1 }
0x1650   :  { %v7736_v49 = vpop.f32.mrb[53].mxu1 }
0x1653   :  { %v5413_v61 = vpop.f32.mrb[54].mxu1 }
0x1654   :  { %6414 = vrot.lane.b32.xlu0 %v5413_v61, %s10349_s7  ;;  %v7746_v37 = vpop.f32.mrb[55].mxu1 }
0x1657   :  { %v5579_v39 = vpop.f32.mrb[56].mxu1 }
0x1658   :  { %6418 = vrot.lane.b32.xlu0 %v5579_v39, %s10345_s23  ;;  %v7756_v6 = vpop.f32.mrb[57].mxu1 }
0x1688   :  { %v5745_v20 = vpop.f32.mrb[58].mxu1 }
0x1689   :  { %6422 = vrot.lane.b32.xlu0 %v5745_v20, %s8640_s17  ;;  %v7766_v17 = vpop.f32.mrb[59].mxu1  ;;  %v6599_v20 = vld [vmem:[#allocation13 + $0x60] sm:$0xff] }
0x168a   :  { %v8027_v17 = vpack.c.bf16 %v6600_v28, %v6599_v20 }
0x168c   :  { %v5911_v23 = vpop.f32.mrb[60].mxu1  ;;  %8028 = vmatprep.subr.bf16.mxu1 %v8027_v17 }
0x168d   :  { %6426 = vrot.lane.b32.xlu0 %v5911_v23, %s8639_s2  ;;  %v7776_v27 = vpop.f32.mrb[61].mxu1  ;;  %8030 = vmatpush3.bf16.msra.mxu1 %v8027_v17  ;;  %v6601_v23 = vld [vmem:[#allocation13 + $0x70] sm:$0xff] }
0x168e   :  { %v6602_v27 = vld [vmem:[#allocation13 + $0x78] sm:$0xff] }
0x1690   :  { %v6077_v4 = vpop.f32.mrb[62].mxu1 }
0x1691   :  { %6430 = vrot.lane.b32.xlu0 %v6077_v4, %s8644_s13  ;;  %v7786_v57 = vpop.f32.mrb[63].mxu1  ;;  %v8031_v4 = vpack.c.bf16 %v6602_v27, %v6601_v23 }
0x1692   :  { %v7159_v57 = vld [vmem:[%s10314_s14 + $0x80] sm:$0xff] }
0x1693   :  { %8032 = vmatprep.subr.bf16.mxu1 %v8031_v4 }
0x1694   :  { %v6243_v26 = vpop.f32.mrb[64].mxu1  ;;  %8034 = vmatpush3.bf16.msra.mxu1 %v8031_v4 }
0x1695   :  { %6434 = vrot.lane.b32.xlu0 %v6243_v26, %s8642_s0  ;;  %v7796_v13 = vpop.f32.mrb[65].mxu1  ;;  %v7160_v26 = vld [vmem:[%s10314_s14 + $0x88] sm:$0xff] }
0x1696   :  { %v7161_v13 = vld [vmem:[%s10314_s14 + $0x90] sm:$0xff] }
0x1698   :  { %v6409_v5 = vpop.f32.mrb[66].mxu1 }
0x1699   :  { %6438 = vrot.lane.b32.xlu1 %v6409_v5, %s8641_s28  ;;  %v7806_v31 = vpop.f32.mrb[67].mxu1  ;;  %v8035_v5 = vpack.c.bf16 %v7160_v26, %v7159_v57 }
0x169a   :  { %v7162_v31 = vld [vmem:[%s10314_s14 + $0x98] sm:$0xff] }
0x169b   :  { %8036 = vmatprep.subr.bf16.mxu0 %v8035_v5 }
0x16a6   :  { %v5055_v32 = vpop.permute.xlu0 %5054 }
0x16a7   :  { %v5081_v29 = vsel %vm508_vm3, %v9874_v24, %v5055_v32 }
0x16aa   :  { %v5059_v42 = vpop.permute.xlu1 %5058 }
0x16ab   :  { %v5082_v34 = vsel %vm1860_vm4, %v5081_v29, %v5059_v42  ;;  %v8039_v42 = vpack.c.bf16 %v7162_v31, %v7161_v13  ;;  %v7166_v29 = vld [vmem:[%s10314_s14 + $0xb8] sm:$0xff]  ;;  %v6842_v13 = vld [vmem:[%s10318_s18] sm:$0xff] }
0x16ae   :  { %v5063_v46 = vpop.permute.xlu1 %5062 }
0x16af   :  { %v5083_v30 = vsel %vm1862_vm5, %v5082_v34, %v5063_v46  ;;  %v7163_v46 = vld [vmem:[%s10314_s14 + $0xa0] sm:$0xff] }
0x16b2   :  { %v5067_v0 = vpop.permute.xlu1 %5066 }
0x16b3   :  { %v5084_v36 = vsel %vm263_vm0, %v5083_v30, %v5067_v0  ;;  %v7164_v0 = vld [vmem:[%s10314_s14 + $0xa8] sm:$0xff] }
0x16b4   :  { %v8043_v32 = vpack.c.bf16 %v7164_v0, %v7163_v46  ;;  %v7168_v30 = vld [vmem:[%s10314_s14 + $0xc8] sm:$0xff]  ;;  %v6845_v46 = vld [vmem:[%s10318_s18 + $0x18] sm:$0xff] }
0x16b6   :  { %v5071_v62 = vpop.permute.xlu1 %5070 }
0x16b7   :  { %v5085_v35 = vsel %vm1865_vm6, %v5084_v36, %v5071_v62  ;;  %v7165_v62 = vld [vmem:[%s10314_s14 + $0xb0] sm:$0xff] }
0x16b8   :  { %v8047_v34 = vpack.c.bf16 %v7166_v29, %v7165_v62  ;;  %v6847_v62 = vld [vmem:[%s10318_s18 + $0x28] sm:$0xff] }
0x16ba   :  { %v5075_v16 = vpop.permute.xlu1 %5074 }
0x16bb   :  { %v5086_v19 = vsel %vm1867_vm7, %v5085_v35, %v5075_v16  ;;  %v7167_v16 = vld [vmem:[%s10314_s14 + $0xc0] sm:$0xff]  ;;  %v7169_v35 = vld [vmem:[%s10314_s14 + $0xd0] sm:$0xff] }
0x16bc   :  { %v8051_v36 = vpack.c.bf16 %v7168_v30, %v7167_v16  ;;  %v6849_v16 = vld [vmem:[%s10318_s18 + $0x38] sm:$0xff] }
0x16be   :  { %v5079_v40 = vpop.permute.xlu1 %5078 }
0x16bf   :  { %v5087_v44 = vsel %vm1869_vm8, %v5086_v19, %v5079_v40  ;;  %v7170_v19 = vld [vmem:[%s10314_s14 + $0xd8] sm:$0xff] }
0x16c0   :  { %7823 = vmatprep.mubr.msk.f32.mxu0 %vm347_vm1, %v5087_v44  ;;  %v8055_v40 = vpack.c.bf16 %v7170_v19, %v7169_v35  ;;  %v7171_v44 = vld [vmem:[%s10314_s14 + $0xe0] sm:$0xff] }
0x16c6   :  { %v6415_v54 = vpop.permute.xlu0 %6414 }
0x16c7   :  { %v6441_v47 = vsel %vm508_vm3, %v10129_v60, %v6415_v54  ;;  %v7172_v54 = vld [vmem:[%s10314_s14 + $0xe8] sm:$0xff] }
0x16ca   :  { %v6419_v45 = vpop.permute.xlu0 %6418 }
0x16cb   :  { %v6442_v58 = vsel %vm1860_vm4, %v6441_v47, %v6419_v45  ;;  %v8059_v45 = vpack.c.bf16 %v7172_v54, %v7171_v44 }
0x16fb   :  { %v6423_v59 = vpop.permute.xlu0 %6422 }
0x16fc   :  { %v6443_v2 = vsel %vm1862_vm5, %v6442_v58, %v6423_v59 }
0x16ff   :  { %v6427_v24 = vpop.permute.xlu0 %6426 }
0x1700   :  { %v6444_v8 = vsel %vm263_vm0, %v6443_v2, %v6427_v24 }
0x1703   :  { %v6431_v3 = vpop.permute.xlu0 %6430 }
0x1704   :  { %v6445_v63 = vsel %vm1865_vm6, %v6444_v8, %v6431_v3  ;;  %v7154_v8 = vld [vmem:[#allocation10 + $0x1] ss:$0 sm:$0xff] }
0x1707   :  { %v6435_v56 = vpop.permute.xlu0 %6434 }
0x1708   :  { %v6446_v15 = vsel %vm1867_vm7, %v6445_v63, %v6435_v56 }
0x170b   :  { %v6439_v11 = vpop.permute.xlu1 %6438 }
0x170c   :  { %v6447_v43 = vsel %vm1869_vm8, %v6446_v15, %v6439_v11  ;;  %v7155_v15 = vld [vmem:[#allocation11 + $0x1] ss:$0 sm:$0xff] }
0x170d   :  { %7824 = vmatmul.mubr.msk.f32.vlgmr.msra.gmra.mrb[76].mxu0 %vm347_vm1, %v6447_v43 }
0x170e   :  { %8038 = vmatpush3.bf16.msra.mxu0 %v8035_v5  ;;  %v6843_v5 = vld [vmem:[%s10318_s18 + $0x8] sm:$0xff] }
0x170f   :  { %8040 = vmatprep.subr.bf16.mxu0 %v8039_v42  ;;  %v8067_v31 = vpack.c.bf16 %v6843_v5, %v6842_v13 }
0x1711   :  { %8068 = vmatprep.subr.bf16.mxu1 %v8067_v31 }
0x1712   :  { %8042 = vmatpush3.bf16.msra.mxu0 %v8039_v42  ;;  %v6844_v42 = vld [vmem:[%s10318_s18 + $0x10] sm:$0xff] }
0x1713   :  { %8044 = vmatprep.subr.bf16.mxu0 %v8043_v32  ;;  %v8071_v0 = vpack.c.bf16 %v6845_v46, %v6844_v42 }
0x1716   :  { %8046 = vmatpush3.bf16.msra.mxu0 %v8043_v32  ;;  %v6846_v32 = vld [vmem:[%s10318_s18 + $0x20] sm:$0xff] }
0x1717   :  { %8048 = vmatprep.subr.bf16.mxu0 %v8047_v34  ;;  %v8075_v29 = vpack.c.bf16 %v6847_v62, %v6846_v32 }
0x171a   :  { %8050 = vmatpush3.bf16.msra.mxu0 %v8047_v34  ;;  %v6848_v34 = vld [vmem:[%s10318_s18 + $0x30] sm:$0xff]  ;;  %s8650_s18 = smov [#allocation25]  }
0x171b   :  { %8052 = vmatprep.subr.bf16.mxu0 %v8051_v36  ;;  %v8079_v30 = vpack.c.bf16 %v6849_v16, %v6848_v34  ;;  %s6990_s3 = sshll.u32 %s8650_s18, 4  ;;  %s6991_s3 = int_to_ptr.vmem [resolvable:$true] %s6990_s3 }
0x171c   :  { %s8577_s11 = scalar_lea.vmem %s6991_s3, 256  ;;  %p8582_p1 = scmp.lt.s32.totalorder %s6991_s3, %s6991_s3 }
0x171d   :  { %p8578_p0 = scmp.ne.s32.totalorder %s6991_s3, %s8577_s11  ;;  %p8583_p2 = scmp.lt.s32.totalorder %s8577_s11, %s8577_s11 }
0x171e   :  { %8054 = vmatpush3.bf16.msra.mxu0 %v8051_v36 }
0x171f   :  { %8056 = vmatprep.subr.bf16.mxu0 %v8055_v40  ;;  %p8584_p3 = por %p8583_p2, %p8582_p1 }
0x1721   :  { %p8585_p4 = pnand %p8584_p3, %p8578_p0 }
0x1722   :  { %8058 = vmatpush3.bf16.msra.mxu0 %v8055_v40 }
0x1723   :  { %8060 = vmatprep.subr.bf16.mxu0 %v8059_v45 }
0x1726   :  { %8062 = vmatpush3.bf16.msra.mxu0 %v8059_v45 }
0x17e0   :  { %v7825_v7 = vpop.f32.mrb[76].mxu0 }
0x17e1   :  { %v6543_v51 = vadd.f32 %v7825_v7, %v7151_v9  ;;  %v6537_v53 = vpop.f32.mrb[77].mxu0 }
0x17e2   :  { %v6538_v55 = vadd.f32 %v7151_v9, %v6537_v53 }
0x17e3   :  { %v6547_v1 = vadd.f32 %v6543_v51, %v9658_v21 }
0x17e4   :  { %v6546_v60 = vadd.f32 %v6538_v55, %v9653_v10  ;;  %v7173_v55 = vld [vmem:[%s10314_s14 + $0xf0] sm:$0xff] }
0x17e5   :  { %v6555_v49 = vsel %vm347_vm1, %v6547_v1, 0.0 }
0x17e6   :  { %6556 = vadd.xlane.f32.xlu1 %v6555_v49  ;;  %v6552_v61 = vsel %vm347_vm1, %v6546_v60, 0.0  ;;  %v7156_v49 = vld [vmem:[#allocation14 + $0x1] ss:$0 sm:$0xff] }
0x17e7   :  { %6553 = vadd.xlane.f32.xlu0 %v6552_v61 }
0x1873   :  { %v6557_v37 = vpop.xlane.xlu1 %6556 }
0x1874   :  { %v6559_v39 = vmul.f32 0.015625, %v6557_v37  ;;  %v6554_v6 = vpop.xlane.xlu0 %6553 }
0x1875   :  { %v6558_v12 = vmul.f32 0.015625, %v6554_v6 }
0x1876   :  { %v10187_v41 = vsub.f32 %v6547_v1, %v6559_v39  ;;  %v7174_v1 = vld [vmem:[%s10314_s14 + $0xf8] sm:$0xff] }
0x1877   :  { %v10189_v22 = vsub.f32 %v6546_v60, %v6558_v12  ;;  %v8063_v60 = vpack.c.bf16 %v7174_v1, %v7173_v55 }
0x1878   :  { %v6563_v10 = vmul.f32 %v10187_v41, %v10187_v41 }
0x1879   :  { %v6562_v38 = vmul.f32 %v10189_v22, %v10189_v22  ;;  %8064 = vmatprep.subr.bf16.mxu0 %v8063_v60 }
0x187a   :  { %v6567_v48 = vsel %vm347_vm1, %v6563_v10, 0.0  ;;  %8066 = vmatpush3.bf16.msra.mxu0 %v8063_v60 }
0x187b   :  { %v6564_v21 = vsel %vm347_vm1, %v6562_v38, 0.0 }
0x187c   :  { %6565 = vadd.xlane.f32.xlu0 %v6564_v21 }
0x1880   :  { %6568 = vadd.xlane.f32.xlu0 %v6567_v48 }
0x1909   :  { %v6566_v59 = vpop.xlane.xlu0 %6565 }
0x190a   :  { %v6570_v24 = vmul.f32 0.015625, %v6566_v59  ;;  %v7176_v59 = vld [vmem:[#allocation17 + $0x1] ss:$0 sm:$0xff] }
0x190c   :  { %v6572_v3 = vadd.f32 1e-05, %v6570_v24 }
0x190d   :  { %v6569_v47 = vpop.xlane.xlu0 %6568 }
0x190e   :  { %8257 = vrsqrt.f32 %v6572_v3  ;;  %v6571_v58 = vmul.f32 0.015625, %v6569_v47 }
0x1910   :  { %v6573_v2 = vadd.f32 1e-05, %v6571_v58  ;;  %v7177_v58 = vld [vmem:[#allocation19 + $0x1] ss:$0 sm:$0xff] }
0x1912   :  { %8259 = vrsqrt.f32 %v6573_v2 }
0x1918   :  { %v8258_v56 = vpop.eup %8257 }
0x1919   :  { %v6576_v63 = vmul.f32 %v8258_v56, %v10189_v22  ;;  %v7175_v22 = vld [vmem:[#allocation16 + $0x1] ss:$0 sm:$0xff] }
0x191b   :  { %v6584_v11 = vmul.f32 %v7154_v8, %v6576_v63 }
0x191c   :  { %v8260_v43 = vpop.eup %8259 }
0x191d   :  { %v6577_v9 = vmul.f32 %v8260_v43, %v10187_v41  ;;  %v6592_v7 = vadd.f32 %v7155_v15, %v6584_v11 }
0x191f   :  { %v6585_v51 = vmul.f32 %v7154_v8, %v6577_v9  ;;  %7842 = vmatprep.mubr.msk.f32.mxu1 %vm347_vm1, %v6592_v7 }
0x1921   :  { %v6593_v53 = vadd.f32 %v7155_v15, %v6585_v51  ;;  %v7178_v15 = vld [vmem:[#allocation20] ss:$0 sm:$0xff] }
0x1923   :  { %7843 = vmatmul.mubr.msk.f32.vlgmr.msra.gmra.mrb[68].mxu1 %vm347_vm1, %v6593_v53 }
0x1924   :  { %8070 = vmatpush3.bf16.msra.mxu1 %v8067_v31 }
0x1925   :  { %8072 = vmatprep.subr.bf16.mxu1 %v8071_v0 }
0x1928   :  { %8074 = vmatpush3.bf16.msra.mxu1 %v8071_v0 }
0x1929   :  { %8076 = vmatprep.subr.bf16.mxu1 %v8075_v29 }
0x192c   :  { %8078 = vmatpush3.bf16.msra.mxu1 %v8075_v29 }
0x192d   :  { %8080 = vmatprep.subr.bf16.mxu1 %v8079_v30 }
0x1930   :  { %8082 = vmatpush3.bf16.msra.mxu1 %v8079_v30 }
0x19f6   :  { %v7844_v61 = vpop.f32.mrb[68].mxu1 }
0x19f7   :  { %v6689_v37 = vadd.f32 %v7844_v61, %v7156_v49  ;;  %v6683_v39 = vpop.f32.mrb[69].mxu1 }
0x19f8   :  { %v6684_v6 = vadd.f32 %v7156_v49, %v6683_v39 }
0x19f9   :  { %v6693_v41 = vmax.f32 %v6689_v37, 0.0 }
0x19fa   :  { %v6692_v12 = vmax.f32 %v6684_v6, 0.0 }
0x19fc   :  { %7877 = vmatprep.mubr.f32.mxu0 %v6692_v12 }
0x19fd   :  { %7878 = vmatmul.mubr.f32.vlgmr.msra.gmra.mrb[78].mxu0 %v6693_v41 }
0x1ad0   :  { %v7879_v38 = vpop.f32.mrb[78].mxu0 }
0x1ad1   :  { %v6791_v21 = vadd.f32 %v7879_v38, %v7175_v22  ;;  %v6785_v10 = vpop.f32.mrb[79].mxu0 }
0x1ad2   :  { %v6786_v48 = vadd.f32 %v7175_v22, %v6785_v10 }
0x1ad3   :  { %v6795_v14 = vadd.f32 %v6791_v21, %v6593_v53 }
0x1ad4   :  { %v6794_v33 = vadd.f32 %v6786_v48, %v6592_v7 }
0x1ad5   :  { %v6803_v52 = vsel %vm347_vm1, %v6795_v14, 0.0 }
0x1ad6   :  { %6804 = vadd.xlane.f32.xlu1 %v6803_v52  ;;  %v6800_v18 = vsel %vm347_vm1, %v6794_v33, 0.0  ;;  %v7181_v52 = vld [vmem:[#allocation22] ss:$0 sm:$0xff] }
0x1ad7   :  { %6801 = vadd.xlane.f32.xlu0 %v6800_v18 }
0x1b63   :  { %v6805_v25 = vpop.xlane.xlu1 %6804 }
0x1b64   :  { %v6807_v50 = vmul.f32 0.015625, %v6805_v25  ;;  %v6802_v20 = vpop.xlane.xlu0 %6801 }
0x1b65   :  { %v6806_v28 = vmul.f32 0.015625, %v6802_v20  ;;  %v7182_v20 = vld [vmem:[#allocation23] ss:$0 sm:$0xff] }
0x1b66   :  { %v6809_v17 = vsub.f32 %v6795_v14, %v6807_v50 }
0x1b67   :  { %v6808_v23 = vsub.f32 %v6794_v33, %v6806_v28 }
0x1b68   :  { %v6811_v27 = vmul.f32 %v6809_v17, %v6809_v17 }
0x1b69   :  { %v6810_v4 = vmul.f32 %v6808_v23, %v6808_v23 }
0x1b6a   :  { %v6815_v57 = vsel %vm347_vm1, %v6811_v27, 0.0 }
0x1b6b   :  { %6816 = vadd.xlane.f32.xlu1 %v6815_v57  ;;  %v6812_v26 = vsel %vm347_vm1, %v6810_v4, 0.0 }
0x1b6c   :  { %6813 = vadd.xlane.f32.xlu0 %v6812_v26 }
0x1bf8   :  { %v6817_v36 = vpop.xlane.xlu1 %6816 }
0x1bf9   :  { %v6819_v35 = vmul.f32 0.015625, %v6817_v36  ;;  %v6814_v19 = vpop.xlane.xlu0 %6813 }
0x1bfa   :  { %v6818_v40 = vmul.f32 0.015625, %v6814_v19 }
0x1bfb   :  { %v6821_v44 = vadd.f32 1e-05, %v6819_v35 }
0x1bfc   :  { %v6820_v54 = vadd.f32 1e-05, %v6818_v40 }
0x1bfd   :  { %8261 = vrsqrt.f32 %v6821_v44 }
0x1bfe   :  { %8263 = vrsqrt.f32 %v6820_v54 }
0x1c07   :  { %v8262_v45 = vpop.eup %8261 }
0x1c08   :  { %v8264_v24 = vpop.eup %8263  ;;  %v6825_v3 = vmul.f32 %v8262_v45, %v6809_v17 }
0x1c09   :  { %v6824_v47 = vmul.f32 %v8264_v24, %v6808_v23 }
0x1c0a   :  { %v6833_v2 = vmul.f32 %v7176_v59, %v6825_v3 }
0x1c0b   :  { %v6832_v56 = vmul.f32 %v7176_v59, %v6824_v47 }
0x1c0c   :  { %v6841_v63 = vadd.f32 %v7177_v58, %v6833_v2 }
0x1c0d   :  { %v6840_v8 = vadd.f32 %v7177_v58, %v6832_v56 }
0x1c0f   :  { %7896 = vmatprep.mubr.msk.f32.mxu1 %vm347_vm1, %v6840_v8 }
0x1c10   :  { %7897 = vmatmul.mubr.msk.f32.vlgmr.msra.gmra.mrb[70].mxu1 %vm347_vm1, %v6841_v63 }
0x1ce3   :  { %v7898_v11 = vpop.f32.mrb[70].mxu1 }
0x1ce4   :  { %v6935_v43 = vadd.f32 %v7898_v11, %v7178_v15  ;;  %v6929_v9 = vpop.f32.mrb[71].mxu1 }
0x1ce5   :  { %v6930_v7 = vadd.f32 %v7178_v15, %v6929_v9 }
0x1ce6   :  { %v6943_v51 = vsel %vm263_vm0, %v6935_v43, 0.0 }
0x1ce7   :  { %6944 = vadd.xlane.f32.xlu1 %v6943_v51  ;;  %v6940_v53 = vsel %vm263_vm0, %v6930_v7, 0.0 }
0x1ce8   :  { %6941 = vadd.xlane.f32.xlu0 %v6940_v53 }
0x1d74   :  { %v6945_v55 = vpop.xlane.xlu1 %6944 }
0x1d75   :  { %v6948_v1 = vmul.f32 0.03125, %v6945_v55  ;;  %v6942_v60 = vpop.xlane.xlu0 %6941 }
0x1d76   :  { %v6947_v49 = vmul.f32 0.03125, %v6942_v60 }
0x1d77   :  { %v6950_v61 = vsub.f32 %v6935_v43, %v6948_v1 }
0x1d78   :  { %v6949_v37 = vsub.f32 %v6930_v7, %v6947_v49 }
0x1d79   :  { %v6952_v39 = vmul.f32 %v6950_v61, %v6950_v61 }
0x1d7a   :  { %v6951_v6 = vmul.f32 %v6949_v37, %v6949_v37 }
0x1d7b   :  { %v6956_v12 = vsel %vm263_vm0, %v6952_v39, 0.0 }
0x1d7c   :  { %6957 = vadd.xlane.f32.xlu1 %v6956_v12  ;;  %v6953_v41 = vsel %vm263_vm0, %v6951_v6, 0.0 }
0x1d7d   :  { %6954 = vadd.xlane.f32.xlu0 %v6953_v41 }
0x1e09   :  { %v6958_v22 = vpop.xlane.xlu1 %6957 }
0x1e0a   :  { %v6960_v38 = vmul.f32 0.03125, %v6958_v22  ;;  %v6955_v21 = vpop.xlane.xlu0 %6954 }
0x1e0b   :  { %v6959_v10 = vmul.f32 0.03125, %v6955_v21 }
0x1e0c   :  { %v6962_v48 = vadd.f32 1e-05, %v6960_v38 }
0x1e0d   :  { %v6961_v14 = vadd.f32 1e-05, %v6959_v10 }
0x1e0e   :  { %8265 = vrsqrt.f32 %v6962_v48 }
0x1e0f   :  { %8267 = vrsqrt.f32 %v6961_v14 }
0x1e18   :  { %v8266_v33 = vpop.eup %8265 }
0x1e19   :  { %v8268_v18 = vpop.eup %8267  ;;  %v6966_v25 = vmul.f32 %v8266_v33, %v6950_v61 }
0x1e1a   :  { %v6965_v50 = vmul.f32 %v8268_v18, %v6949_v37 }
0x1e1b   :  { %v6974_v28 = vmul.f32 %v7181_v52, %v6966_v25 }
0x1e1c   :  { %v6973_v17 = vmul.f32 %v7181_v52, %v6965_v50 }
0x1e1d   :  { %v6982_v23 = vadd.f32 %v7182_v20, %v6974_v28 }
0x1e1e   :  { %v6981_v27 = vadd.f32 %v7182_v20, %v6973_v17 }
0x1e1f   :  { %6984 = vst.msk [vmem:[#allocation25 + $0x8] sm:$0xff] %vm263_vm0, %v6982_v23 }
0x1e20   :  { %6983 = vst.msk [vmem:[#allocation25] sm:$0xff] %vm263_vm0, %v6981_v27 }
0x1e21   :  { %8588 = shalt.err (!%p8585_p4)
}
0x1e22   :  { %s8589_s12 = scalar_lea.hbm %s10322_s22, 256 }
0x1e23   :  { %p8590_p5 = scmp.ne.s32.totalorder %s10322_s22, %s8589_s12  ;;  %p8593_p6 = scmp.lt.u32.totalorder %s8589_s12, %s10322_s22 }
0x1e25   :  { %p8595_p7 = pnand %p8593_p6, %p8590_p5 }
0x1e27   :  { %8598 = shalt.err (!%p8595_p7)
}
0x1e28   :  { %s10350_s28 = smov 128  }
0x1e29   :  { %6996 = dma.vmem_to_hbm [thread:$0]  %s6991_s3, 256, %s10322_s22, [#allocation4], %s10350_s28, %s10350_s28, %s10349_s7  }
0x1e2a   :  { %8615 = dma.done.wait [#allocation4], 256  }
0x1e2b   :  { %8616 = vsyncadd [#allocation4], 4294967040 }
0x1e2c   :  { %7000 = vsyncpa [#allocation3], 1 }
0x1e2d   :  { %7001 = vsyncpa [#allocation6], 1 }
0x1e2e   :  { %7002 = vsyncpa [#allocation9], 1 }
0x1e2f   :  { %7003 = vsyncpa [#allocation12], 1 }
0x1e30   :  { %7004 = vsyncpa [#allocation15], 1 }
0x1e31   :  { %7005 = vsyncpa [#allocation18], 1 }
0x1e32   :  { %7006 = vsyncpa [#allocation21], 1 }
0x1e33   :  { %7007 = vsyncpa [#allocation24], 1 }
0x1e34   :  { %7008 = vsyncpa [#allocation4], 1 }

</bundles_post_ra>
